<compile_context>
chip_gen: v7x
topology: tpu7x:2x2x1
jax: 0.10.0
libtpu: 0.0.40
codegen_flags: <defaults>
</compile_context>

<pallas_src>
import jax
import jax.numpy as jnp
from jax.experimental import pallas as pl
from jax.experimental.pallas import tpu as pltpu

SEQ_LEN = 31
SEQ_PAD = 32
INPUT_SIZE = 100
IN_PAD = 128
HIDDEN = 5
HK = 8                      # padded contraction width for the recurrent / tail dots
GATE_OFF = 32               # per-gate lane offset inside the 128-lane gate block
GATE_W = 4 * GATE_OFF       # 128
OUT_SIZE = 2
OUT_PAD = 128


def _lstm_kernel(x_ref, wih_ref, whh_ref, b_ref, wf_ref, bf_ref, out_ref):
    blk = GATE_OFF

    # --- Hoisted input projection (one matmul for all 31 steps) --------------
    # (32,128)bf16 @ (128,128)bf16 -> f32, + bias.  Kept live: 4 vregs.
    xw = jnp.dot(x_ref[...], wih_ref[...],
                 preferred_element_type=jnp.float32) + b_ref[...]      # (32,128)

    h = jnp.zeros((1, blk), jnp.float32)   # lanes 0..4 real, 5..31 provably 0
    c = jnp.zeros((1, blk), jnp.float32)

    # --- Fully-unrolled 31-step recurrence ------------------------------------
    # Per step: one (1,8)@(8,128) bf16 MXU dot (single column block, K=8 depth),
    # 4 static lane-slice gate extractions (XLU), 3 sigmoid + 2 tanh EUP pushes,
    # a handful of VPU ops.  Pad lanes of h/c stay exactly 0 (zero weight/bias
    # pad columns -> pre=0 -> sigmoid(0)=0.5 multiplies a zero state).
    for t in range(SEQ_LEN):
        pre = xw[t:t + 1, :] + jnp.dot(
            h[:, :HK].astype(jnp.bfloat16), whh_ref[...],
            preferred_element_type=jnp.float32)                        # (1,128)
        i_g = jax.nn.sigmoid(pre[:, 0 * blk:1 * blk])
        f_g = jax.nn.sigmoid(pre[:, 1 * blk:2 * blk])
        g_g = jnp.tanh(pre[:, 2 * blk:3 * blk])
        o_g = jax.nn.sigmoid(pre[:, 3 * blk:4 * blk])
        c = f_g * c + i_g * g_g
        h = o_g * jnp.tanh(c)

    # --- Fused 3-layer MLP tail + exact softmax over the 2 classes ------------
    logits = jnp.dot(h[:, :HK], wf_ref[...],
                     preferred_element_type=jnp.float32) + bf_ref[...]  # (1,128)
    logits = logits - jnp.max(logits, axis=-1, keepdims=True)
    e = jnp.exp(logits)            # padded logit lanes carry bias -1e30 -> exp == 0
    out_ref[...] = e / jnp.sum(e, axis=-1, keepdims=True)   # exact reciprocal


def _pack_params(p):
    """One-time relay of natural-shape parameters into the padded kernel layout."""
    H, I, O = HIDDEN, INPUT_SIZE, OUT_SIZE

    def relay_gates(w, n_rows, row_pad):
        # w: (n_rows, 4H) dense PyTorch gate order [i,f,g,o] ->
        #    (row_pad, 128) with gate g occupying lanes [g*32, g*32 + H).
        out = jnp.zeros((row_pad, GATE_W), jnp.float32)
        for g in range(4):
            out = out.at[:n_rows, g * GATE_OFF:g * GATE_OFF + H].set(
                w[:, g * H:(g + 1) * H])
        return out

    wih = relay_gates(p["w_ih"], I, IN_PAD).astype(jnp.bfloat16)    # (128, 128)
    whh = relay_gates(p["w_hh"], H, HK).astype(jnp.bfloat16)        # (8, 128)
    b = jnp.zeros((1, GATE_W), jnp.float32)
    for g in range(4):
        b = b.at[:, g * GATE_OFF:g * GATE_OFF + H].set(
            p["b_gates"][:, g * H:(g + 1) * H])

    # Fuse the affine stack: ((x@W1+b1)@W2+b2)@W3+b3 == x@Wf + bf (exact; the
    # reference module has no nonlinearity between linear/linear2/linear3).
    wf = p["w1"] @ p["w2"] @ p["w3"]                                # (5, 2)
    bf = (p["b1"] @ p["w2"] + p["b2"]) @ p["w3"] + p["b3"]          # (1, 2)
    wf_pad = jnp.zeros((HK, OUT_PAD), jnp.float32).at[:H, :O].set(wf)
    bf_pad = jnp.full((1, OUT_PAD), -1e30, jnp.float32).at[:, :O].set(bf)
    return wih, whh, b, wf_pad, bf_pad


@jax.jit
def _forward_packed(x, wih, whh, b, wf, bf):
    """x: (31, 100) float32, weights already packed. Returns probabilities (2,)."""
    x_pad = (jnp.zeros((SEQ_PAD, IN_PAD), jnp.bfloat16)
             .at[:SEQ_LEN, :INPUT_SIZE].set(x.astype(jnp.bfloat16)))

    vmem = pl.BlockSpec(memory_space=pltpu.MemorySpace.VMEM)
    out = pl.pallas_call(
        _lstm_kernel,
        out_shape=jax.ShapeDtypeStruct((1, OUT_PAD), jnp.float32),
        in_specs=[vmem] * 6,
        out_specs=vmem,
    )(x_pad, wih, whh, b, wf, bf)
    return out[0, :OUT_SIZE]   # == softmax(predictions[-1], dim=0)


def lstm_forward(x, params):
    """Convenience wrapper: pack (once) and run."""
    return _forward_packed(x, *_pack_params(params))


def init_params(key):
    """Deterministic synthetic parameters with PyTorch-default-like uniform init."""
    H, I, O = HIDDEN, INPUT_SIZE, OUT_SIZE
    k = 1.0 / jnp.sqrt(jnp.float32(H))
    keys = jax.random.split(key, 12)
    u = lambda kk, shape, bound: jax.random.uniform(
        kk, shape, jnp.float32, minval=-bound, maxval=bound)
    # LSTM weights: PyTorch stores (4H, in)/(4H, H); we pre-transpose to (in, 4H).
    w_ih = u(keys[0], (I, 4 * H), k)
    w_hh = u(keys[1], (H, 4 * H), k)
    b_ih = u(keys[2], (1, 4 * H), k)
    b_hh = u(keys[3], (1, 4 * H), k)
    # Linear layers: stored as (in, out) for x @ W.
    w1 = u(keys[4], (H, H), k)
    b1 = u(keys[5], (1, H), k)
    w2 = u(keys[6], (H, H), k)
    b2 = u(keys[7], (1, H), k)
    w3 = u(keys[8], (H, O), k)
    b3 = u(keys[9], (1, O), k)
    return {
        "w_ih": w_ih, "w_hh": w_hh, "b_gates": b_ih + b_hh,
        "w1": w1, "b1": b1, "w2": w2, "b2": b2, "w3": w3, "b3": b3,
    }


if __name__ == "__main__":
    key = jax.random.PRNGKey(0)
    k_x, k_p = jax.random.split(key)
    # Module's forward hard-codes view(1, 31, 100) -> supply (31, 100).
    x = jax.random.normal(k_x, (SEQ_LEN, INPUT_SIZE), jnp.float32)
    params = init_params(k_p)

    packed = _pack_params(params)          # one-time weight relay / padding
    y = _forward_packed(x, *packed)
    y = jax.block_until_ready(y)

    assert y.shape == (OUT_SIZE,)
    assert bool(jnp.isfinite(y).all())
    assert abs(float(jnp.sum(y)) - 1.0) < 1e-5   # exact-division softmax sums to 1
    print("KERNEL_OK")
</pallas_src>

<mosaic_0001>
module attributes {stable_mosaic.version = 11 : i64} {
  func.func @_lstm_kernel(%arg0: memref<32x128xbf16, #tpu.memory_space<vmem>>, %arg1: memref<128x128xbf16, #tpu.memory_space<vmem>>, %arg2: memref<8x128xbf16, #tpu.memory_space<vmem>>, %arg3: memref<1x128xf32, #tpu.memory_space<vmem>>, %arg4: memref<8x128xf32, #tpu.memory_space<vmem>>, %arg5: memref<1x128xf32, #tpu.memory_space<vmem>>, %arg6: memref<1x128xf32, #tpu.memory_space<vmem>>) attributes {dimension_semantics = [], scalar_prefetch = 0 : i64, scratch_operands = 0 : i64, tpu.core_type = #tpu.core_type<tc>} {
    %c0 = arith.constant 0 : index
    %c0_0 = arith.constant 0 : index
    %0 = vector.load %arg0[%c0, %c0_0] : memref<32x128xbf16, #tpu.memory_space<vmem>>, vector<32x128xbf16>
    %c0_1 = arith.constant 0 : index
    %c0_2 = arith.constant 0 : index
    %1 = vector.load %arg1[%c0_1, %c0_2] : memref<128x128xbf16, #tpu.memory_space<vmem>>, vector<128x128xbf16>
    %cst = arith.constant dense<0.000000e+00> : vector<32x128xf32>
    %2 = tpu.matmul %0, %1, %cst {dimension_numbers = #tpu.dot_dimension_numbers<[1], [0], [0], [1], [0, 0, 1, 1], [], []>} : vector<32x128xbf16>, vector<128x128xbf16>, vector<32x128xf32> -> vector<32x128xf32>
    %c0_3 = arith.constant 0 : index
    %c0_4 = arith.constant 0 : index
    %3 = vector.load %arg3[%c0_3, %c0_4] : memref<1x128xf32, #tpu.memory_space<vmem>>, vector<1x128xf32>
    %4 = vector.broadcast %3 : vector<1x128xf32> to vector<32x128xf32>
    %5 = arith.addf %2, %4 : vector<32x128xf32>
    %cst_5 = arith.constant 0.000000e+00 : f32
    %6 = vector.broadcast %cst_5 : f32 to vector<1x32xf32>
    %cst_6 = arith.constant 0.000000e+00 : f32
    %7 = vector.broadcast %cst_6 : f32 to vector<1x32xf32>
    %8 = vector.extract_strided_slice %5 {offsets = [0, 0], sizes = [1, 128], strides = [1, 1]} : vector<32x128xf32> to vector<1x128xf32>
    %9 = vector.extract_strided_slice %6 {offsets = [0, 0], sizes = [1, 8], strides = [1, 1]} : vector<1x32xf32> to vector<1x8xf32>
    %10 = arith.truncf %9 : vector<1x8xf32> to vector<1x8xbf16>
    %c0_7 = arith.constant 0 : index
    %c0_8 = arith.constant 0 : index
    %11 = vector.load %arg2[%c0_7, %c0_8] : memref<8x128xbf16, #tpu.memory_space<vmem>>, vector<8x128xbf16>
    %cst_9 = arith.constant dense<0.000000e+00> : vector<1x128xf32>
    %12 = tpu.matmul %10, %11, %cst_9 {dimension_numbers = #tpu.dot_dimension_numbers<[1], [0], [0], [1], [0, 0, 1, 1], [], []>} : vector<1x8xbf16>, vector<8x128xbf16>, vector<1x128xf32> -> vector<1x128xf32>
    %13 = arith.addf %8, %12 : vector<1x128xf32>
    %14 = vector.extract_strided_slice %13 {offsets = [0, 0], sizes = [1, 32], strides = [1, 1]} : vector<1x128xf32> to vector<1x32xf32>
    %15 = arith.negf %14 : vector<1x32xf32>
    %16 = math.exp %15 : vector<1x32xf32>
    %cst_10 = arith.constant 1.000000e+00 : f32
    %17 = vector.broadcast %cst_10 : f32 to vector<1x32xf32>
    %18 = arith.addf %17, %16 : vector<1x32xf32>
    %19 = arith.divf %17, %18 : vector<1x32xf32>
    %20 = vector.extract_strided_slice %13 {offsets = [0, 32], sizes = [1, 32], strides = [1, 1]} : vector<1x128xf32> to vector<1x32xf32>
    %21 = arith.negf %20 : vector<1x32xf32>
    %22 = math.exp %21 : vector<1x32xf32>
    %cst_11 = arith.constant 1.000000e+00 : f32
    %23 = vector.broadcast %cst_11 : f32 to vector<1x32xf32>
    %24 = arith.addf %23, %22 : vector<1x32xf32>
    %25 = arith.divf %23, %24 : vector<1x32xf32>
    %26 = vector.extract_strided_slice %13 {offsets = [0, 64], sizes = [1, 32], strides = [1, 1]} : vector<1x128xf32> to vector<1x32xf32>
    %27 = math.tanh %26 : vector<1x32xf32>
    %28 = vector.extract_strided_slice %13 {offsets = [0, 96], sizes = [1, 32], strides = [1, 1]} : vector<1x128xf32> to vector<1x32xf32>
    %29 = arith.negf %28 : vector<1x32xf32>
    %30 = math.exp %29 : vector<1x32xf32>
    %cst_12 = arith.constant 1.000000e+00 : f32
    %31 = vector.broadcast %cst_12 : f32 to vector<1x32xf32>
    %32 = arith.addf %31, %30 : vector<1x32xf32>
    %33 = arith.divf %31, %32 : vector<1x32xf32>
    %34 = arith.mulf %25, %7 : vector<1x32xf32>
    %35 = arith.mulf %19, %27 : vector<1x32xf32>
    %36 = arith.addf %34, %35 : vector<1x32xf32>
    %37 = math.tanh %36 : vector<1x32xf32>
    %38 = arith.mulf %33, %37 : vector<1x32xf32>
    %39 = vector.extract_strided_slice %5 {offsets = [1, 0], sizes = [1, 128], strides = [1, 1]} : vector<32x128xf32> to vector<1x128xf32>
    %40 = vector.extract_strided_slice %38 {offsets = [0, 0], sizes = [1, 8], strides = [1, 1]} : vector<1x32xf32> to vector<1x8xf32>
    %41 = arith.truncf %40 : vector<1x8xf32> to vector<1x8xbf16>
    %c0_13 = arith.constant 0 : index
    %c0_14 = arith.constant 0 : index
    %42 = vector.load %arg2[%c0_13, %c0_14] : memref<8x128xbf16, #tpu.memory_space<vmem>>, vector<8x128xbf16>
    %cst_15 = arith.constant dense<0.000000e+00> : vector<1x128xf32>
    %43 = tpu.matmul %41, %42, %cst_15 {dimension_numbers = #tpu.dot_dimension_numbers<[1], [0], [0], [1], [0, 0, 1, 1], [], []>} : vector<1x8xbf16>, vector<8x128xbf16>, vector<1x128xf32> -> vector<1x128xf32>
    %44 = arith.addf %39, %43 : vector<1x128xf32>
    %45 = vector.extract_strided_slice %44 {offsets = [0, 0], sizes = [1, 32], strides = [1, 1]} : vector<1x128xf32> to vector<1x32xf32>
    %46 = arith.negf %45 : vector<1x32xf32>
    %47 = math.exp %46 : vector<1x32xf32>
    %cst_16 = arith.constant 1.000000e+00 : f32
    %48 = vector.broadcast %cst_16 : f32 to vector<1x32xf32>
    %49 = arith.addf %48, %47 : vector<1x32xf32>
    %50 = arith.divf %48, %49 : vector<1x32xf32>
    %51 = vector.extract_strided_slice %44 {offsets = [0, 32], sizes = [1, 32], strides = [1, 1]} : vector<1x128xf32> to vector<1x32xf32>
    %52 = arith.negf %51 : vector<1x32xf32>
    %53 = math.exp %52 : vector<1x32xf32>
    %cst_17 = arith.constant 1.000000e+00 : f32
    %54 = vector.broadcast %cst_17 : f32 to vector<1x32xf32>
    %55 = arith.addf %54, %53 : vector<1x32xf32>
    %56 = arith.divf %54, %55 : vector<1x32xf32>
    %57 = vector.extract_strided_slice %44 {offsets = [0, 64], sizes = [1, 32], strides = [1, 1]} : vector<1x128xf32> to vector<1x32xf32>
    %58 = math.tanh %57 : vector<1x32xf32>
    %59 = vector.extract_strided_slice %44 {offsets = [0, 96], sizes = [1, 32], strides = [1, 1]} : vector<1x128xf32> to vector<1x32xf32>
    %60 = arith.negf %59 : vector<1x32xf32>
    %61 = math.exp %60 : vector<1x32xf32>
    %cst_18 = arith.constant 1.000000e+00 : f32
    %62 = vector.broadcast %cst_18 : f32 to vector<1x32xf32>
    %63 = arith.addf %62, %61 : vector<1x32xf32>
    %64 = arith.divf %62, %63 : vector<1x32xf32>
    %65 = arith.mulf %56, %36 : vector<1x32xf32>
    %66 = arith.mulf %50, %58 : vector<1x32xf32>
    %67 = arith.addf %65, %66 : vector<1x32xf32>
    %68 = math.tanh %67 : vector<1x32xf32>
    %69 = arith.mulf %64, %68 : vector<1x32xf32>
    %70 = vector.extract_strided_slice %5 {offsets = [2, 0], sizes = [1, 128], strides = [1, 1]} : vector<32x128xf32> to vector<1x128xf32>
    %71 = vector.extract_strided_slice %69 {offsets = [0, 0], sizes = [1, 8], strides = [1, 1]} : vector<1x32xf32> to vector<1x8xf32>
    %72 = arith.truncf %71 : vector<1x8xf32> to vector<1x8xbf16>
    %c0_19 = arith.constant 0 : index
    %c0_20 = arith.constant 0 : index
    %73 = vector.load %arg2[%c0_19, %c0_20] : memref<8x128xbf16, #tpu.memory_space<vmem>>, vector<8x128xbf16>
    %cst_21 = arith.constant dense<0.000000e+00> : vector<1x128xf32>
    %74 = tpu.matmul %72, %73, %cst_21 {dimension_numbers = #tpu.dot_dimension_numbers<[1], [0], [0], [1], [0, 0, 1, 1], [], []>} : vector<1x8xbf16>, vector<8x128xbf16>, vector<1x128xf32> -> vector<1x128xf32>
    %75 = arith.addf %70, %74 : vector<1x128xf32>
    %76 = vector.extract_strided_slice %75 {offsets = [0, 0], sizes = [1, 32], strides = [1, 1]} : vector<1x128xf32> to vector<1x32xf32>
    %77 = arith.negf %76 : vector<1x32xf32>
    %78 = math.exp %77 : vector<1x32xf32>
    %cst_22 = arith.constant 1.000000e+00 : f32
    %79 = vector.broadcast %cst_22 : f32 to vector<1x32xf32>
    %80 = arith.addf %79, %78 : vector<1x32xf32>
    %81 = arith.divf %79, %80 : vector<1x32xf32>
    %82 = vector.extract_strided_slice %75 {offsets = [0, 32], sizes = [1, 32], strides = [1, 1]} : vector<1x128xf32> to vector<1x32xf32>
    %83 = arith.negf %82 : vector<1x32xf32>
    %84 = math.exp %83 : vector<1x32xf32>
    %cst_23 = arith.constant 1.000000e+00 : f32
    %85 = vector.broadcast %cst_23 : f32 to vector<1x32xf32>
    %86 = arith.addf %85, %84 : vector<1x32xf32>
    %87 = arith.divf %85, %86 : vector<1x32xf32>
    %88 = vector.extract_strided_slice %75 {offsets = [0, 64], sizes = [1, 32], strides = [1, 1]} : vector<1x128xf32> to vector<1x32xf32>
    %89 = math.tanh %88 : vector<1x32xf32>
    %90 = vector.extract_strided_slice %75 {offsets = [0, 96], sizes = [1, 32], strides = [1, 1]} : vector<1x128xf32> to vector<1x32xf32>
    %91 = arith.negf %90 : vector<1x32xf32>
    %92 = math.exp %91 : vector<1x32xf32>
    %cst_24 = arith.constant 1.000000e+00 : f32
    %93 = vector.broadcast %cst_24 : f32 to vector<1x32xf32>
    %94 = arith.addf %93, %92 : vector<1x32xf32>
    %95 = arith.divf %93, %94 : vector<1x32xf32>
    %96 = arith.mulf %87, %67 : vector<1x32xf32>
    %97 = arith.mulf %81, %89 : vector<1x32xf32>
    %98 = arith.addf %96, %97 : vector<1x32xf32>
    %99 = math.tanh %98 : vector<1x32xf32>
    %100 = arith.mulf %95, %99 : vector<1x32xf32>
    %101 = vector.extract_strided_slice %5 {offsets = [3, 0], sizes = [1, 128], strides = [1, 1]} : vector<32x128xf32> to vector<1x128xf32>
    %102 = vector.extract_strided_slice %100 {offsets = [0, 0], sizes = [1, 8], strides = [1, 1]} : vector<1x32xf32> to vector<1x8xf32>
    %103 = arith.truncf %102 : vector<1x8xf32> to vector<1x8xbf16>
    %c0_25 = arith.constant 0 : index
    %c0_26 = arith.constant 0 : index
    %104 = vector.load %arg2[%c0_25, %c0_26] : memref<8x128xbf16, #tpu.memory_space<vmem>>, vector<8x128xbf16>
    %cst_27 = arith.constant dense<0.000000e+00> : vector<1x128xf32>
    %105 = tpu.matmul %103, %104, %cst_27 {dimension_numbers = #tpu.dot_dimension_numbers<[1], [0], [0], [1], [0, 0, 1, 1], [], []>} : vector<1x8xbf16>, vector<8x128xbf16>, vector<1x128xf32> -> vector<1x128xf32>
    %106 = arith.addf %101, %105 : vector<1x128xf32>
    %107 = vector.extract_strided_slice %106 {offsets = [0, 0], sizes = [1, 32], strides = [1, 1]} : vector<1x128xf32> to vector<1x32xf32>
    %108 = arith.negf %107 : vector<1x32xf32>
    %109 = math.exp %108 : vector<1x32xf32>
    %cst_28 = arith.constant 1.000000e+00 : f32
    %110 = vector.broadcast %cst_28 : f32 to vector<1x32xf32>
    %111 = arith.addf %110, %109 : vector<1x32xf32>
    %112 = arith.divf %110, %111 : vector<1x32xf32>
    %113 = vector.extract_strided_slice %106 {offsets = [0, 32], sizes = [1, 32], strides = [1, 1]} : vector<1x128xf32> to vector<1x32xf32>
    %114 = arith.negf %113 : vector<1x32xf32>
    %115 = math.exp %114 : vector<1x32xf32>
    %cst_29 = arith.constant 1.000000e+00 : f32
    %116 = vector.broadcast %cst_29 : f32 to vector<1x32xf32>
    %117 = arith.addf %116, %115 : vector<1x32xf32>
    %118 = arith.divf %116, %117 : vector<1x32xf32>
    %119 = vector.extract_strided_slice %106 {offsets = [0, 64], sizes = [1, 32], strides = [1, 1]} : vector<1x128xf32> to vector<1x32xf32>
    %120 = math.tanh %119 : vector<1x32xf32>
    %121 = vector.extract_strided_slice %106 {offsets = [0, 96], sizes = [1, 32], strides = [1, 1]} : vector<1x128xf32> to vector<1x32xf32>
    %122 = arith.negf %121 : vector<1x32xf32>
    %123 = math.exp %122 : vector<1x32xf32>
    %cst_30 = arith.constant 1.000000e+00 : f32
    %124 = vector.broadcast %cst_30 : f32 to vector<1x32xf32>
    %125 = arith.addf %124, %123 : vector<1x32xf32>
    %126 = arith.divf %124, %125 : vector<1x32xf32>
    %127 = arith.mulf %118, %98 : vector<1x32xf32>
    %128 = arith.mulf %112, %120 : vector<1x32xf32>
    %129 = arith.addf %127, %128 : vector<1x32xf32>
    %130 = math.tanh %129 : vector<1x32xf32>
    %131 = arith.mulf %126, %130 : vector<1x32xf32>
    %132 = vector.extract_strided_slice %5 {offsets = [4, 0], sizes = [1, 128], strides = [1, 1]} : vector<32x128xf32> to vector<1x128xf32>
    %133 = vector.extract_strided_slice %131 {offsets = [0, 0], sizes = [1, 8], strides = [1, 1]} : vector<1x32xf32> to vector<1x8xf32>
    %134 = arith.truncf %133 : vector<1x8xf32> to vector<1x8xbf16>
    %c0_31 = arith.constant 0 : index
    %c0_32 = arith.constant 0 : index
    %135 = vector.load %arg2[%c0_31, %c0_32] : memref<8x128xbf16, #tpu.memory_space<vmem>>, vector<8x128xbf16>
    %cst_33 = arith.constant dense<0.000000e+00> : vector<1x128xf32>
    %136 = tpu.matmul %134, %135, %cst_33 {dimension_numbers = #tpu.dot_dimension_numbers<[1], [0], [0], [1], [0, 0, 1, 1], [], []>} : vector<1x8xbf16>, vector<8x128xbf16>, vector<1x128xf32> -> vector<1x128xf32>
    %137 = arith.addf %132, %136 : vector<1x128xf32>
    %138 = vector.extract_strided_slice %137 {offsets = [0, 0], sizes = [1, 32], strides = [1, 1]} : vector<1x128xf32> to vector<1x32xf32>
    %139 = arith.negf %138 : vector<1x32xf32>
    %140 = math.exp %139 : vector<1x32xf32>
    %cst_34 = arith.constant 1.000000e+00 : f32
    %141 = vector.broadcast %cst_34 : f32 to vector<1x32xf32>
    %142 = arith.addf %141, %140 : vector<1x32xf32>
    %143 = arith.divf %141, %142 : vector<1x32xf32>
    %144 = vector.extract_strided_slice %137 {offsets = [0, 32], sizes = [1, 32], strides = [1, 1]} : vector<1x128xf32> to vector<1x32xf32>
    %145 = arith.negf %144 : vector<1x32xf32>
    %146 = math.exp %145 : vector<1x32xf32>
    %cst_35 = arith.constant 1.000000e+00 : f32
    %147 = vector.broadcast %cst_35 : f32 to vector<1x32xf32>
    %148 = arith.addf %147, %146 : vector<1x32xf32>
    %149 = arith.divf %147, %148 : vector<1x32xf32>
    %150 = vector.extract_strided_slice %137 {offsets = [0, 64], sizes = [1, 32], strides = [1, 1]} : vector<1x128xf32> to vector<1x32xf32>
    %151 = math.tanh %150 : vector<1x32xf32>
    %152 = vector.extract_strided_slice %137 {offsets = [0, 96], sizes = [1, 32], strides = [1, 1]} : vector<1x128xf32> to vector<1x32xf32>
    %153 = arith.negf %152 : vector<1x32xf32>
    %154 = math.exp %153 : vector<1x32xf32>
    %cst_36 = arith.constant 1.000000e+00 : f32
    %155 = vector.broadcast %cst_36 : f32 to vector<1x32xf32>
    %156 = arith.addf %155, %154 : vector<1x32xf32>
    %157 = arith.divf %155, %156 : vector<1x32xf32>
    %158 = arith.mulf %149, %129 : vector<1x32xf32>
    %159 = arith.mulf %143, %151 : vector<1x32xf32>
    %160 = arith.addf %158, %159 : vector<1x32xf32>
    %161 = math.tanh %160 : vector<1x32xf32>
    %162 = arith.mulf %157, %161 : vector<1x32xf32>
    %163 = vector.extract_strided_slice %5 {offsets = [5, 0], sizes = [1, 128], strides = [1, 1]} : vector<32x128xf32> to vector<1x128xf32>
    %164 = vector.extract_strided_slice %162 {offsets = [0, 0], sizes = [1, 8], strides = [1, 1]} : vector<1x32xf32> to vector<1x8xf32>
    %165 = arith.truncf %164 : vector<1x8xf32> to vector<1x8xbf16>
    %c0_37 = arith.constant 0 : index
    %c0_38 = arith.constant 0 : index
    %166 = vector.load %arg2[%c0_37, %c0_38] : memref<8x128xbf16, #tpu.memory_space<vmem>>, vector<8x128xbf16>
    %cst_39 = arith.constant dense<0.000000e+00> : vector<1x128xf32>
    %167 = tpu.matmul %165, %166, %cst_39 {dimension_numbers = #tpu.dot_dimension_numbers<[1], [0], [0], [1], [0, 0, 1, 1], [], []>} : vector<1x8xbf16>, vector<8x128xbf16>, vector<1x128xf32> -> vector<1x128xf32>
    %168 = arith.addf %163, %167 : vector<1x128xf32>
    %169 = vector.extract_strided_slice %168 {offsets = [0, 0], sizes = [1, 32], strides = [1, 1]} : vector<1x128xf32> to vector<1x32xf32>
    %170 = arith.negf %169 : vector<1x32xf32>
    %171 = math.exp %170 : vector<1x32xf32>
    %cst_40 = arith.constant 1.000000e+00 : f32
    %172 = vector.broadcast %cst_40 : f32 to vector<1x32xf32>
    %173 = arith.addf %172, %171 : vector<1x32xf32>
    %174 = arith.divf %172, %173 : vector<1x32xf32>
    %175 = vector.extract_strided_slice %168 {offsets = [0, 32], sizes = [1, 32], strides = [1, 1]} : vector<1x128xf32> to vector<1x32xf32>
    %176 = arith.negf %175 : vector<1x32xf32>
    %177 = math.exp %176 : vector<1x32xf32>
    %cst_41 = arith.constant 1.000000e+00 : f32
    %178 = vector.broadcast %cst_41 : f32 to vector<1x32xf32>
    %179 = arith.addf %178, %177 : vector<1x32xf32>
    %180 = arith.divf %178, %179 : vector<1x32xf32>
    %181 = vector.extract_strided_slice %168 {offsets = [0, 64], sizes = [1, 32], strides = [1, 1]} : vector<1x128xf32> to vector<1x32xf32>
    %182 = math.tanh %181 : vector<1x32xf32>
    %183 = vector.extract_strided_slice %168 {offsets = [0, 96], sizes = [1, 32], strides = [1, 1]} : vector<1x128xf32> to vector<1x32xf32>
    %184 = arith.negf %183 : vector<1x32xf32>
    %185 = math.exp %184 : vector<1x32xf32>
    %cst_42 = arith.constant 1.000000e+00 : f32
    %186 = vector.broadcast %cst_42 : f32 to vector<1x32xf32>
    %187 = arith.addf %186, %185 : vector<1x32xf32>
    %188 = arith.divf %186, %187 : vector<1x32xf32>
    %189 = arith.mulf %180, %160 : vector<1x32xf32>
    %190 = arith.mulf %174, %182 : vector<1x32xf32>
    %191 = arith.addf %189, %190 : vector<1x32xf32>
    %192 = math.tanh %191 : vector<1x32xf32>
    %193 = arith.mulf %188, %192 : vector<1x32xf32>
    %194 = vector.extract_strided_slice %5 {offsets = [6, 0], sizes = [1, 128], strides = [1, 1]} : vector<32x128xf32> to vector<1x128xf32>
    %195 = vector.extract_strided_slice %193 {offsets = [0, 0], sizes = [1, 8], strides = [1, 1]} : vector<1x32xf32> to vector<1x8xf32>
    %196 = arith.truncf %195 : vector<1x8xf32> to vector<1x8xbf16>
    %c0_43 = arith.constant 0 : index
    %c0_44 = arith.constant 0 : index
    %197 = vector.load %arg2[%c0_43, %c0_44] : memref<8x128xbf16, #tpu.memory_space<vmem>>, vector<8x128xbf16>
    %cst_45 = arith.constant dense<0.000000e+00> : vector<1x128xf32>
    %198 = tpu.matmul %196, %197, %cst_45 {dimension_numbers = #tpu.dot_dimension_numbers<[1], [0], [0], [1], [0, 0, 1, 1], [], []>} : vector<1x8xbf16>, vector<8x128xbf16>, vector<1x128xf32> -> vector<1x128xf32>
    %199 = arith.addf %194, %198 : vector<1x128xf32>
    %200 = vector.extract_strided_slice %199 {offsets = [0, 0], sizes = [1, 32], strides = [1, 1]} : vector<1x128xf32> to vector<1x32xf32>
    %201 = arith.negf %200 : vector<1x32xf32>
    %202 = math.exp %201 : vector<1x32xf32>
    %cst_46 = arith.constant 1.000000e+00 : f32
    %203 = vector.broadcast %cst_46 : f32 to vector<1x32xf32>
    %204 = arith.addf %203, %202 : vector<1x32xf32>
    %205 = arith.divf %203, %204 : vector<1x32xf32>
    %206 = vector.extract_strided_slice %199 {offsets = [0, 32], sizes = [1, 32], strides = [1, 1]} : vector<1x128xf32> to vector<1x32xf32>
    %207 = arith.negf %206 : vector<1x32xf32>
    %208 = math.exp %207 : vector<1x32xf32>
    %cst_47 = arith.constant 1.000000e+00 : f32
    %209 = vector.broadcast %cst_47 : f32 to vector<1x32xf32>
    %210 = arith.addf %209, %208 : vector<1x32xf32>
    %211 = arith.divf %209, %210 : vector<1x32xf32>
    %212 = vector.extract_strided_slice %199 {offsets = [0, 64], sizes = [1, 32], strides = [1, 1]} : vector<1x128xf32> to vector<1x32xf32>
    %213 = math.tanh %212 : vector<1x32xf32>
    %214 = vector.extract_strided_slice %199 {offsets = [0, 96], sizes = [1, 32], strides = [1, 1]} : vector<1x128xf32> to vector<1x32xf32>
    %215 = arith.negf %214 : vector<1x32xf32>
    %216 = math.exp %215 : vector<1x32xf32>
    %cst_48 = arith.constant 1.000000e+00 : f32
    %217 = vector.broadcast %cst_48 : f32 to vector<1x32xf32>
    %218 = arith.addf %217, %216 : vector<1x32xf32>
    %219 = arith.divf %217, %218 : vector<1x32xf32>
    %220 = arith.mulf %211, %191 : vector<1x32xf32>
    %221 = arith.mulf %205, %213 : vector<1x32xf32>
    %222 = arith.addf %220, %221 : vector<1x32xf32>
    %223 = math.tanh %222 : vector<1x32xf32>
    %224 = arith.mulf %219, %223 : vector<1x32xf32>
    %225 = vector.extract_strided_slice %5 {offsets = [7, 0], sizes = [1, 128], strides = [1, 1]} : vector<32x128xf32> to vector<1x128xf32>
    %226 = vector.extract_strided_slice %224 {offsets = [0, 0], sizes = [1, 8], strides = [1, 1]} : vector<1x32xf32> to vector<1x8xf32>
    %227 = arith.truncf %226 : vector<1x8xf32> to vector<1x8xbf16>
    %c0_49 = arith.constant 0 : index
    %c0_50 = arith.constant 0 : index
    %228 = vector.load %arg2[%c0_49, %c0_50] : memref<8x128xbf16, #tpu.memory_space<vmem>>, vector<8x128xbf16>
    %cst_51 = arith.constant dense<0.000000e+00> : vector<1x128xf32>
    %229 = tpu.matmul %227, %228, %cst_51 {dimension_numbers = #tpu.dot_dimension_numbers<[1], [0], [0], [1], [0, 0, 1, 1], [], []>} : vector<1x8xbf16>, vector<8x128xbf16>, vector<1x128xf32> -> vector<1x128xf32>
    %230 = arith.addf %225, %229 : vector<1x128xf32>
    %231 = vector.extract_strided_slice %230 {offsets = [0, 0], sizes = [1, 32], strides = [1, 1]} : vector<1x128xf32> to vector<1x32xf32>
    %232 = arith.negf %231 : vector<1x32xf32>
    %233 = math.exp %232 : vector<1x32xf32>
    %cst_52 = arith.constant 1.000000e+00 : f32
    %234 = vector.broadcast %cst_52 : f32 to vector<1x32xf32>
    %235 = arith.addf %234, %233 : vector<1x32xf32>
    %236 = arith.divf %234, %235 : vector<1x32xf32>
    %237 = vector.extract_strided_slice %230 {offsets = [0, 32], sizes = [1, 32], strides = [1, 1]} : vector<1x128xf32> to vector<1x32xf32>
    %238 = arith.negf %237 : vector<1x32xf32>
    %239 = math.exp %238 : vector<1x32xf32>
    %cst_53 = arith.constant 1.000000e+00 : f32
    %240 = vector.broadcast %cst_53 : f32 to vector<1x32xf32>
    %241 = arith.addf %240, %239 : vector<1x32xf32>
    %242 = arith.divf %240, %241 : vector<1x32xf32>
    %243 = vector.extract_strided_slice %230 {offsets = [0, 64], sizes = [1, 32], strides = [1, 1]} : vector<1x128xf32> to vector<1x32xf32>
    %244 = math.tanh %243 : vector<1x32xf32>
    %245 = vector.extract_strided_slice %230 {offsets = [0, 96], sizes = [1, 32], strides = [1, 1]} : vector<1x128xf32> to vector<1x32xf32>
    %246 = arith.negf %245 : vector<1x32xf32>
    %247 = math.exp %246 : vector<1x32xf32>
    %cst_54 = arith.constant 1.000000e+00 : f32
    %248 = vector.broadcast %cst_54 : f32 to vector<1x32xf32>
    %249 = arith.addf %248, %247 : vector<1x32xf32>
    %250 = arith.divf %248, %249 : vector<1x32xf32>
    %251 = arith.mulf %242, %222 : vector<1x32xf32>
    %252 = arith.mulf %236, %244 : vector<1x32xf32>
    %253 = arith.addf %251, %252 : vector<1x32xf32>
    %254 = math.tanh %253 : vector<1x32xf32>
    %255 = arith.mulf %250, %254 : vector<1x32xf32>
    %256 = vector.extract_strided_slice %5 {offsets = [8, 0], sizes = [1, 128], strides = [1, 1]} : vector<32x128xf32> to vector<1x128xf32>
    %257 = vector.extract_strided_slice %255 {offsets = [0, 0], sizes = [1, 8], strides = [1, 1]} : vector<1x32xf32> to vector<1x8xf32>
    %258 = arith.truncf %257 : vector<1x8xf32> to vector<1x8xbf16>
    %c0_55 = arith.constant 0 : index
    %c0_56 = arith.constant 0 : index
    %259 = vector.load %arg2[%c0_55, %c0_56] : memref<8x128xbf16, #tpu.memory_space<vmem>>, vector<8x128xbf16>
    %cst_57 = arith.constant dense<0.000000e+00> : vector<1x128xf32>
    %260 = tpu.matmul %258, %259, %cst_57 {dimension_numbers = #tpu.dot_dimension_numbers<[1], [0], [0], [1], [0, 0, 1, 1], [], []>} : vector<1x8xbf16>, vector<8x128xbf16>, vector<1x128xf32> -> vector<1x128xf32>
    %261 = arith.addf %256, %260 : vector<1x128xf32>
    %262 = vector.extract_strided_slice %261 {offsets = [0, 0], sizes = [1, 32], strides = [1, 1]} : vector<1x128xf32> to vector<1x32xf32>
    %263 = arith.negf %262 : vector<1x32xf32>
    %264 = math.exp %263 : vector<1x32xf32>
    %cst_58 = arith.constant 1.000000e+00 : f32
    %265 = vector.broadcast %cst_58 : f32 to vector<1x32xf32>
    %266 = arith.addf %265, %264 : vector<1x32xf32>
    %267 = arith.divf %265, %266 : vector<1x32xf32>
    %268 = vector.extract_strided_slice %261 {offsets = [0, 32], sizes = [1, 32], strides = [1, 1]} : vector<1x128xf32> to vector<1x32xf32>
    %269 = arith.negf %268 : vector<1x32xf32>
    %270 = math.exp %269 : vector<1x32xf32>
    %cst_59 = arith.constant 1.000000e+00 : f32
    %271 = vector.broadcast %cst_59 : f32 to vector<1x32xf32>
    %272 = arith.addf %271, %270 : vector<1x32xf32>
    %273 = arith.divf %271, %272 : vector<1x32xf32>
    %274 = vector.extract_strided_slice %261 {offsets = [0, 64], sizes = [1, 32], strides = [1, 1]} : vector<1x128xf32> to vector<1x32xf32>
    %275 = math.tanh %274 : vector<1x32xf32>
    %276 = vector.extract_strided_slice %261 {offsets = [0, 96], sizes = [1, 32], strides = [1, 1]} : vector<1x128xf32> to vector<1x32xf32>
    %277 = arith.negf %276 : vector<1x32xf32>
    %278 = math.exp %277 : vector<1x32xf32>
    %cst_60 = arith.constant 1.000000e+00 : f32
    %279 = vector.broadcast %cst_60 : f32 to vector<1x32xf32>
    %280 = arith.addf %279, %278 : vector<1x32xf32>
    %281 = arith.divf %279, %280 : vector<1x32xf32>
    %282 = arith.mulf %273, %253 : vector<1x32xf32>
    %283 = arith.mulf %267, %275 : vector<1x32xf32>
    %284 = arith.addf %282, %283 : vector<1x32xf32>
    %285 = math.tanh %284 : vector<1x32xf32>
    %286 = arith.mulf %281, %285 : vector<1x32xf32>
    %287 = vector.extract_strided_slice %5 {offsets = [9, 0], sizes = [1, 128], strides = [1, 1]} : vector<32x128xf32> to vector<1x128xf32>
    %288 = vector.extract_strided_slice %286 {offsets = [0, 0], sizes = [1, 8], strides = [1, 1]} : vector<1x32xf32> to vector<1x8xf32>
    %289 = arith.truncf %288 : vector<1x8xf32> to vector<1x8xbf16>
    %c0_61 = arith.constant 0 : index
    %c0_62 = arith.constant 0 : index
    %290 = vector.load %arg2[%c0_61, %c0_62] : memref<8x128xbf16, #tpu.memory_space<vmem>>, vector<8x128xbf16>
    %cst_63 = arith.constant dense<0.000000e+00> : vector<1x128xf32>
    %291 = tpu.matmul %289, %290, %cst_63 {dimension_numbers = #tpu.dot_dimension_numbers<[1], [0], [0], [1], [0, 0, 1, 1], [], []>} : vector<1x8xbf16>, vector<8x128xbf16>, vector<1x128xf32> -> vector<1x128xf32>
    %292 = arith.addf %287, %291 : vector<1x128xf32>
    %293 = vector.extract_strided_slice %292 {offsets = [0, 0], sizes = [1, 32], strides = [1, 1]} : vector<1x128xf32> to vector<1x32xf32>
    %294 = arith.negf %293 : vector<1x32xf32>
    %295 = math.exp %294 : vector<1x32xf32>
    %cst_64 = arith.constant 1.000000e+00 : f32
    %296 = vector.broadcast %cst_64 : f32 to vector<1x32xf32>
    %297 = arith.addf %296, %295 : vector<1x32xf32>
    %298 = arith.divf %296, %297 : vector<1x32xf32>
    %299 = vector.extract_strided_slice %292 {offsets = [0, 32], sizes = [1, 32], strides = [1, 1]} : vector<1x128xf32> to vector<1x32xf32>
    %300 = arith.negf %299 : vector<1x32xf32>
    %301 = math.exp %300 : vector<1x32xf32>
    %cst_65 = arith.constant 1.000000e+00 : f32
    %302 = vector.broadcast %cst_65 : f32 to vector<1x32xf32>
    %303 = arith.addf %302, %301 : vector<1x32xf32>
    %304 = arith.divf %302, %303 : vector<1x32xf32>
    %305 = vector.extract_strided_slice %292 {offsets = [0, 64], sizes = [1, 32], strides = [1, 1]} : vector<1x128xf32> to vector<1x32xf32>
    %306 = math.tanh %305 : vector<1x32xf32>
    %307 = vector.extract_strided_slice %292 {offsets = [0, 96], sizes = [1, 32], strides = [1, 1]} : vector<1x128xf32> to vector<1x32xf32>
    %308 = arith.negf %307 : vector<1x32xf32>
    %309 = math.exp %308 : vector<1x32xf32>
    %cst_66 = arith.constant 1.000000e+00 : f32
    %310 = vector.broadcast %cst_66 : f32 to vector<1x32xf32>
    %311 = arith.addf %310, %309 : vector<1x32xf32>
    %312 = arith.divf %310, %311 : vector<1x32xf32>
    %313 = arith.mulf %304, %284 : vector<1x32xf32>
    %314 = arith.mulf %298, %306 : vector<1x32xf32>
    %315 = arith.addf %313, %314 : vector<1x32xf32>
    %316 = math.tanh %315 : vector<1x32xf32>
    %317 = arith.mulf %312, %316 : vector<1x32xf32>
    %318 = vector.extract_strided_slice %5 {offsets = [10, 0], sizes = [1, 128], strides = [1, 1]} : vector<32x128xf32> to vector<1x128xf32>
    %319 = vector.extract_strided_slice %317 {offsets = [0, 0], sizes = [1, 8], strides = [1, 1]} : vector<1x32xf32> to vector<1x8xf32>
    %320 = arith.truncf %319 : vector<1x8xf32> to vector<1x8xbf16>
    %c0_67 = arith.constant 0 : index
    %c0_68 = arith.constant 0 : index
    %321 = vector.load %arg2[%c0_67, %c0_68] : memref<8x128xbf16, #tpu.memory_space<vmem>>, vector<8x128xbf16>
    %cst_69 = arith.constant dense<0.000000e+00> : vector<1x128xf32>
    %322 = tpu.matmul %320, %321, %cst_69 {dimension_numbers = #tpu.dot_dimension_numbers<[1], [0], [0], [1], [0, 0, 1, 1], [], []>} : vector<1x8xbf16>, vector<8x128xbf16>, vector<1x128xf32> -> vector<1x128xf32>
    %323 = arith.addf %318, %322 : vector<1x128xf32>
    %324 = vector.extract_strided_slice %323 {offsets = [0, 0], sizes = [1, 32], strides = [1, 1]} : vector<1x128xf32> to vector<1x32xf32>
    %325 = arith.negf %324 : vector<1x32xf32>
    %326 = math.exp %325 : vector<1x32xf32>
    %cst_70 = arith.constant 1.000000e+00 : f32
    %327 = vector.broadcast %cst_70 : f32 to vector<1x32xf32>
    %328 = arith.addf %327, %326 : vector<1x32xf32>
    %329 = arith.divf %327, %328 : vector<1x32xf32>
    %330 = vector.extract_strided_slice %323 {offsets = [0, 32], sizes = [1, 32], strides = [1, 1]} : vector<1x128xf32> to vector<1x32xf32>
    %331 = arith.negf %330 : vector<1x32xf32>
    %332 = math.exp %331 : vector<1x32xf32>
    %cst_71 = arith.constant 1.000000e+00 : f32
    %333 = vector.broadcast %cst_71 : f32 to vector<1x32xf32>
    %334 = arith.addf %333, %332 : vector<1x32xf32>
    %335 = arith.divf %333, %334 : vector<1x32xf32>
    %336 = vector.extract_strided_slice %323 {offsets = [0, 64], sizes = [1, 32], strides = [1, 1]} : vector<1x128xf32> to vector<1x32xf32>
    %337 = math.tanh %336 : vector<1x32xf32>
    %338 = vector.extract_strided_slice %323 {offsets = [0, 96], sizes = [1, 32], strides = [1, 1]} : vector<1x128xf32> to vector<1x32xf32>
    %339 = arith.negf %338 : vector<1x32xf32>
    %340 = math.exp %339 : vector<1x32xf32>
    %cst_72 = arith.constant 1.000000e+00 : f32
    %341 = vector.broadcast %cst_72 : f32 to vector<1x32xf32>
    %342 = arith.addf %341, %340 : vector<1x32xf32>
    %343 = arith.divf %341, %342 : vector<1x32xf32>
    %344 = arith.mulf %335, %315 : vector<1x32xf32>
    %345 = arith.mulf %329, %337 : vector<1x32xf32>
    %346 = arith.addf %344, %345 : vector<1x32xf32>
    %347 = math.tanh %346 : vector<1x32xf32>
    %348 = arith.mulf %343, %347 : vector<1x32xf32>
    %349 = vector.extract_strided_slice %5 {offsets = [11, 0], sizes = [1, 128], strides = [1, 1]} : vector<32x128xf32> to vector<1x128xf32>
    %350 = vector.extract_strided_slice %348 {offsets = [0, 0], sizes = [1, 8], strides = [1, 1]} : vector<1x32xf32> to vector<1x8xf32>
    %351 = arith.truncf %350 : vector<1x8xf32> to vector<1x8xbf16>
    %c0_73 = arith.constant 0 : index
    %c0_74 = arith.constant 0 : index
    %352 = vector.load %arg2[%c0_73, %c0_74] : memref<8x128xbf16, #tpu.memory_space<vmem>>, vector<8x128xbf16>
    %cst_75 = arith.constant dense<0.000000e+00> : vector<1x128xf32>
    %353 = tpu.matmul %351, %352, %cst_75 {dimension_numbers = #tpu.dot_dimension_numbers<[1], [0], [0], [1], [0, 0, 1, 1], [], []>} : vector<1x8xbf16>, vector<8x128xbf16>, vector<1x128xf32> -> vector<1x128xf32>
    %354 = arith.addf %349, %353 : vector<1x128xf32>
    %355 = vector.extract_strided_slice %354 {offsets = [0, 0], sizes = [1, 32], strides = [1, 1]} : vector<1x128xf32> to vector<1x32xf32>
    %356 = arith.negf %355 : vector<1x32xf32>
    %357 = math.exp %356 : vector<1x32xf32>
    %cst_76 = arith.constant 1.000000e+00 : f32
    %358 = vector.broadcast %cst_76 : f32 to vector<1x32xf32>
    %359 = arith.addf %358, %357 : vector<1x32xf32>
    %360 = arith.divf %358, %359 : vector<1x32xf32>
    %361 = vector.extract_strided_slice %354 {offsets = [0, 32], sizes = [1, 32], strides = [1, 1]} : vector<1x128xf32> to vector<1x32xf32>
    %362 = arith.negf %361 : vector<1x32xf32>
    %363 = math.exp %362 : vector<1x32xf32>
    %cst_77 = arith.constant 1.000000e+00 : f32
    %364 = vector.broadcast %cst_77 : f32 to vector<1x32xf32>
    %365 = arith.addf %364, %363 : vector<1x32xf32>
    %366 = arith.divf %364, %365 : vector<1x32xf32>
    %367 = vector.extract_strided_slice %354 {offsets = [0, 64], sizes = [1, 32], strides = [1, 1]} : vector<1x128xf32> to vector<1x32xf32>
    %368 = math.tanh %367 : vector<1x32xf32>
    %369 = vector.extract_strided_slice %354 {offsets = [0, 96], sizes = [1, 32], strides = [1, 1]} : vector<1x128xf32> to vector<1x32xf32>
    %370 = arith.negf %369 : vector<1x32xf32>
    %371 = math.exp %370 : vector<1x32xf32>
    %cst_78 = arith.constant 1.000000e+00 : f32
    %372 = vector.broadcast %cst_78 : f32 to vector<1x32xf32>
    %373 = arith.addf %372, %371 : vector<1x32xf32>
    %374 = arith.divf %372, %373 : vector<1x32xf32>
    %375 = arith.mulf %366, %346 : vector<1x32xf32>
    %376 = arith.mulf %360, %368 : vector<1x32xf32>
    %377 = arith.addf %375, %376 : vector<1x32xf32>
    %378 = math.tanh %377 : vector<1x32xf32>
    %379 = arith.mulf %374, %378 : vector<1x32xf32>
    %380 = vector.extract_strided_slice %5 {offsets = [12, 0], sizes = [1, 128], strides = [1, 1]} : vector<32x128xf32> to vector<1x128xf32>
    %381 = vector.extract_strided_slice %379 {offsets = [0, 0], sizes = [1, 8], strides = [1, 1]} : vector<1x32xf32> to vector<1x8xf32>
    %382 = arith.truncf %381 : vector<1x8xf32> to vector<1x8xbf16>
    %c0_79 = arith.constant 0 : index
    %c0_80 = arith.constant 0 : index
    %383 = vector.load %arg2[%c0_79, %c0_80] : memref<8x128xbf16, #tpu.memory_space<vmem>>, vector<8x128xbf16>
    %cst_81 = arith.constant dense<0.000000e+00> : vector<1x128xf32>
    %384 = tpu.matmul %382, %383, %cst_81 {dimension_numbers = #tpu.dot_dimension_numbers<[1], [0], [0], [1], [0, 0, 1, 1], [], []>} : vector<1x8xbf16>, vector<8x128xbf16>, vector<1x128xf32> -> vector<1x128xf32>
    %385 = arith.addf %380, %384 : vector<1x128xf32>
    %386 = vector.extract_strided_slice %385 {offsets = [0, 0], sizes = [1, 32], strides = [1, 1]} : vector<1x128xf32> to vector<1x32xf32>
    %387 = arith.negf %386 : vector<1x32xf32>
    %388 = math.exp %387 : vector<1x32xf32>
    %cst_82 = arith.constant 1.000000e+00 : f32
    %389 = vector.broadcast %cst_82 : f32 to vector<1x32xf32>
    %390 = arith.addf %389, %388 : vector<1x32xf32>
    %391 = arith.divf %389, %390 : vector<1x32xf32>
    %392 = vector.extract_strided_slice %385 {offsets = [0, 32], sizes = [1, 32], strides = [1, 1]} : vector<1x128xf32> to vector<1x32xf32>
    %393 = arith.negf %392 : vector<1x32xf32>
    %394 = math.exp %393 : vector<1x32xf32>
    %cst_83 = arith.constant 1.000000e+00 : f32
    %395 = vector.broadcast %cst_83 : f32 to vector<1x32xf32>
    %396 = arith.addf %395, %394 : vector<1x32xf32>
    %397 = arith.divf %395, %396 : vector<1x32xf32>
    %398 = vector.extract_strided_slice %385 {offsets = [0, 64], sizes = [1, 32], strides = [1, 1]} : vector<1x128xf32> to vector<1x32xf32>
    %399 = math.tanh %398 : vector<1x32xf32>
    %400 = vector.extract_strided_slice %385 {offsets = [0, 96], sizes = [1, 32], strides = [1, 1]} : vector<1x128xf32> to vector<1x32xf32>
    %401 = arith.negf %400 : vector<1x32xf32>
    %402 = math.exp %401 : vector<1x32xf32>
    %cst_84 = arith.constant 1.000000e+00 : f32
    %403 = vector.broadcast %cst_84 : f32 to vector<1x32xf32>
    %404 = arith.addf %403, %402 : vector<1x32xf32>
    %405 = arith.divf %403, %404 : vector<1x32xf32>
    %406 = arith.mulf %397, %377 : vector<1x32xf32>
    %407 = arith.mulf %391, %399 : vector<1x32xf32>
    %408 = arith.addf %406, %407 : vector<1x32xf32>
    %409 = math.tanh %408 : vector<1x32xf32>
    %410 = arith.mulf %405, %409 : vector<1x32xf32>
    %411 = vector.extract_strided_slice %5 {offsets = [13, 0], sizes = [1, 128], strides = [1, 1]} : vector<32x128xf32> to vector<1x128xf32>
    %412 = vector.extract_strided_slice %410 {offsets = [0, 0], sizes = [1, 8], strides = [1, 1]} : vector<1x32xf32> to vector<1x8xf32>
    %413 = arith.truncf %412 : vector<1x8xf32> to vector<1x8xbf16>
    %c0_85 = arith.constant 0 : index
    %c0_86 = arith.constant 0 : index
    %414 = vector.load %arg2[%c0_85, %c0_86] : memref<8x128xbf16, #tpu.memory_space<vmem>>, vector<8x128xbf16>
    %cst_87 = arith.constant dense<0.000000e+00> : vector<1x128xf32>
    %415 = tpu.matmul %413, %414, %cst_87 {dimension_numbers = #tpu.dot_dimension_numbers<[1], [0], [0], [1], [0, 0, 1, 1], [], []>} : vector<1x8xbf16>, vector<8x128xbf16>, vector<1x128xf32> -> vector<1x128xf32>
    %416 = arith.addf %411, %415 : vector<1x128xf32>
    %417 = vector.extract_strided_slice %416 {offsets = [0, 0], sizes = [1, 32], strides = [1, 1]} : vector<1x128xf32> to vector<1x32xf32>
    %418 = arith.negf %417 : vector<1x32xf32>
    %419 = math.exp %418 : vector<1x32xf32>
    %cst_88 = arith.constant 1.000000e+00 : f32
    %420 = vector.broadcast %cst_88 : f32 to vector<1x32xf32>
    %421 = arith.addf %420, %419 : vector<1x32xf32>
    %422 = arith.divf %420, %421 : vector<1x32xf32>
    %423 = vector.extract_strided_slice %416 {offsets = [0, 32], sizes = [1, 32], strides = [1, 1]} : vector<1x128xf32> to vector<1x32xf32>
    %424 = arith.negf %423 : vector<1x32xf32>
    %425 = math.exp %424 : vector<1x32xf32>
    %cst_89 = arith.constant 1.000000e+00 : f32
    %426 = vector.broadcast %cst_89 : f32 to vector<1x32xf32>
    %427 = arith.addf %426, %425 : vector<1x32xf32>
    %428 = arith.divf %426, %427 : vector<1x32xf32>
    %429 = vector.extract_strided_slice %416 {offsets = [0, 64], sizes = [1, 32], strides = [1, 1]} : vector<1x128xf32> to vector<1x32xf32>
    %430 = math.tanh %429 : vector<1x32xf32>
    %431 = vector.extract_strided_slice %416 {offsets = [0, 96], sizes = [1, 32], strides = [1, 1]} : vector<1x128xf32> to vector<1x32xf32>
    %432 = arith.negf %431 : vector<1x32xf32>
    %433 = math.exp %432 : vector<1x32xf32>
    %cst_90 = arith.constant 1.000000e+00 : f32
    %434 = vector.broadcast %cst_90 : f32 to vector<1x32xf32>
    %435 = arith.addf %434, %433 : vector<1x32xf32>
    %436 = arith.divf %434, %435 : vector<1x32xf32>
    %437 = arith.mulf %428, %408 : vector<1x32xf32>
    %438 = arith.mulf %422, %430 : vector<1x32xf32>
    %439 = arith.addf %437, %438 : vector<1x32xf32>
    %440 = math.tanh %439 : vector<1x32xf32>
    %441 = arith.mulf %436, %440 : vector<1x32xf32>
    %442 = vector.extract_strided_slice %5 {offsets = [14, 0], sizes = [1, 128], strides = [1, 1]} : vector<32x128xf32> to vector<1x128xf32>
    %443 = vector.extract_strided_slice %441 {offsets = [0, 0], sizes = [1, 8], strides = [1, 1]} : vector<1x32xf32> to vector<1x8xf32>
    %444 = arith.truncf %443 : vector<1x8xf32> to vector<1x8xbf16>
    %c0_91 = arith.constant 0 : index
    %c0_92 = arith.constant 0 : index
    %445 = vector.load %arg2[%c0_91, %c0_92] : memref<8x128xbf16, #tpu.memory_space<vmem>>, vector<8x128xbf16>
    %cst_93 = arith.constant dense<0.000000e+00> : vector<1x128xf32>
    %446 = tpu.matmul %444, %445, %cst_93 {dimension_numbers = #tpu.dot_dimension_numbers<[1], [0], [0], [1], [0, 0, 1, 1], [], []>} : vector<1x8xbf16>, vector<8x128xbf16>, vector<1x128xf32> -> vector<1x128xf32>
    %447 = arith.addf %442, %446 : vector<1x128xf32>
    %448 = vector.extract_strided_slice %447 {offsets = [0, 0], sizes = [1, 32], strides = [1, 1]} : vector<1x128xf32> to vector<1x32xf32>
    %449 = arith.negf %448 : vector<1x32xf32>
    %450 = math.exp %449 : vector<1x32xf32>
    %cst_94 = arith.constant 1.000000e+00 : f32
    %451 = vector.broadcast %cst_94 : f32 to vector<1x32xf32>
    %452 = arith.addf %451, %450 : vector<1x32xf32>
    %453 = arith.divf %451, %452 : vector<1x32xf32>
    %454 = vector.extract_strided_slice %447 {offsets = [0, 32], sizes = [1, 32], strides = [1, 1]} : vector<1x128xf32> to vector<1x32xf32>
    %455 = arith.negf %454 : vector<1x32xf32>
    %456 = math.exp %455 : vector<1x32xf32>
    %cst_95 = arith.constant 1.000000e+00 : f32
    %457 = vector.broadcast %cst_95 : f32 to vector<1x32xf32>
    %458 = arith.addf %457, %456 : vector<1x32xf32>
    %459 = arith.divf %457, %458 : vector<1x32xf32>
    %460 = vector.extract_strided_slice %447 {offsets = [0, 64], sizes = [1, 32], strides = [1, 1]} : vector<1x128xf32> to vector<1x32xf32>
    %461 = math.tanh %460 : vector<1x32xf32>
    %462 = vector.extract_strided_slice %447 {offsets = [0, 96], sizes = [1, 32], strides = [1, 1]} : vector<1x128xf32> to vector<1x32xf32>
    %463 = arith.negf %462 : vector<1x32xf32>
    %464 = math.exp %463 : vector<1x32xf32>
    %cst_96 = arith.constant 1.000000e+00 : f32
    %465 = vector.broadcast %cst_96 : f32 to vector<1x32xf32>
    %466 = arith.addf %465, %464 : vector<1x32xf32>
    %467 = arith.divf %465, %466 : vector<1x32xf32>
    %468 = arith.mulf %459, %439 : vector<1x32xf32>
    %469 = arith.mulf %453, %461 : vector<1x32xf32>
    %470 = arith.addf %468, %469 : vector<1x32xf32>
    %471 = math.tanh %470 : vector<1x32xf32>
    %472 = arith.mulf %467, %471 : vector<1x32xf32>
    %473 = vector.extract_strided_slice %5 {offsets = [15, 0], sizes = [1, 128], strides = [1, 1]} : vector<32x128xf32> to vector<1x128xf32>
    %474 = vector.extract_strided_slice %472 {offsets = [0, 0], sizes = [1, 8], strides = [1, 1]} : vector<1x32xf32> to vector<1x8xf32>
    %475 = arith.truncf %474 : vector<1x8xf32> to vector<1x8xbf16>
    %c0_97 = arith.constant 0 : index
    %c0_98 = arith.constant 0 : index
    %476 = vector.load %arg2[%c0_97, %c0_98] : memref<8x128xbf16, #tpu.memory_space<vmem>>, vector<8x128xbf16>
    %cst_99 = arith.constant dense<0.000000e+00> : vector<1x128xf32>
    %477 = tpu.matmul %475, %476, %cst_99 {dimension_numbers = #tpu.dot_dimension_numbers<[1], [0], [0], [1], [0, 0, 1, 1], [], []>} : vector<1x8xbf16>, vector<8x128xbf16>, vector<1x128xf32> -> vector<1x128xf32>
    %478 = arith.addf %473, %477 : vector<1x128xf32>
    %479 = vector.extract_strided_slice %478 {offsets = [0, 0], sizes = [1, 32], strides = [1, 1]} : vector<1x128xf32> to vector<1x32xf32>
    %480 = arith.negf %479 : vector<1x32xf32>
    %481 = math.exp %480 : vector<1x32xf32>
    %cst_100 = arith.constant 1.000000e+00 : f32
    %482 = vector.broadcast %cst_100 : f32 to vector<1x32xf32>
    %483 = arith.addf %482, %481 : vector<1x32xf32>
    %484 = arith.divf %482, %483 : vector<1x32xf32>
    %485 = vector.extract_strided_slice %478 {offsets = [0, 32], sizes = [1, 32], strides = [1, 1]} : vector<1x128xf32> to vector<1x32xf32>
    %486 = arith.negf %485 : vector<1x32xf32>
    %487 = math.exp %486 : vector<1x32xf32>
    %cst_101 = arith.constant 1.000000e+00 : f32
    %488 = vector.broadcast %cst_101 : f32 to vector<1x32xf32>
    %489 = arith.addf %488, %487 : vector<1x32xf32>
    %490 = arith.divf %488, %489 : vector<1x32xf32>
    %491 = vector.extract_strided_slice %478 {offsets = [0, 64], sizes = [1, 32], strides = [1, 1]} : vector<1x128xf32> to vector<1x32xf32>
    %492 = math.tanh %491 : vector<1x32xf32>
    %493 = vector.extract_strided_slice %478 {offsets = [0, 96], sizes = [1, 32], strides = [1, 1]} : vector<1x128xf32> to vector<1x32xf32>
    %494 = arith.negf %493 : vector<1x32xf32>
    %495 = math.exp %494 : vector<1x32xf32>
    %cst_102 = arith.constant 1.000000e+00 : f32
    %496 = vector.broadcast %cst_102 : f32 to vector<1x32xf32>
    %497 = arith.addf %496, %495 : vector<1x32xf32>
    %498 = arith.divf %496, %497 : vector<1x32xf32>
    %499 = arith.mulf %490, %470 : vector<1x32xf32>
    %500 = arith.mulf %484, %492 : vector<1x32xf32>
    %501 = arith.addf %499, %500 : vector<1x32xf32>
    %502 = math.tanh %501 : vector<1x32xf32>
    %503 = arith.mulf %498, %502 : vector<1x32xf32>
    %504 = vector.extract_strided_slice %5 {offsets = [16, 0], sizes = [1, 128], strides = [1, 1]} : vector<32x128xf32> to vector<1x128xf32>
    %505 = vector.extract_strided_slice %503 {offsets = [0, 0], sizes = [1, 8], strides = [1, 1]} : vector<1x32xf32> to vector<1x8xf32>
    %506 = arith.truncf %505 : vector<1x8xf32> to vector<1x8xbf16>
    %c0_103 = arith.constant 0 : index
    %c0_104 = arith.constant 0 : index
    %507 = vector.load %arg2[%c0_103, %c0_104] : memref<8x128xbf16, #tpu.memory_space<vmem>>, vector<8x128xbf16>
    %cst_105 = arith.constant dense<0.000000e+00> : vector<1x128xf32>
    %508 = tpu.matmul %506, %507, %cst_105 {dimension_numbers = #tpu.dot_dimension_numbers<[1], [0], [0], [1], [0, 0, 1, 1], [], []>} : vector<1x8xbf16>, vector<8x128xbf16>, vector<1x128xf32> -> vector<1x128xf32>
    %509 = arith.addf %504, %508 : vector<1x128xf32>
    %510 = vector.extract_strided_slice %509 {offsets = [0, 0], sizes = [1, 32], strides = [1, 1]} : vector<1x128xf32> to vector<1x32xf32>
    %511 = arith.negf %510 : vector<1x32xf32>
    %512 = math.exp %511 : vector<1x32xf32>
    %cst_106 = arith.constant 1.000000e+00 : f32
    %513 = vector.broadcast %cst_106 : f32 to vector<1x32xf32>
    %514 = arith.addf %513, %512 : vector<1x32xf32>
    %515 = arith.divf %513, %514 : vector<1x32xf32>
    %516 = vector.extract_strided_slice %509 {offsets = [0, 32], sizes = [1, 32], strides = [1, 1]} : vector<1x128xf32> to vector<1x32xf32>
    %517 = arith.negf %516 : vector<1x32xf32>
    %518 = math.exp %517 : vector<1x32xf32>
    %cst_107 = arith.constant 1.000000e+00 : f32
    %519 = vector.broadcast %cst_107 : f32 to vector<1x32xf32>
    %520 = arith.addf %519, %518 : vector<1x32xf32>
    %521 = arith.divf %519, %520 : vector<1x32xf32>
    %522 = vector.extract_strided_slice %509 {offsets = [0, 64], sizes = [1, 32], strides = [1, 1]} : vector<1x128xf32> to vector<1x32xf32>
    %523 = math.tanh %522 : vector<1x32xf32>
    %524 = vector.extract_strided_slice %509 {offsets = [0, 96], sizes = [1, 32], strides = [1, 1]} : vector<1x128xf32> to vector<1x32xf32>
    %525 = arith.negf %524 : vector<1x32xf32>
    %526 = math.exp %525 : vector<1x32xf32>
    %cst_108 = arith.constant 1.000000e+00 : f32
    %527 = vector.broadcast %cst_108 : f32 to vector<1x32xf32>
    %528 = arith.addf %527, %526 : vector<1x32xf32>
    %529 = arith.divf %527, %528 : vector<1x32xf32>
    %530 = arith.mulf %521, %501 : vector<1x32xf32>
    %531 = arith.mulf %515, %523 : vector<1x32xf32>
    %532 = arith.addf %530, %531 : vector<1x32xf32>
    %533 = math.tanh %532 : vector<1x32xf32>
    %534 = arith.mulf %529, %533 : vector<1x32xf32>
    %535 = vector.extract_strided_slice %5 {offsets = [17, 0], sizes = [1, 128], strides = [1, 1]} : vector<32x128xf32> to vector<1x128xf32>
    %536 = vector.extract_strided_slice %534 {offsets = [0, 0], sizes = [1, 8], strides = [1, 1]} : vector<1x32xf32> to vector<1x8xf32>
    %537 = arith.truncf %536 : vector<1x8xf32> to vector<1x8xbf16>
    %c0_109 = arith.constant 0 : index
    %c0_110 = arith.constant 0 : index
    %538 = vector.load %arg2[%c0_109, %c0_110] : memref<8x128xbf16, #tpu.memory_space<vmem>>, vector<8x128xbf16>
    %cst_111 = arith.constant dense<0.000000e+00> : vector<1x128xf32>
    %539 = tpu.matmul %537, %538, %cst_111 {dimension_numbers = #tpu.dot_dimension_numbers<[1], [0], [0], [1], [0, 0, 1, 1], [], []>} : vector<1x8xbf16>, vector<8x128xbf16>, vector<1x128xf32> -> vector<1x128xf32>
    %540 = arith.addf %535, %539 : vector<1x128xf32>
    %541 = vector.extract_strided_slice %540 {offsets = [0, 0], sizes = [1, 32], strides = [1, 1]} : vector<1x128xf32> to vector<1x32xf32>
    %542 = arith.negf %541 : vector<1x32xf32>
    %543 = math.exp %542 : vector<1x32xf32>
    %cst_112 = arith.constant 1.000000e+00 : f32
    %544 = vector.broadcast %cst_112 : f32 to vector<1x32xf32>
    %545 = arith.addf %544, %543 : vector<1x32xf32>
    %546 = arith.divf %544, %545 : vector<1x32xf32>
    %547 = vector.extract_strided_slice %540 {offsets = [0, 32], sizes = [1, 32], strides = [1, 1]} : vector<1x128xf32> to vector<1x32xf32>
    %548 = arith.negf %547 : vector<1x32xf32>
    %549 = math.exp %548 : vector<1x32xf32>
    %cst_113 = arith.constant 1.000000e+00 : f32
    %550 = vector.broadcast %cst_113 : f32 to vector<1x32xf32>
    %551 = arith.addf %550, %549 : vector<1x32xf32>
    %552 = arith.divf %550, %551 : vector<1x32xf32>
    %553 = vector.extract_strided_slice %540 {offsets = [0, 64], sizes = [1, 32], strides = [1, 1]} : vector<1x128xf32> to vector<1x32xf32>
    %554 = math.tanh %553 : vector<1x32xf32>
    %555 = vector.extract_strided_slice %540 {offsets = [0, 96], sizes = [1, 32], strides = [1, 1]} : vector<1x128xf32> to vector<1x32xf32>
    %556 = arith.negf %555 : vector<1x32xf32>
    %557 = math.exp %556 : vector<1x32xf32>
    %cst_114 = arith.constant 1.000000e+00 : f32
    %558 = vector.broadcast %cst_114 : f32 to vector<1x32xf32>
    %559 = arith.addf %558, %557 : vector<1x32xf32>
    %560 = arith.divf %558, %559 : vector<1x32xf32>
    %561 = arith.mulf %552, %532 : vector<1x32xf32>
    %562 = arith.mulf %546, %554 : vector<1x32xf32>
    %563 = arith.addf %561, %562 : vector<1x32xf32>
    %564 = math.tanh %563 : vector<1x32xf32>
    %565 = arith.mulf %560, %564 : vector<1x32xf32>
    %566 = vector.extract_strided_slice %5 {offsets = [18, 0], sizes = [1, 128], strides = [1, 1]} : vector<32x128xf32> to vector<1x128xf32>
    %567 = vector.extract_strided_slice %565 {offsets = [0, 0], sizes = [1, 8], strides = [1, 1]} : vector<1x32xf32> to vector<1x8xf32>
    %568 = arith.truncf %567 : vector<1x8xf32> to vector<1x8xbf16>
    %c0_115 = arith.constant 0 : index
    %c0_116 = arith.constant 0 : index
    %569 = vector.load %arg2[%c0_115, %c0_116] : memref<8x128xbf16, #tpu.memory_space<vmem>>, vector<8x128xbf16>
    %cst_117 = arith.constant dense<0.000000e+00> : vector<1x128xf32>
    %570 = tpu.matmul %568, %569, %cst_117 {dimension_numbers = #tpu.dot_dimension_numbers<[1], [0], [0], [1], [0, 0, 1, 1], [], []>} : vector<1x8xbf16>, vector<8x128xbf16>, vector<1x128xf32> -> vector<1x128xf32>
    %571 = arith.addf %566, %570 : vector<1x128xf32>
    %572 = vector.extract_strided_slice %571 {offsets = [0, 0], sizes = [1, 32], strides = [1, 1]} : vector<1x128xf32> to vector<1x32xf32>
    %573 = arith.negf %572 : vector<1x32xf32>
    %574 = math.exp %573 : vector<1x32xf32>
    %cst_118 = arith.constant 1.000000e+00 : f32
    %575 = vector.broadcast %cst_118 : f32 to vector<1x32xf32>
    %576 = arith.addf %575, %574 : vector<1x32xf32>
    %577 = arith.divf %575, %576 : vector<1x32xf32>
    %578 = vector.extract_strided_slice %571 {offsets = [0, 32], sizes = [1, 32], strides = [1, 1]} : vector<1x128xf32> to vector<1x32xf32>
    %579 = arith.negf %578 : vector<1x32xf32>
    %580 = math.exp %579 : vector<1x32xf32>
    %cst_119 = arith.constant 1.000000e+00 : f32
    %581 = vector.broadcast %cst_119 : f32 to vector<1x32xf32>
    %582 = arith.addf %581, %580 : vector<1x32xf32>
    %583 = arith.divf %581, %582 : vector<1x32xf32>
    %584 = vector.extract_strided_slice %571 {offsets = [0, 64], sizes = [1, 32], strides = [1, 1]} : vector<1x128xf32> to vector<1x32xf32>
    %585 = math.tanh %584 : vector<1x32xf32>
    %586 = vector.extract_strided_slice %571 {offsets = [0, 96], sizes = [1, 32], strides = [1, 1]} : vector<1x128xf32> to vector<1x32xf32>
    %587 = arith.negf %586 : vector<1x32xf32>
    %588 = math.exp %587 : vector<1x32xf32>
    %cst_120 = arith.constant 1.000000e+00 : f32
    %589 = vector.broadcast %cst_120 : f32 to vector<1x32xf32>
    %590 = arith.addf %589, %588 : vector<1x32xf32>
    %591 = arith.divf %589, %590 : vector<1x32xf32>
    %592 = arith.mulf %583, %563 : vector<1x32xf32>
    %593 = arith.mulf %577, %585 : vector<1x32xf32>
    %594 = arith.addf %592, %593 : vector<1x32xf32>
    %595 = math.tanh %594 : vector<1x32xf32>
    %596 = arith.mulf %591, %595 : vector<1x32xf32>
    %597 = vector.extract_strided_slice %5 {offsets = [19, 0], sizes = [1, 128], strides = [1, 1]} : vector<32x128xf32> to vector<1x128xf32>
    %598 = vector.extract_strided_slice %596 {offsets = [0, 0], sizes = [1, 8], strides = [1, 1]} : vector<1x32xf32> to vector<1x8xf32>
    %599 = arith.truncf %598 : vector<1x8xf32> to vector<1x8xbf16>
    %c0_121 = arith.constant 0 : index
    %c0_122 = arith.constant 0 : index
    %600 = vector.load %arg2[%c0_121, %c0_122] : memref<8x128xbf16, #tpu.memory_space<vmem>>, vector<8x128xbf16>
    %cst_123 = arith.constant dense<0.000000e+00> : vector<1x128xf32>
    %601 = tpu.matmul %599, %600, %cst_123 {dimension_numbers = #tpu.dot_dimension_numbers<[1], [0], [0], [1], [0, 0, 1, 1], [], []>} : vector<1x8xbf16>, vector<8x128xbf16>, vector<1x128xf32> -> vector<1x128xf32>
    %602 = arith.addf %597, %601 : vector<1x128xf32>
    %603 = vector.extract_strided_slice %602 {offsets = [0, 0], sizes = [1, 32], strides = [1, 1]} : vector<1x128xf32> to vector<1x32xf32>
    %604 = arith.negf %603 : vector<1x32xf32>
    %605 = math.exp %604 : vector<1x32xf32>
    %cst_124 = arith.constant 1.000000e+00 : f32
    %606 = vector.broadcast %cst_124 : f32 to vector<1x32xf32>
    %607 = arith.addf %606, %605 : vector<1x32xf32>
    %608 = arith.divf %606, %607 : vector<1x32xf32>
    %609 = vector.extract_strided_slice %602 {offsets = [0, 32], sizes = [1, 32], strides = [1, 1]} : vector<1x128xf32> to vector<1x32xf32>
    %610 = arith.negf %609 : vector<1x32xf32>
    %611 = math.exp %610 : vector<1x32xf32>
    %cst_125 = arith.constant 1.000000e+00 : f32
    %612 = vector.broadcast %cst_125 : f32 to vector<1x32xf32>
    %613 = arith.addf %612, %611 : vector<1x32xf32>
    %614 = arith.divf %612, %613 : vector<1x32xf32>
    %615 = vector.extract_strided_slice %602 {offsets = [0, 64], sizes = [1, 32], strides = [1, 1]} : vector<1x128xf32> to vector<1x32xf32>
    %616 = math.tanh %615 : vector<1x32xf32>
    %617 = vector.extract_strided_slice %602 {offsets = [0, 96], sizes = [1, 32], strides = [1, 1]} : vector<1x128xf32> to vector<1x32xf32>
    %618 = arith.negf %617 : vector<1x32xf32>
    %619 = math.exp %618 : vector<1x32xf32>
    %cst_126 = arith.constant 1.000000e+00 : f32
    %620 = vector.broadcast %cst_126 : f32 to vector<1x32xf32>
    %621 = arith.addf %620, %619 : vector<1x32xf32>
    %622 = arith.divf %620, %621 : vector<1x32xf32>
    %623 = arith.mulf %614, %594 : vector<1x32xf32>
    %624 = arith.mulf %608, %616 : vector<1x32xf32>
    %625 = arith.addf %623, %624 : vector<1x32xf32>
    %626 = math.tanh %625 : vector<1x32xf32>
    %627 = arith.mulf %622, %626 : vector<1x32xf32>
    %628 = vector.extract_strided_slice %5 {offsets = [20, 0], sizes = [1, 128], strides = [1, 1]} : vector<32x128xf32> to vector<1x128xf32>
    %629 = vector.extract_strided_slice %627 {offsets = [0, 0], sizes = [1, 8], strides = [1, 1]} : vector<1x32xf32> to vector<1x8xf32>
    %630 = arith.truncf %629 : vector<1x8xf32> to vector<1x8xbf16>
    %c0_127 = arith.constant 0 : index
    %c0_128 = arith.constant 0 : index
    %631 = vector.load %arg2[%c0_127, %c0_128] : memref<8x128xbf16, #tpu.memory_space<vmem>>, vector<8x128xbf16>
    %cst_129 = arith.constant dense<0.000000e+00> : vector<1x128xf32>
    %632 = tpu.matmul %630, %631, %cst_129 {dimension_numbers = #tpu.dot_dimension_numbers<[1], [0], [0], [1], [0, 0, 1, 1], [], []>} : vector<1x8xbf16>, vector<8x128xbf16>, vector<1x128xf32> -> vector<1x128xf32>
    %633 = arith.addf %628, %632 : vector<1x128xf32>
    %634 = vector.extract_strided_slice %633 {offsets = [0, 0], sizes = [1, 32], strides = [1, 1]} : vector<1x128xf32> to vector<1x32xf32>
    %635 = arith.negf %634 : vector<1x32xf32>
    %636 = math.exp %635 : vector<1x32xf32>
    %cst_130 = arith.constant 1.000000e+00 : f32
    %637 = vector.broadcast %cst_130 : f32 to vector<1x32xf32>
    %638 = arith.addf %637, %636 : vector<1x32xf32>
    %639 = arith.divf %637, %638 : vector<1x32xf32>
    %640 = vector.extract_strided_slice %633 {offsets = [0, 32], sizes = [1, 32], strides = [1, 1]} : vector<1x128xf32> to vector<1x32xf32>
    %641 = arith.negf %640 : vector<1x32xf32>
    %642 = math.exp %641 : vector<1x32xf32>
    %cst_131 = arith.constant 1.000000e+00 : f32
    %643 = vector.broadcast %cst_131 : f32 to vector<1x32xf32>
    %644 = arith.addf %643, %642 : vector<1x32xf32>
    %645 = arith.divf %643, %644 : vector<1x32xf32>
    %646 = vector.extract_strided_slice %633 {offsets = [0, 64], sizes = [1, 32], strides = [1, 1]} : vector<1x128xf32> to vector<1x32xf32>
    %647 = math.tanh %646 : vector<1x32xf32>
    %648 = vector.extract_strided_slice %633 {offsets = [0, 96], sizes = [1, 32], strides = [1, 1]} : vector<1x128xf32> to vector<1x32xf32>
    %649 = arith.negf %648 : vector<1x32xf32>
    %650 = math.exp %649 : vector<1x32xf32>
    %cst_132 = arith.constant 1.000000e+00 : f32
    %651 = vector.broadcast %cst_132 : f32 to vector<1x32xf32>
    %652 = arith.addf %651, %650 : vector<1x32xf32>
    %653 = arith.divf %651, %652 : vector<1x32xf32>
    %654 = arith.mulf %645, %625 : vector<1x32xf32>
    %655 = arith.mulf %639, %647 : vector<1x32xf32>
    %656 = arith.addf %654, %655 : vector<1x32xf32>
    %657 = math.tanh %656 : vector<1x32xf32>
    %658 = arith.mulf %653, %657 : vector<1x32xf32>
    %659 = vector.extract_strided_slice %5 {offsets = [21, 0], sizes = [1, 128], strides = [1, 1]} : vector<32x128xf32> to vector<1x128xf32>
    %660 = vector.extract_strided_slice %658 {offsets = [0, 0], sizes = [1, 8], strides = [1, 1]} : vector<1x32xf32> to vector<1x8xf32>
    %661 = arith.truncf %660 : vector<1x8xf32> to vector<1x8xbf16>
    %c0_133 = arith.constant 0 : index
    %c0_134 = arith.constant 0 : index
    %662 = vector.load %arg2[%c0_133, %c0_134] : memref<8x128xbf16, #tpu.memory_space<vmem>>, vector<8x128xbf16>
    %cst_135 = arith.constant dense<0.000000e+00> : vector<1x128xf32>
    %663 = tpu.matmul %661, %662, %cst_135 {dimension_numbers = #tpu.dot_dimension_numbers<[1], [0], [0], [1], [0, 0, 1, 1], [], []>} : vector<1x8xbf16>, vector<8x128xbf16>, vector<1x128xf32> -> vector<1x128xf32>
    %664 = arith.addf %659, %663 : vector<1x128xf32>
    %665 = vector.extract_strided_slice %664 {offsets = [0, 0], sizes = [1, 32], strides = [1, 1]} : vector<1x128xf32> to vector<1x32xf32>
    %666 = arith.negf %665 : vector<1x32xf32>
    %667 = math.exp %666 : vector<1x32xf32>
    %cst_136 = arith.constant 1.000000e+00 : f32
    %668 = vector.broadcast %cst_136 : f32 to vector<1x32xf32>
    %669 = arith.addf %668, %667 : vector<1x32xf32>
    %670 = arith.divf %668, %669 : vector<1x32xf32>
    %671 = vector.extract_strided_slice %664 {offsets = [0, 32], sizes = [1, 32], strides = [1, 1]} : vector<1x128xf32> to vector<1x32xf32>
    %672 = arith.negf %671 : vector<1x32xf32>
    %673 = math.exp %672 : vector<1x32xf32>
    %cst_137 = arith.constant 1.000000e+00 : f32
    %674 = vector.broadcast %cst_137 : f32 to vector<1x32xf32>
    %675 = arith.addf %674, %673 : vector<1x32xf32>
    %676 = arith.divf %674, %675 : vector<1x32xf32>
    %677 = vector.extract_strided_slice %664 {offsets = [0, 64], sizes = [1, 32], strides = [1, 1]} : vector<1x128xf32> to vector<1x32xf32>
    %678 = math.tanh %677 : vector<1x32xf32>
    %679 = vector.extract_strided_slice %664 {offsets = [0, 96], sizes = [1, 32], strides = [1, 1]} : vector<1x128xf32> to vector<1x32xf32>
    %680 = arith.negf %679 : vector<1x32xf32>
    %681 = math.exp %680 : vector<1x32xf32>
    %cst_138 = arith.constant 1.000000e+00 : f32
    %682 = vector.broadcast %cst_138 : f32 to vector<1x32xf32>
    %683 = arith.addf %682, %681 : vector<1x32xf32>
    %684 = arith.divf %682, %683 : vector<1x32xf32>
    %685 = arith.mulf %676, %656 : vector<1x32xf32>
    %686 = arith.mulf %670, %678 : vector<1x32xf32>
    %687 = arith.addf %685, %686 : vector<1x32xf32>
    %688 = math.tanh %687 : vector<1x32xf32>
    %689 = arith.mulf %684, %688 : vector<1x32xf32>
    %690 = vector.extract_strided_slice %5 {offsets = [22, 0], sizes = [1, 128], strides = [1, 1]} : vector<32x128xf32> to vector<1x128xf32>
    %691 = vector.extract_strided_slice %689 {offsets = [0, 0], sizes = [1, 8], strides = [1, 1]} : vector<1x32xf32> to vector<1x8xf32>
    %692 = arith.truncf %691 : vector<1x8xf32> to vector<1x8xbf16>
    %c0_139 = arith.constant 0 : index
    %c0_140 = arith.constant 0 : index
    %693 = vector.load %arg2[%c0_139, %c0_140] : memref<8x128xbf16, #tpu.memory_space<vmem>>, vector<8x128xbf16>
    %cst_141 = arith.constant dense<0.000000e+00> : vector<1x128xf32>
    %694 = tpu.matmul %692, %693, %cst_141 {dimension_numbers = #tpu.dot_dimension_numbers<[1], [0], [0], [1], [0, 0, 1, 1], [], []>} : vector<1x8xbf16>, vector<8x128xbf16>, vector<1x128xf32> -> vector<1x128xf32>
    %695 = arith.addf %690, %694 : vector<1x128xf32>
    %696 = vector.extract_strided_slice %695 {offsets = [0, 0], sizes = [1, 32], strides = [1, 1]} : vector<1x128xf32> to vector<1x32xf32>
    %697 = arith.negf %696 : vector<1x32xf32>
    %698 = math.exp %697 : vector<1x32xf32>
    %cst_142 = arith.constant 1.000000e+00 : f32
    %699 = vector.broadcast %cst_142 : f32 to vector<1x32xf32>
    %700 = arith.addf %699, %698 : vector<1x32xf32>
    %701 = arith.divf %699, %700 : vector<1x32xf32>
    %702 = vector.extract_strided_slice %695 {offsets = [0, 32], sizes = [1, 32], strides = [1, 1]} : vector<1x128xf32> to vector<1x32xf32>
    %703 = arith.negf %702 : vector<1x32xf32>
    %704 = math.exp %703 : vector<1x32xf32>
    %cst_143 = arith.constant 1.000000e+00 : f32
    %705 = vector.broadcast %cst_143 : f32 to vector<1x32xf32>
    %706 = arith.addf %705, %704 : vector<1x32xf32>
    %707 = arith.divf %705, %706 : vector<1x32xf32>
    %708 = vector.extract_strided_slice %695 {offsets = [0, 64], sizes = [1, 32], strides = [1, 1]} : vector<1x128xf32> to vector<1x32xf32>
    %709 = math.tanh %708 : vector<1x32xf32>
    %710 = vector.extract_strided_slice %695 {offsets = [0, 96], sizes = [1, 32], strides = [1, 1]} : vector<1x128xf32> to vector<1x32xf32>
    %711 = arith.negf %710 : vector<1x32xf32>
    %712 = math.exp %711 : vector<1x32xf32>
    %cst_144 = arith.constant 1.000000e+00 : f32
    %713 = vector.broadcast %cst_144 : f32 to vector<1x32xf32>
    %714 = arith.addf %713, %712 : vector<1x32xf32>
    %715 = arith.divf %713, %714 : vector<1x32xf32>
    %716 = arith.mulf %707, %687 : vector<1x32xf32>
    %717 = arith.mulf %701, %709 : vector<1x32xf32>
    %718 = arith.addf %716, %717 : vector<1x32xf32>
    %719 = math.tanh %718 : vector<1x32xf32>
    %720 = arith.mulf %715, %719 : vector<1x32xf32>
    %721 = vector.extract_strided_slice %5 {offsets = [23, 0], sizes = [1, 128], strides = [1, 1]} : vector<32x128xf32> to vector<1x128xf32>
    %722 = vector.extract_strided_slice %720 {offsets = [0, 0], sizes = [1, 8], strides = [1, 1]} : vector<1x32xf32> to vector<1x8xf32>
    %723 = arith.truncf %722 : vector<1x8xf32> to vector<1x8xbf16>
    %c0_145 = arith.constant 0 : index
    %c0_146 = arith.constant 0 : index
    %724 = vector.load %arg2[%c0_145, %c0_146] : memref<8x128xbf16, #tpu.memory_space<vmem>>, vector<8x128xbf16>
    %cst_147 = arith.constant dense<0.000000e+00> : vector<1x128xf32>
    %725 = tpu.matmul %723, %724, %cst_147 {dimension_numbers = #tpu.dot_dimension_numbers<[1], [0], [0], [1], [0, 0, 1, 1], [], []>} : vector<1x8xbf16>, vector<8x128xbf16>, vector<1x128xf32> -> vector<1x128xf32>
    %726 = arith.addf %721, %725 : vector<1x128xf32>
    %727 = vector.extract_strided_slice %726 {offsets = [0, 0], sizes = [1, 32], strides = [1, 1]} : vector<1x128xf32> to vector<1x32xf32>
    %728 = arith.negf %727 : vector<1x32xf32>
    %729 = math.exp %728 : vector<1x32xf32>
    %cst_148 = arith.constant 1.000000e+00 : f32
    %730 = vector.broadcast %cst_148 : f32 to vector<1x32xf32>
    %731 = arith.addf %730, %729 : vector<1x32xf32>
    %732 = arith.divf %730, %731 : vector<1x32xf32>
    %733 = vector.extract_strided_slice %726 {offsets = [0, 32], sizes = [1, 32], strides = [1, 1]} : vector<1x128xf32> to vector<1x32xf32>
    %734 = arith.negf %733 : vector<1x32xf32>
    %735 = math.exp %734 : vector<1x32xf32>
    %cst_149 = arith.constant 1.000000e+00 : f32
    %736 = vector.broadcast %cst_149 : f32 to vector<1x32xf32>
    %737 = arith.addf %736, %735 : vector<1x32xf32>
    %738 = arith.divf %736, %737 : vector<1x32xf32>
    %739 = vector.extract_strided_slice %726 {offsets = [0, 64], sizes = [1, 32], strides = [1, 1]} : vector<1x128xf32> to vector<1x32xf32>
    %740 = math.tanh %739 : vector<1x32xf32>
    %741 = vector.extract_strided_slice %726 {offsets = [0, 96], sizes = [1, 32], strides = [1, 1]} : vector<1x128xf32> to vector<1x32xf32>
    %742 = arith.negf %741 : vector<1x32xf32>
    %743 = math.exp %742 : vector<1x32xf32>
    %cst_150 = arith.constant 1.000000e+00 : f32
    %744 = vector.broadcast %cst_150 : f32 to vector<1x32xf32>
    %745 = arith.addf %744, %743 : vector<1x32xf32>
    %746 = arith.divf %744, %745 : vector<1x32xf32>
    %747 = arith.mulf %738, %718 : vector<1x32xf32>
    %748 = arith.mulf %732, %740 : vector<1x32xf32>
    %749 = arith.addf %747, %748 : vector<1x32xf32>
    %750 = math.tanh %749 : vector<1x32xf32>
    %751 = arith.mulf %746, %750 : vector<1x32xf32>
    %752 = vector.extract_strided_slice %5 {offsets = [24, 0], sizes = [1, 128], strides = [1, 1]} : vector<32x128xf32> to vector<1x128xf32>
    %753 = vector.extract_strided_slice %751 {offsets = [0, 0], sizes = [1, 8], strides = [1, 1]} : vector<1x32xf32> to vector<1x8xf32>
    %754 = arith.truncf %753 : vector<1x8xf32> to vector<1x8xbf16>
    %c0_151 = arith.constant 0 : index
    %c0_152 = arith.constant 0 : index
    %755 = vector.load %arg2[%c0_151, %c0_152] : memref<8x128xbf16, #tpu.memory_space<vmem>>, vector<8x128xbf16>
    %cst_153 = arith.constant dense<0.000000e+00> : vector<1x128xf32>
    %756 = tpu.matmul %754, %755, %cst_153 {dimension_numbers = #tpu.dot_dimension_numbers<[1], [0], [0], [1], [0, 0, 1, 1], [], []>} : vector<1x8xbf16>, vector<8x128xbf16>, vector<1x128xf32> -> vector<1x128xf32>
    %757 = arith.addf %752, %756 : vector<1x128xf32>
    %758 = vector.extract_strided_slice %757 {offsets = [0, 0], sizes = [1, 32], strides = [1, 1]} : vector<1x128xf32> to vector<1x32xf32>
    %759 = arith.negf %758 : vector<1x32xf32>
    %760 = math.exp %759 : vector<1x32xf32>
    %cst_154 = arith.constant 1.000000e+00 : f32
    %761 = vector.broadcast %cst_154 : f32 to vector<1x32xf32>
    %762 = arith.addf %761, %760 : vector<1x32xf32>
    %763 = arith.divf %761, %762 : vector<1x32xf32>
    %764 = vector.extract_strided_slice %757 {offsets = [0, 32], sizes = [1, 32], strides = [1, 1]} : vector<1x128xf32> to vector<1x32xf32>
    %765 = arith.negf %764 : vector<1x32xf32>
    %766 = math.exp %765 : vector<1x32xf32>
    %cst_155 = arith.constant 1.000000e+00 : f32
    %767 = vector.broadcast %cst_155 : f32 to vector<1x32xf32>
    %768 = arith.addf %767, %766 : vector<1x32xf32>
    %769 = arith.divf %767, %768 : vector<1x32xf32>
    %770 = vector.extract_strided_slice %757 {offsets = [0, 64], sizes = [1, 32], strides = [1, 1]} : vector<1x128xf32> to vector<1x32xf32>
    %771 = math.tanh %770 : vector<1x32xf32>
    %772 = vector.extract_strided_slice %757 {offsets = [0, 96], sizes = [1, 32], strides = [1, 1]} : vector<1x128xf32> to vector<1x32xf32>
    %773 = arith.negf %772 : vector<1x32xf32>
    %774 = math.exp %773 : vector<1x32xf32>
    %cst_156 = arith.constant 1.000000e+00 : f32
    %775 = vector.broadcast %cst_156 : f32 to vector<1x32xf32>
    %776 = arith.addf %775, %774 : vector<1x32xf32>
    %777 = arith.divf %775, %776 : vector<1x32xf32>
    %778 = arith.mulf %769, %749 : vector<1x32xf32>
    %779 = arith.mulf %763, %771 : vector<1x32xf32>
    %780 = arith.addf %778, %779 : vector<1x32xf32>
    %781 = math.tanh %780 : vector<1x32xf32>
    %782 = arith.mulf %777, %781 : vector<1x32xf32>
    %783 = vector.extract_strided_slice %5 {offsets = [25, 0], sizes = [1, 128], strides = [1, 1]} : vector<32x128xf32> to vector<1x128xf32>
    %784 = vector.extract_strided_slice %782 {offsets = [0, 0], sizes = [1, 8], strides = [1, 1]} : vector<1x32xf32> to vector<1x8xf32>
    %785 = arith.truncf %784 : vector<1x8xf32> to vector<1x8xbf16>
    %c0_157 = arith.constant 0 : index
    %c0_158 = arith.constant 0 : index
    %786 = vector.load %arg2[%c0_157, %c0_158] : memref<8x128xbf16, #tpu.memory_space<vmem>>, vector<8x128xbf16>
    %cst_159 = arith.constant dense<0.000000e+00> : vector<1x128xf32>
    %787 = tpu.matmul %785, %786, %cst_159 {dimension_numbers = #tpu.dot_dimension_numbers<[1], [0], [0], [1], [0, 0, 1, 1], [], []>} : vector<1x8xbf16>, vector<8x128xbf16>, vector<1x128xf32> -> vector<1x128xf32>
    %788 = arith.addf %783, %787 : vector<1x128xf32>
    %789 = vector.extract_strided_slice %788 {offsets = [0, 0], sizes = [1, 32], strides = [1, 1]} : vector<1x128xf32> to vector<1x32xf32>
    %790 = arith.negf %789 : vector<1x32xf32>
    %791 = math.exp %790 : vector<1x32xf32>
    %cst_160 = arith.constant 1.000000e+00 : f32
    %792 = vector.broadcast %cst_160 : f32 to vector<1x32xf32>
    %793 = arith.addf %792, %791 : vector<1x32xf32>
    %794 = arith.divf %792, %793 : vector<1x32xf32>
    %795 = vector.extract_strided_slice %788 {offsets = [0, 32], sizes = [1, 32], strides = [1, 1]} : vector<1x128xf32> to vector<1x32xf32>
    %796 = arith.negf %795 : vector<1x32xf32>
    %797 = math.exp %796 : vector<1x32xf32>
    %cst_161 = arith.constant 1.000000e+00 : f32
    %798 = vector.broadcast %cst_161 : f32 to vector<1x32xf32>
    %799 = arith.addf %798, %797 : vector<1x32xf32>
    %800 = arith.divf %798, %799 : vector<1x32xf32>
    %801 = vector.extract_strided_slice %788 {offsets = [0, 64], sizes = [1, 32], strides = [1, 1]} : vector<1x128xf32> to vector<1x32xf32>
    %802 = math.tanh %801 : vector<1x32xf32>
    %803 = vector.extract_strided_slice %788 {offsets = [0, 96], sizes = [1, 32], strides = [1, 1]} : vector<1x128xf32> to vector<1x32xf32>
    %804 = arith.negf %803 : vector<1x32xf32>
    %805 = math.exp %804 : vector<1x32xf32>
    %cst_162 = arith.constant 1.000000e+00 : f32
    %806 = vector.broadcast %cst_162 : f32 to vector<1x32xf32>
    %807 = arith.addf %806, %805 : vector<1x32xf32>
    %808 = arith.divf %806, %807 : vector<1x32xf32>
    %809 = arith.mulf %800, %780 : vector<1x32xf32>
    %810 = arith.mulf %794, %802 : vector<1x32xf32>
    %811 = arith.addf %809, %810 : vector<1x32xf32>
    %812 = math.tanh %811 : vector<1x32xf32>
    %813 = arith.mulf %808, %812 : vector<1x32xf32>
    %814 = vector.extract_strided_slice %5 {offsets = [26, 0], sizes = [1, 128], strides = [1, 1]} : vector<32x128xf32> to vector<1x128xf32>
    %815 = vector.extract_strided_slice %813 {offsets = [0, 0], sizes = [1, 8], strides = [1, 1]} : vector<1x32xf32> to vector<1x8xf32>
    %816 = arith.truncf %815 : vector<1x8xf32> to vector<1x8xbf16>
    %c0_163 = arith.constant 0 : index
    %c0_164 = arith.constant 0 : index
    %817 = vector.load %arg2[%c0_163, %c0_164] : memref<8x128xbf16, #tpu.memory_space<vmem>>, vector<8x128xbf16>
    %cst_165 = arith.constant dense<0.000000e+00> : vector<1x128xf32>
    %818 = tpu.matmul %816, %817, %cst_165 {dimension_numbers = #tpu.dot_dimension_numbers<[1], [0], [0], [1], [0, 0, 1, 1], [], []>} : vector<1x8xbf16>, vector<8x128xbf16>, vector<1x128xf32> -> vector<1x128xf32>
    %819 = arith.addf %814, %818 : vector<1x128xf32>
    %820 = vector.extract_strided_slice %819 {offsets = [0, 0], sizes = [1, 32], strides = [1, 1]} : vector<1x128xf32> to vector<1x32xf32>
    %821 = arith.negf %820 : vector<1x32xf32>
    %822 = math.exp %821 : vector<1x32xf32>
    %cst_166 = arith.constant 1.000000e+00 : f32
    %823 = vector.broadcast %cst_166 : f32 to vector<1x32xf32>
    %824 = arith.addf %823, %822 : vector<1x32xf32>
    %825 = arith.divf %823, %824 : vector<1x32xf32>
    %826 = vector.extract_strided_slice %819 {offsets = [0, 32], sizes = [1, 32], strides = [1, 1]} : vector<1x128xf32> to vector<1x32xf32>
    %827 = arith.negf %826 : vector<1x32xf32>
    %828 = math.exp %827 : vector<1x32xf32>
    %cst_167 = arith.constant 1.000000e+00 : f32
    %829 = vector.broadcast %cst_167 : f32 to vector<1x32xf32>
    %830 = arith.addf %829, %828 : vector<1x32xf32>
    %831 = arith.divf %829, %830 : vector<1x32xf32>
    %832 = vector.extract_strided_slice %819 {offsets = [0, 64], sizes = [1, 32], strides = [1, 1]} : vector<1x128xf32> to vector<1x32xf32>
    %833 = math.tanh %832 : vector<1x32xf32>
    %834 = vector.extract_strided_slice %819 {offsets = [0, 96], sizes = [1, 32], strides = [1, 1]} : vector<1x128xf32> to vector<1x32xf32>
    %835 = arith.negf %834 : vector<1x32xf32>
    %836 = math.exp %835 : vector<1x32xf32>
    %cst_168 = arith.constant 1.000000e+00 : f32
    %837 = vector.broadcast %cst_168 : f32 to vector<1x32xf32>
    %838 = arith.addf %837, %836 : vector<1x32xf32>
    %839 = arith.divf %837, %838 : vector<1x32xf32>
    %840 = arith.mulf %831, %811 : vector<1x32xf32>
    %841 = arith.mulf %825, %833 : vector<1x32xf32>
    %842 = arith.addf %840, %841 : vector<1x32xf32>
    %843 = math.tanh %842 : vector<1x32xf32>
    %844 = arith.mulf %839, %843 : vector<1x32xf32>
    %845 = vector.extract_strided_slice %5 {offsets = [27, 0], sizes = [1, 128], strides = [1, 1]} : vector<32x128xf32> to vector<1x128xf32>
    %846 = vector.extract_strided_slice %844 {offsets = [0, 0], sizes = [1, 8], strides = [1, 1]} : vector<1x32xf32> to vector<1x8xf32>
    %847 = arith.truncf %846 : vector<1x8xf32> to vector<1x8xbf16>
    %c0_169 = arith.constant 0 : index
    %c0_170 = arith.constant 0 : index
    %848 = vector.load %arg2[%c0_169, %c0_170] : memref<8x128xbf16, #tpu.memory_space<vmem>>, vector<8x128xbf16>
    %cst_171 = arith.constant dense<0.000000e+00> : vector<1x128xf32>
    %849 = tpu.matmul %847, %848, %cst_171 {dimension_numbers = #tpu.dot_dimension_numbers<[1], [0], [0], [1], [0, 0, 1, 1], [], []>} : vector<1x8xbf16>, vector<8x128xbf16>, vector<1x128xf32> -> vector<1x128xf32>
    %850 = arith.addf %845, %849 : vector<1x128xf32>
    %851 = vector.extract_strided_slice %850 {offsets = [0, 0], sizes = [1, 32], strides = [1, 1]} : vector<1x128xf32> to vector<1x32xf32>
    %852 = arith.negf %851 : vector<1x32xf32>
    %853 = math.exp %852 : vector<1x32xf32>
    %cst_172 = arith.constant 1.000000e+00 : f32
    %854 = vector.broadcast %cst_172 : f32 to vector<1x32xf32>
    %855 = arith.addf %854, %853 : vector<1x32xf32>
    %856 = arith.divf %854, %855 : vector<1x32xf32>
    %857 = vector.extract_strided_slice %850 {offsets = [0, 32], sizes = [1, 32], strides = [1, 1]} : vector<1x128xf32> to vector<1x32xf32>
    %858 = arith.negf %857 : vector<1x32xf32>
    %859 = math.exp %858 : vector<1x32xf32>
    %cst_173 = arith.constant 1.000000e+00 : f32
    %860 = vector.broadcast %cst_173 : f32 to vector<1x32xf32>
    %861 = arith.addf %860, %859 : vector<1x32xf32>
    %862 = arith.divf %860, %861 : vector<1x32xf32>
    %863 = vector.extract_strided_slice %850 {offsets = [0, 64], sizes = [1, 32], strides = [1, 1]} : vector<1x128xf32> to vector<1x32xf32>
    %864 = math.tanh %863 : vector<1x32xf32>
    %865 = vector.extract_strided_slice %850 {offsets = [0, 96], sizes = [1, 32], strides = [1, 1]} : vector<1x128xf32> to vector<1x32xf32>
    %866 = arith.negf %865 : vector<1x32xf32>
    %867 = math.exp %866 : vector<1x32xf32>
    %cst_174 = arith.constant 1.000000e+00 : f32
    %868 = vector.broadcast %cst_174 : f32 to vector<1x32xf32>
    %869 = arith.addf %868, %867 : vector<1x32xf32>
    %870 = arith.divf %868, %869 : vector<1x32xf32>
    %871 = arith.mulf %862, %842 : vector<1x32xf32>
    %872 = arith.mulf %856, %864 : vector<1x32xf32>
    %873 = arith.addf %871, %872 : vector<1x32xf32>
    %874 = math.tanh %873 : vector<1x32xf32>
    %875 = arith.mulf %870, %874 : vector<1x32xf32>
    %876 = vector.extract_strided_slice %5 {offsets = [28, 0], sizes = [1, 128], strides = [1, 1]} : vector<32x128xf32> to vector<1x128xf32>
    %877 = vector.extract_strided_slice %875 {offsets = [0, 0], sizes = [1, 8], strides = [1, 1]} : vector<1x32xf32> to vector<1x8xf32>
    %878 = arith.truncf %877 : vector<1x8xf32> to vector<1x8xbf16>
    %c0_175 = arith.constant 0 : index
    %c0_176 = arith.constant 0 : index
    %879 = vector.load %arg2[%c0_175, %c0_176] : memref<8x128xbf16, #tpu.memory_space<vmem>>, vector<8x128xbf16>
    %cst_177 = arith.constant dense<0.000000e+00> : vector<1x128xf32>
    %880 = tpu.matmul %878, %879, %cst_177 {dimension_numbers = #tpu.dot_dimension_numbers<[1], [0], [0], [1], [0, 0, 1, 1], [], []>} : vector<1x8xbf16>, vector<8x128xbf16>, vector<1x128xf32> -> vector<1x128xf32>
    %881 = arith.addf %876, %880 : vector<1x128xf32>
    %882 = vector.extract_strided_slice %881 {offsets = [0, 0], sizes = [1, 32], strides = [1, 1]} : vector<1x128xf32> to vector<1x32xf32>
    %883 = arith.negf %882 : vector<1x32xf32>
    %884 = math.exp %883 : vector<1x32xf32>
    %cst_178 = arith.constant 1.000000e+00 : f32
    %885 = vector.broadcast %cst_178 : f32 to vector<1x32xf32>
    %886 = arith.addf %885, %884 : vector<1x32xf32>
    %887 = arith.divf %885, %886 : vector<1x32xf32>
    %888 = vector.extract_strided_slice %881 {offsets = [0, 32], sizes = [1, 32], strides = [1, 1]} : vector<1x128xf32> to vector<1x32xf32>
    %889 = arith.negf %888 : vector<1x32xf32>
    %890 = math.exp %889 : vector<1x32xf32>
    %cst_179 = arith.constant 1.000000e+00 : f32
    %891 = vector.broadcast %cst_179 : f32 to vector<1x32xf32>
    %892 = arith.addf %891, %890 : vector<1x32xf32>
    %893 = arith.divf %891, %892 : vector<1x32xf32>
    %894 = vector.extract_strided_slice %881 {offsets = [0, 64], sizes = [1, 32], strides = [1, 1]} : vector<1x128xf32> to vector<1x32xf32>
    %895 = math.tanh %894 : vector<1x32xf32>
    %896 = vector.extract_strided_slice %881 {offsets = [0, 96], sizes = [1, 32], strides = [1, 1]} : vector<1x128xf32> to vector<1x32xf32>
    %897 = arith.negf %896 : vector<1x32xf32>
    %898 = math.exp %897 : vector<1x32xf32>
    %cst_180 = arith.constant 1.000000e+00 : f32
    %899 = vector.broadcast %cst_180 : f32 to vector<1x32xf32>
    %900 = arith.addf %899, %898 : vector<1x32xf32>
    %901 = arith.divf %899, %900 : vector<1x32xf32>
    %902 = arith.mulf %893, %873 : vector<1x32xf32>
    %903 = arith.mulf %887, %895 : vector<1x32xf32>
    %904 = arith.addf %902, %903 : vector<1x32xf32>
    %905 = math.tanh %904 : vector<1x32xf32>
    %906 = arith.mulf %901, %905 : vector<1x32xf32>
    %907 = vector.extract_strided_slice %5 {offsets = [29, 0], sizes = [1, 128], strides = [1, 1]} : vector<32x128xf32> to vector<1x128xf32>
    %908 = vector.extract_strided_slice %906 {offsets = [0, 0], sizes = [1, 8], strides = [1, 1]} : vector<1x32xf32> to vector<1x8xf32>
    %909 = arith.truncf %908 : vector<1x8xf32> to vector<1x8xbf16>
    %c0_181 = arith.constant 0 : index
    %c0_182 = arith.constant 0 : index
    %910 = vector.load %arg2[%c0_181, %c0_182] : memref<8x128xbf16, #tpu.memory_space<vmem>>, vector<8x128xbf16>
    %cst_183 = arith.constant dense<0.000000e+00> : vector<1x128xf32>
    %911 = tpu.matmul %909, %910, %cst_183 {dimension_numbers = #tpu.dot_dimension_numbers<[1], [0], [0], [1], [0, 0, 1, 1], [], []>} : vector<1x8xbf16>, vector<8x128xbf16>, vector<1x128xf32> -> vector<1x128xf32>
    %912 = arith.addf %907, %911 : vector<1x128xf32>
    %913 = vector.extract_strided_slice %912 {offsets = [0, 0], sizes = [1, 32], strides = [1, 1]} : vector<1x128xf32> to vector<1x32xf32>
    %914 = arith.negf %913 : vector<1x32xf32>
    %915 = math.exp %914 : vector<1x32xf32>
    %cst_184 = arith.constant 1.000000e+00 : f32
    %916 = vector.broadcast %cst_184 : f32 to vector<1x32xf32>
    %917 = arith.addf %916, %915 : vector<1x32xf32>
    %918 = arith.divf %916, %917 : vector<1x32xf32>
    %919 = vector.extract_strided_slice %912 {offsets = [0, 32], sizes = [1, 32], strides = [1, 1]} : vector<1x128xf32> to vector<1x32xf32>
    %920 = arith.negf %919 : vector<1x32xf32>
    %921 = math.exp %920 : vector<1x32xf32>
    %cst_185 = arith.constant 1.000000e+00 : f32
    %922 = vector.broadcast %cst_185 : f32 to vector<1x32xf32>
    %923 = arith.addf %922, %921 : vector<1x32xf32>
    %924 = arith.divf %922, %923 : vector<1x32xf32>
    %925 = vector.extract_strided_slice %912 {offsets = [0, 64], sizes = [1, 32], strides = [1, 1]} : vector<1x128xf32> to vector<1x32xf32>
    %926 = math.tanh %925 : vector<1x32xf32>
    %927 = vector.extract_strided_slice %912 {offsets = [0, 96], sizes = [1, 32], strides = [1, 1]} : vector<1x128xf32> to vector<1x32xf32>
    %928 = arith.negf %927 : vector<1x32xf32>
    %929 = math.exp %928 : vector<1x32xf32>
    %cst_186 = arith.constant 1.000000e+00 : f32
    %930 = vector.broadcast %cst_186 : f32 to vector<1x32xf32>
    %931 = arith.addf %930, %929 : vector<1x32xf32>
    %932 = arith.divf %930, %931 : vector<1x32xf32>
    %933 = arith.mulf %924, %904 : vector<1x32xf32>
    %934 = arith.mulf %918, %926 : vector<1x32xf32>
    %935 = arith.addf %933, %934 : vector<1x32xf32>
    %936 = math.tanh %935 : vector<1x32xf32>
    %937 = arith.mulf %932, %936 : vector<1x32xf32>
    %938 = vector.extract_strided_slice %5 {offsets = [30, 0], sizes = [1, 128], strides = [1, 1]} : vector<32x128xf32> to vector<1x128xf32>
    %939 = vector.extract_strided_slice %937 {offsets = [0, 0], sizes = [1, 8], strides = [1, 1]} : vector<1x32xf32> to vector<1x8xf32>
    %940 = arith.truncf %939 : vector<1x8xf32> to vector<1x8xbf16>
    %c0_187 = arith.constant 0 : index
    %c0_188 = arith.constant 0 : index
    %941 = vector.load %arg2[%c0_187, %c0_188] : memref<8x128xbf16, #tpu.memory_space<vmem>>, vector<8x128xbf16>
    %cst_189 = arith.constant dense<0.000000e+00> : vector<1x128xf32>
    %942 = tpu.matmul %940, %941, %cst_189 {dimension_numbers = #tpu.dot_dimension_numbers<[1], [0], [0], [1], [0, 0, 1, 1], [], []>} : vector<1x8xbf16>, vector<8x128xbf16>, vector<1x128xf32> -> vector<1x128xf32>
    %943 = arith.addf %938, %942 : vector<1x128xf32>
    %944 = vector.extract_strided_slice %943 {offsets = [0, 0], sizes = [1, 32], strides = [1, 1]} : vector<1x128xf32> to vector<1x32xf32>
    %945 = arith.negf %944 : vector<1x32xf32>
    %946 = math.exp %945 : vector<1x32xf32>
    %cst_190 = arith.constant 1.000000e+00 : f32
    %947 = vector.broadcast %cst_190 : f32 to vector<1x32xf32>
    %948 = arith.addf %947, %946 : vector<1x32xf32>
    %949 = arith.divf %947, %948 : vector<1x32xf32>
    %950 = vector.extract_strided_slice %943 {offsets = [0, 32], sizes = [1, 32], strides = [1, 1]} : vector<1x128xf32> to vector<1x32xf32>
    %951 = arith.negf %950 : vector<1x32xf32>
    %952 = math.exp %951 : vector<1x32xf32>
    %cst_191 = arith.constant 1.000000e+00 : f32
    %953 = vector.broadcast %cst_191 : f32 to vector<1x32xf32>
    %954 = arith.addf %953, %952 : vector<1x32xf32>
    %955 = arith.divf %953, %954 : vector<1x32xf32>
    %956 = vector.extract_strided_slice %943 {offsets = [0, 64], sizes = [1, 32], strides = [1, 1]} : vector<1x128xf32> to vector<1x32xf32>
    %957 = math.tanh %956 : vector<1x32xf32>
    %958 = vector.extract_strided_slice %943 {offsets = [0, 96], sizes = [1, 32], strides = [1, 1]} : vector<1x128xf32> to vector<1x32xf32>
    %959 = arith.negf %958 : vector<1x32xf32>
    %960 = math.exp %959 : vector<1x32xf32>
    %cst_192 = arith.constant 1.000000e+00 : f32
    %961 = vector.broadcast %cst_192 : f32 to vector<1x32xf32>
    %962 = arith.addf %961, %960 : vector<1x32xf32>
    %963 = arith.divf %961, %962 : vector<1x32xf32>
    %964 = arith.mulf %955, %935 : vector<1x32xf32>
    %965 = arith.mulf %949, %957 : vector<1x32xf32>
    %966 = arith.addf %964, %965 : vector<1x32xf32>
    %967 = math.tanh %966 : vector<1x32xf32>
    %968 = arith.mulf %963, %967 : vector<1x32xf32>
    %969 = vector.extract_strided_slice %968 {offsets = [0, 0], sizes = [1, 8], strides = [1, 1]} : vector<1x32xf32> to vector<1x8xf32>
    %c0_193 = arith.constant 0 : index
    %c0_194 = arith.constant 0 : index
    %970 = vector.load %arg4[%c0_193, %c0_194] : memref<8x128xf32, #tpu.memory_space<vmem>>, vector<8x128xf32>
    %cst_195 = arith.constant dense<0.000000e+00> : vector<1x128xf32>
    %971 = tpu.matmul %969, %970, %cst_195 {dimension_numbers = #tpu.dot_dimension_numbers<[1], [0], [0], [1], [0, 0, 1, 1], [], []>} : vector<1x8xf32>, vector<8x128xf32>, vector<1x128xf32> -> vector<1x128xf32>
    %c0_196 = arith.constant 0 : index
    %c0_197 = arith.constant 0 : index
    %972 = vector.load %arg5[%c0_196, %c0_197] : memref<1x128xf32, #tpu.memory_space<vmem>>, vector<1x128xf32>
    %973 = arith.addf %971, %972 : vector<1x128xf32>
    %cst_198 = arith.constant dense<0xFF800000> : vector<1xf32>
    %974 = vector.multi_reduction <maximumf>, %973, %cst_198 [1] : vector<1x128xf32> to vector<1xf32>
    %975 = vector.shape_cast %974 : vector<1xf32> to vector<1x1xf32>
    %976 = vector.broadcast %975 : vector<1x1xf32> to vector<1x128xf32>
    %977 = arith.subf %973, %976 : vector<1x128xf32>
    %978 = math.exp %977 : vector<1x128xf32>
    %cst_199 = arith.constant dense<0.000000e+00> : vector<1xf32>
    %979 = vector.multi_reduction <add>, %978, %cst_199 [1] : vector<1x128xf32> to vector<1xf32>
    %980 = vector.shape_cast %979 : vector<1xf32> to vector<1x1xf32>
    %981 = vector.broadcast %980 : vector<1x1xf32> to vector<1x128xf32>
    %982 = arith.divf %978, %981 : vector<1x128xf32>
    %c0_200 = arith.constant 0 : index
    %c0_201 = arith.constant 0 : index
    %983 = vector.load %arg6[%c0_200, %c0_201] : memref<1x128xf32, #tpu.memory_space<vmem>>, vector<1x128xf32>
    tpu.vector_store %arg6[%c0_200, %c0_201], %982 {strides = array<i32>} : memref<1x128xf32, #tpu.memory_space<vmem>>, vector<1x128xf32>,
    return
  }
}

</mosaic_0001>

<bundles_post_ra>
// kernel: _forward_packed.1
= control target key start
LH: loop header
LB: loop body
LE: loop exit
PB: predicated region body
PF: predicated region fallthrough
CT: control target
= control target key end

     0   :  { %v3337_v1 = vmov 0.0   ;;  %vm3338_vm0 = vmmov 0   ;;  %vm165_vm1 = vcmask 1043456   ;;  %v3339_v9 = vmov 0   ;;  %s3745_s1 = inlined_call_operand.vmem [shape: bf16[128,128], index: 1, kind: input, shape index: {}]   ;;  %s3746_s2 = inlined_call_operand.vmem [shape: bf16[8,128], index: 2, kind: input, shape index: {}]   ;;  %s3747_s0 = inlined_call_operand.vmem [shape: bf16[32,128], index: 0, kind: input, shape index: {}]   ;;  %s3748_s3 = inlined_call_operand.vmem [shape: f32[1,128], index: 3, kind: input, shape index: {}]   ;;  %s3749_s4 = inlined_call_operand.vmem [shape: f32[8,128], index: 4, kind: input, shape index: {}]   ;;  %s3750_s5 = inlined_call_operand.vmem [shape: f32[1,128], index: 5, kind: input, shape index: {}]   ;;  %s3751_s6 = inlined_call_operand.vmem [shape: f32[1,128], index: 6, kind: output, shape index: {}]  }
   0x1   :  { %v3075_v0 = vld [vmem:[%s3745_s1] sm:$0xff]   ;;  %2879 = vmatprep.subr.bf16.mxu1 %v3337_v1  ;;  %2881 = vmatprep.mubr.msk.bf16.mxu1 %vm3338_vm0, %v3337_v1  ;;  %v3076_v2 = vld [vmem:[%s3745_s1 + $0x8] sm:$0xff]   ;;  %v3077_v3 = vld [vmem:[%s3745_s1 + $0x10] sm:$0xff]   ;;  %vm161_vm2 = vcmask 64512   ;;  %vm2695_vm3 = vcmask 1040384  }
   0x2   :  { %2859 = vmatprep.subr.bf16.mxu0 %v3075_v0  ;;  %v3078_v4 = vld [vmem:[%s3745_s1 + $0x18] sm:$0xff]   ;;  %v160_v5 = vld [vmem:[%s3746_s2] sm:$0xf]  ;;  %v3080_v10 = vld [vmem:[%s3745_s1 + $0x28] sm:$0xff]  }
   0x3   :  { %2860 = vmatpush3.bf16.msra.mxu0 %v3075_v0  ;;  %v3395_v6 = vsel %vm165_vm1, %v160_v5, 0  ;;  %v3083_v7 = vld [vmem:[%s3747_s0] sm:$0xff]   ;;  %v3081_v11 = vld [vmem:[%s3745_s1 + $0x30] sm:$0xff]   ;;  %v3082_v12 = vld [vmem:[%s3745_s1 + $0x38] sm:$0xff]  }
   0x4   :  { %2861 = vmatprep.subr.bf16.mxu0 %v3076_v2  ;;  %2880 = vmatpush3.bf16.msra.mxu1 %v3395_v6  ;;  %v3079_v8 = vld [vmem:[%s3745_s1 + $0x20] sm:$0xff]   ;;  %v3084_v13 = vld [vmem:[%s3747_s0 + $0x8] sm:$0xff]   ;;  %s3340_s0 = smov 64  }
   0x5   :  { %2875 = vmatprep.mubr.bf16.mxu0 %v3083_v7  ;;  %2885 = vmatprep.subr.bf16.mxu1 %v3337_v1  ;;  %v2712_v18 = vld [vmem:[%s3748_s3] ss:$0 sm:$0xff]  ;;  %s3341_s3 = smov 32  }
   0x7   :  { %2862 = vmatpush3.bf16.msra.mxu0 %v3076_v2  ;;  %2882 = vmatmul.mubr.bf16.vlgmr.msra.gmra.mrb[0].mxu1 %v3339_v9 }
   0x8   :  { %2863 = vmatprep.subr.bf16.mxu0 %v3077_v3  ;;  %2886 = vmatpush3.bf16.msra.mxu1 %v3395_v6 }
   0x9   :  { %2887 = vmatprep.mubr.msk.bf16.mxu1 %vm3338_vm0, %v3337_v1  ;;  %2891 = vmatprep.subr.bf16.mxu1 %v3337_v1 }
   0xb   :  { %2864 = vmatpush3.bf16.msra.mxu0 %v3077_v3 }
   0xc   :  { %2865 = vmatprep.subr.bf16.mxu0 %v3078_v4 }
   0xf   :  { %2866 = vmatpush3.bf16.msra.mxu0 %v3078_v4 }
  0x10   :  { %2867 = vmatprep.subr.bf16.mxu0 %v3079_v8 }
  0x13   :  { %2868 = vmatpush3.bf16.msra.mxu0 %v3079_v8 }
  0x14   :  { %2869 = vmatprep.subr.bf16.mxu0 %v3080_v10 }
  0x17   :  { %2870 = vmatpush3.bf16.msra.mxu0 %v3080_v10 }
  0x18   :  { %2871 = vmatprep.subr.bf16.mxu0 %v3081_v11 }
  0x1b   :  { %2872 = vmatpush3.bf16.msra.mxu0 %v3081_v11 }
  0x1c   :  { %2873 = vmatprep.subr.bf16.mxu0 %v3082_v12 }
  0x1f   :  { %2874 = vmatpush3.bf16.msra.mxu0 %v3082_v12 }
  0x20   :  { %2909 = vmatprep.subr.bf16.mxu0 %v3337_v1 }
  0x22   :  { %2876 = vmatmul.mubr.bf16.vlgmr.msra.gmra.mrb[0].mxu0 %v3084_v13 }
  0x23   :  { %2910 = vmatpush3.bf16.msra.mxu0 %v3395_v6  ;;  %2911 = vmatprep.mubr.msk.bf16.mxu0 %vm3338_vm0, %v3337_v1 }
  0x24   :  { %2921 = vmatprep.subr.bf16.mxu0 %v3337_v1 }
  0xda   :  { %v203_v14 = vpop.f32.mrb[0].mxu1 }
  0xdb   :  { %v2883_v15 = vpop.f32.mrb[1].mxu1 }
  0xdc   :  { %v206_v16 = vpop.f32.mrb[2].mxu1 }
  0xdd   :  { %v2884_v17 = vpop.f32.mrb[3].mxu1 }
  0xf5   :  { %v2877_v19 = vpop.f32.mrb[0].mxu0 }
  0xf6   :  { %v3429_v20 = vadd.f32 %v2877_v19, %v2712_v18  ;;  %v145_v21 = vpop.f32.mrb[1].mxu0 }
  0xf7   :  { %v3431_v22 = vadd.f32 %v2712_v18, %v145_v21  ;;  %v2878_v23 = vpop.f32.mrb[2].mxu0 }
  0xf8   :  { %v3433_v24 = vadd.f32 %v2878_v23, %v2712_v18  ;;  %v148_v25 = vpop.f32.mrb[3].mxu0 }
  0xf9   :  { %v3435_v26 = vadd.f32 %v2712_v18, %v148_v25  ;;  %v209_v27 = vadd.f32 %v203_v14, %v3431_v22 }
  0xfb   :  { %3085 = vtanh.f32 %v209_v27  ;;  %v2723_v29 = vmul.f32 -1.442695, %v209_v27 }
  0xfd   :  { %3087 = vpow2.f32 %v2723_v29 }
 0x105   :  { %v3086_v28 = vpop.eup %3085 }
 0x106   :  { %219 = vrot.lane.b32.xlu0 %v3086_v28, %s3340_s0 }
 0x107   :  { %v3088_v30 = vpop.eup %3087 }
 0x108   :  { %v213_v31 = vadd.f32 1.0, %v3088_v30 }
 0x10a   :  { %3089 = vrcp.f32 %v213_v31 }
 0x114   :  { %v3090_v32 = vpop.eup %3089 }
 0x115   :  { %v217_v35 = vmul.f32 0.0, %v3090_v32 }
 0x178   :  { %v220_v33 = vpop.permute.xlu0 %219 }
 0x179   :  { %v222_v34 = vmul.f32 %v3090_v32, %v220_v33 }
 0x17b   :  { %224 = vrot.lane.b32.xlu0 %v222_v34, %s3341_s3 }
 0x1ed   :  { %v225_v36 = vpop.permute.xlu0 %224 }
 0x1ee   :  { %v227_v37 = vadd.f32 %v225_v36, %v217_v35 }
 0x1f0   :  { %3091 = vtanh.f32 %v227_v37  ;;  %v293_v56 = vrot.slane %v227_v37, 7 }
 0x1fa   :  { %v3092_v38 = vpop.eup %3091 }
 0x1fb   :  { %230 = vrot.lane.b32.xlu1 %v3092_v38, %s3340_s0 }
 0x26d   :  { %v231_v39 = vpop.permute.xlu1 %230 }
 0x26e   :  { %v233_v40 = vmul.f32 %v3090_v32, %v231_v39 }
 0x270   :  { %v234_v41 = vpack.c.bf16 %v233_v40, %v233_v40 }
 0x272   :  { %236 = vrot.lane.b32.xlu1 %v234_v41, %s3341_s3 }
 0x2e4   :  { %v237_v42 = vpop.permute.xlu1 %236 }
 0x2e5   :  { %2888 = vmatmul.mubr.msk.bf16.vlgmr.msra.gmra.mrb[4].mxu1 %vm161_vm2, %v237_v42 }
 0x2e6   :  { %2892 = vmatpush3.bf16.msra.mxu1 %v3395_v6  ;;  %2893 = vmatprep.mubr.msk.bf16.mxu1 %vm3338_vm0, %v3337_v1 }
 0x2e7   :  { %2897 = vmatprep.subr.bf16.mxu1 %v3337_v1 }
 0x3b8   :  { %v275_v43 = vpop.f32.mrb[4].mxu1 }
 0x3b9   :  { %v282_v44 = vrot.slane %v275_v43, 7  ;;  %v2889_v45 = vpop.f32.mrb[5].mxu1 }
 0x3ba   :  { %v278_v46 = vpop.f32.mrb[6].mxu1 }
 0x3bb   :  { %v284_v47 = vadd.f32 %v282_v44, %v3431_v22  ;;  %v2890_v48 = vpop.f32.mrb[7].mxu1 }
 0x3bd   :  { %3093 = vtanh.f32 %v284_v47  ;;  %v2725_v50 = vmul.f32 -1.442695, %v284_v47 }
 0x3bf   :  { %3095 = vpow2.f32 %v2725_v50 }
 0x3c7   :  { %v3094_v49 = vpop.eup %3093 }
 0x3c8   :  { %297 = vrot.lane.b32.xlu0 %v3094_v49, %s3340_s0 }
 0x3c9   :  { %v3096_v51 = vpop.eup %3095 }
 0x3ca   :  { %v288_v52 = vadd.f32 1.0, %v3096_v51 }
 0x3cc   :  { %3097 = vrcp.f32 %v288_v52 }
 0x3d6   :  { %v3098_v53 = vpop.eup %3097 }
 0x3d7   :  { %v295_v57 = vmul.f32 %v3098_v53, %v293_v56 }
 0x43a   :  { %v298_v54 = vpop.permute.xlu0 %297 }
 0x43b   :  { %v300_v55 = vmul.f32 %v3098_v53, %v298_v54 }
 0x43d   :  { %302 = vrot.lane.b32.xlu1 %v300_v55, %s3341_s3 }
 0x4af   :  { %v303_v58 = vpop.permute.xlu1 %302 }
 0x4b0   :  { %v305_v59 = vadd.f32 %v303_v58, %v295_v57 }
 0x4b2   :  { %3099 = vtanh.f32 %v305_v59  ;;  %v373_v17 = vrot.slane %v305_v59, 7 }
 0x4bc   :  { %v3100_v60 = vpop.eup %3099 }
 0x4bd   :  { %308 = vrot.lane.b32.xlu0 %v3100_v60, %s3340_s0 }
 0x52f   :  { %v309_v61 = vpop.permute.xlu0 %308 }
 0x530   :  { %v311_v62 = vmul.f32 %v3098_v53, %v309_v61 }
 0x532   :  { %v312_v63 = vpack.c.bf16 %v311_v62, %v311_v62 }
 0x534   :  { %v314_v0 = vshrl.u32 %v312_v63, 16 }
 0x536   :  { %316 = vrot.lane.b32.xlu1 %v314_v0, %s3341_s3 }
 0x5a8   :  { %v317_v2 = vpop.permute.xlu1 %316 }
 0x5a9   :  { %2894 = vmatmul.mubr.msk.bf16.vlgmr.msra.gmra.mrb[8].mxu1 %vm161_vm2, %v317_v2 }
 0x5aa   :  { %2898 = vmatpush3.bf16.msra.mxu1 %v3395_v6  ;;  %2899 = vmatprep.mubr.msk.bf16.mxu1 %vm3338_vm0, %v3337_v1 }
 0x5ab   :  { %2903 = vmatprep.subr.bf16.mxu1 %v3337_v1 }
 0x67c   :  { %v355_v3 = vpop.f32.mrb[8].mxu1 }
 0x67d   :  { %v362_v4 = vrot.slane %v355_v3, 6  ;;  %v2895_v5 = vpop.f32.mrb[9].mxu1 }
 0x67e   :  { %v358_v7 = vpop.f32.mrb[10].mxu1 }
 0x67f   :  { %v364_v8 = vadd.f32 %v362_v4, %v3431_v22  ;;  %v2896_v9 = vpop.f32.mrb[11].mxu1 }
 0x681   :  { %3101 = vtanh.f32 %v364_v8  ;;  %v2727_v11 = vmul.f32 -1.442695, %v364_v8 }
 0x683   :  { %3103 = vpow2.f32 %v2727_v11 }
 0x68b   :  { %v3102_v10 = vpop.eup %3101 }
 0x68c   :  { %377 = vrot.lane.b32.xlu0 %v3102_v10, %s3340_s0 }
 0x68d   :  { %v3104_v12 = vpop.eup %3103 }
 0x68e   :  { %v368_v13 = vadd.f32 1.0, %v3104_v12 }
 0x690   :  { %3105 = vrcp.f32 %v368_v13 }
 0x69a   :  { %v3106_v14 = vpop.eup %3105 }
 0x69b   :  { %v375_v18 = vmul.f32 %v3106_v14, %v373_v17 }
 0x6fe   :  { %v378_v15 = vpop.permute.xlu0 %377 }
 0x6ff   :  { %v380_v16 = vmul.f32 %v3106_v14, %v378_v15 }
 0x701   :  { %382 = vrot.lane.b32.xlu1 %v380_v16, %s3341_s3 }
 0x773   :  { %v383_v19 = vpop.permute.xlu1 %382 }
 0x774   :  { %v385_v21 = vadd.f32 %v383_v19, %v375_v18 }
 0x776   :  { %3107 = vtanh.f32 %v385_v21  ;;  %v452_v44 = vrot.slane %v385_v21, 7 }
 0x780   :  { %v3108_v23 = vpop.eup %3107 }
 0x781   :  { %388 = vrot.lane.b32.xlu0 %v3108_v23, %s3340_s0 }
 0x7f3   :  { %v389_v25 = vpop.permute.xlu0 %388 }
 0x7f4   :  { %v391_v27 = vmul.f32 %v3106_v14, %v389_v25 }
 0x7f6   :  { %v392_v28 = vpack.c.bf16 %v391_v27, %v391_v27 }
 0x7f8   :  { %v394_v29 = vrot.slane %v392_v28, 1 }
 0x7fa   :  { %395 = vrot.lane.b32.xlu1 %v394_v29, %s3341_s3 }
 0x86c   :  { %v396_v30 = vpop.permute.xlu1 %395 }
 0x86d   :  { %2900 = vmatmul.mubr.msk.bf16.vlgmr.msra.gmra.mrb[12].mxu1 %vm161_vm2, %v396_v30 }
 0x86e   :  { %2904 = vmatpush3.bf16.msra.mxu1 %v3395_v6  ;;  %2905 = vmatprep.mubr.msk.bf16.mxu1 %vm3338_vm0, %v3337_v1 }
 0x86f   :  { %2915 = vmatprep.subr.bf16.mxu1 %v3337_v1 }
 0x940   :  { %v434_v31 = vpop.f32.mrb[12].mxu1 }
 0x941   :  { %v441_v32 = vrot.slane %v434_v31, 5  ;;  %v2901_v33 = vpop.f32.mrb[13].mxu1 }
 0x942   :  { %v437_v34 = vpop.f32.mrb[14].mxu1 }
 0x943   :  { %v443_v35 = vadd.f32 %v441_v32, %v3431_v22  ;;  %v2902_v36 = vpop.f32.mrb[15].mxu1 }
 0x945   :  { %3109 = vtanh.f32 %v443_v35  ;;  %v2729_v38 = vmul.f32 -1.442695, %v443_v35 }
 0x947   :  { %3111 = vpow2.f32 %v2729_v38 }
 0x94f   :  { %v3110_v37 = vpop.eup %3109 }
 0x950   :  { %456 = vrot.lane.b32.xlu0 %v3110_v37, %s3340_s0 }
 0x951   :  { %v3112_v39 = vpop.eup %3111 }
 0x952   :  { %v447_v40 = vadd.f32 1.0, %v3112_v39 }
 0x954   :  { %3113 = vrcp.f32 %v447_v40 }
 0x95e   :  { %v3114_v41 = vpop.eup %3113 }
 0x95f   :  { %v454_v45 = vmul.f32 %v3114_v41, %v452_v44 }
 0x9c2   :  { %v457_v42 = vpop.permute.xlu0 %456 }
 0x9c3   :  { %v459_v43 = vmul.f32 %v3114_v41, %v457_v42 }
 0x9c5   :  { %461 = vrot.lane.b32.xlu1 %v459_v43, %s3341_s3 }
 0xa37   :  { %v462_v46 = vpop.permute.xlu1 %461 }
 0xa38   :  { %v464_v47 = vadd.f32 %v462_v46, %v454_v45 }
 0xa3a   :  { %3115 = vtanh.f32 %v464_v47  ;;  %v533_v5 = vrot.slane %v464_v47, 7 }
 0xa44   :  { %v3116_v48 = vpop.eup %3115 }
 0xa45   :  { %467 = vrot.lane.b32.xlu0 %v3116_v48, %s3340_s0 }
 0xab7   :  { %v468_v49 = vpop.permute.xlu0 %467 }
 0xab8   :  { %v470_v50 = vmul.f32 %v3114_v41, %v468_v49 }
 0xaba   :  { %v471_v51 = vpack.c.bf16 %v470_v50, %v470_v50 }
 0xabc   :  { %v473_v52 = vshrl.u32 %v471_v51, 16 }
 0xabe   :  { %v475_v53 = vrot.slane %v473_v52, 1 }
 0xac0   :  { %476 = vrot.lane.b32.xlu1 %v475_v53, %s3341_s3 }
 0xb32   :  { %v477_v54 = vpop.permute.xlu1 %476 }
 0xb33   :  { %2906 = vmatmul.mubr.msk.bf16.vlgmr.msra.gmra.mrb[16].mxu1 %vm161_vm2, %v477_v54 }
 0xb34   :  { %2916 = vmatpush3.bf16.msra.mxu1 %v3395_v6  ;;  %2917 = vmatprep.mubr.msk.bf16.mxu1 %vm3338_vm0, %v3337_v1 }
 0xb35   :  { %2927 = vmatprep.subr.bf16.mxu1 %v3337_v1 }
 0xc06   :  { %v515_v55 = vpop.f32.mrb[16].mxu1 }
 0xc07   :  { %v522_v56 = vrot.slane %v515_v55, 4  ;;  %v2907_v57 = vpop.f32.mrb[17].mxu1 }
 0xc08   :  { %v518_v58 = vpop.f32.mrb[18].mxu1 }
 0xc09   :  { %v524_v59 = vadd.f32 %v522_v56, %v3431_v22  ;;  %v2908_v60 = vpop.f32.mrb[19].mxu1 }
 0xc0b   :  { %3117 = vtanh.f32 %v524_v59  ;;  %v2731_v62 = vmul.f32 -1.442695, %v524_v59 }
 0xc0d   :  { %3119 = vpow2.f32 %v2731_v62 }
 0xc15   :  { %v3118_v61 = vpop.eup %3117 }
 0xc16   :  { %537 = vrot.lane.b32.xlu0 %v3118_v61, %s3340_s0 }
 0xc17   :  { %v3120_v63 = vpop.eup %3119 }
 0xc18   :  { %v528_v0 = vadd.f32 1.0, %v3120_v63 }
 0xc1a   :  { %3121 = vrcp.f32 %v528_v0 }
 0xc24   :  { %v3122_v2 = vpop.eup %3121 }
 0xc25   :  { %v535_v7 = vmul.f32 %v3122_v2, %v533_v5 }
 0xc88   :  { %v538_v3 = vpop.permute.xlu0 %537 }
 0xc89   :  { %v540_v4 = vmul.f32 %v3122_v2, %v538_v3 }
 0xc8b   :  { %542 = vrot.lane.b32.xlu1 %v540_v4, %s3341_s3 }
 0xcfd   :  { %v543_v8 = vpop.permute.xlu1 %542 }
 0xcfe   :  { %v545_v9 = vadd.f32 %v543_v8, %v535_v7 }
 0xd00   :  { %3123 = vtanh.f32 %v545_v9  ;;  %v612_v33 = vrot.slane %v545_v9, 7 }
 0xd0a   :  { %v3124_v10 = vpop.eup %3123 }
 0xd0b   :  { %548 = vrot.lane.b32.xlu0 %v3124_v10, %s3340_s0 }
 0xd7d   :  { %v549_v11 = vpop.permute.xlu0 %548 }
 0xd7e   :  { %v551_v12 = vmul.f32 %v3122_v2, %v549_v11 }
 0xd80   :  { %v552_v13 = vpack.c.bf16 %v551_v12, %v551_v12 }
 0xd82   :  { %v554_v14 = vrot.slane %v552_v13, 2 }
 0xd84   :  { %555 = vrot.lane.b32.xlu1 %v554_v14, %s3341_s3 }
 0xdf6   :  { %v556_v15 = vpop.permute.xlu1 %555 }
 0xdf7   :  { %2912 = vmatmul.mubr.msk.bf16.vlgmr.msra.gmra.mrb[4].mxu0 %vm161_vm2, %v556_v15 }
 0xdf8   :  { %2922 = vmatpush3.bf16.msra.mxu0 %v3395_v6  ;;  %2923 = vmatprep.mubr.msk.bf16.mxu0 %vm3338_vm0, %v3337_v1 }
 0xdf9   :  { %2933 = vmatprep.subr.bf16.mxu0 %v3337_v1 }
 0xeca   :  { %v594_v16 = vpop.f32.mrb[4].mxu0 }
 0xecb   :  { %v601_v17 = vrot.slane %v594_v16, 3  ;;  %v2913_v18 = vpop.f32.mrb[5].mxu0 }
 0xecc   :  { %v597_v19 = vpop.f32.mrb[6].mxu0 }
 0xecd   :  { %v603_v21 = vadd.f32 %v601_v17, %v3431_v22  ;;  %v2914_v23 = vpop.f32.mrb[7].mxu0 }
 0xecf   :  { %3125 = vtanh.f32 %v603_v21  ;;  %v2733_v27 = vmul.f32 -1.442695, %v603_v21 }
 0xed1   :  { %3127 = vpow2.f32 %v2733_v27 }
 0xed9   :  { %v3126_v25 = vpop.eup %3125 }
 0xeda   :  { %616 = vrot.lane.b32.xlu0 %v3126_v25, %s3340_s0 }
 0xedb   :  { %v3128_v28 = vpop.eup %3127 }
 0xedc   :  { %v607_v29 = vadd.f32 1.0, %v3128_v28 }
 0xede   :  { %3129 = vrcp.f32 %v607_v29 }
 0xee8   :  { %v3130_v30 = vpop.eup %3129 }
 0xee9   :  { %v614_v34 = vmul.f32 %v3130_v30, %v612_v33 }
 0xf4c   :  { %v617_v31 = vpop.permute.xlu0 %616 }
 0xf4d   :  { %v619_v32 = vmul.f32 %v3130_v30, %v617_v31 }
 0xf4f   :  { %621 = vrot.lane.b32.xlu1 %v619_v32, %s3341_s3 }
 0xfc1   :  { %v622_v35 = vpop.permute.xlu1 %621 }
 0xfc2   :  { %v624_v36 = vadd.f32 %v622_v35, %v614_v34 }
 0xfc4   :  { %3131 = vtanh.f32 %v624_v36  ;;  %v693_v57 = vrot.slane %v624_v36, 7 }
 0xfce   :  { %v3132_v37 = vpop.eup %3131 }
 0xfcf   :  { %627 = vrot.lane.b32.xlu0 %v3132_v37, %s3340_s0 }
0x1041   :  { %v628_v38 = vpop.permute.xlu0 %627 }
0x1042   :  { %v630_v39 = vmul.f32 %v3130_v30, %v628_v38 }
0x1044   :  { %v631_v40 = vpack.c.bf16 %v630_v39, %v630_v39 }
0x1046   :  { %v633_v41 = vshrl.u32 %v631_v40, 16 }
0x1048   :  { %v635_v42 = vrot.slane %v633_v41, 2 }
0x104a   :  { %636 = vrot.lane.b32.xlu1 %v635_v42, %s3341_s3 }
0x10bc   :  { %v637_v43 = vpop.permute.xlu1 %636 }
0x10bd   :  { %2918 = vmatmul.mubr.msk.bf16.vlgmr.msra.gmra.mrb[20].mxu1 %vm161_vm2, %v637_v43 }
0x10be   :  { %2928 = vmatpush3.bf16.msra.mxu1 %v3395_v6  ;;  %2929 = vmatprep.mubr.msk.bf16.mxu1 %vm3338_vm0, %v3337_v1 }
0x10bf   :  { %2939 = vmatprep.subr.bf16.mxu1 %v3337_v1 }
0x1190   :  { %v675_v44 = vpop.f32.mrb[20].mxu1 }
0x1191   :  { %v682_v45 = vrot.slane %v675_v44, 2  ;;  %v2919_v46 = vpop.f32.mrb[21].mxu1 }
0x1192   :  { %v678_v47 = vpop.f32.mrb[22].mxu1 }
0x1193   :  { %v684_v48 = vadd.f32 %v682_v45, %v3431_v22  ;;  %v2920_v49 = vpop.f32.mrb[23].mxu1 }
0x1195   :  { %3133 = vtanh.f32 %v684_v48  ;;  %v2735_v51 = vmul.f32 -1.442695, %v684_v48 }
0x1197   :  { %3135 = vpow2.f32 %v2735_v51 }
0x119f   :  { %v3134_v50 = vpop.eup %3133 }
0x11a0   :  { %697 = vrot.lane.b32.xlu0 %v3134_v50, %s3340_s0 }
0x11a1   :  { %v3136_v52 = vpop.eup %3135 }
0x11a2   :  { %v688_v53 = vadd.f32 1.0, %v3136_v52 }
0x11a4   :  { %3137 = vrcp.f32 %v688_v53 }
0x11ae   :  { %v3138_v54 = vpop.eup %3137 }
0x11af   :  { %v695_v58 = vmul.f32 %v3138_v54, %v693_v57 }
0x1212   :  { %v698_v55 = vpop.permute.xlu0 %697 }
0x1213   :  { %v700_v56 = vmul.f32 %v3138_v54, %v698_v55 }
0x1215   :  { %702 = vrot.lane.b32.xlu1 %v700_v56, %s3341_s3 }
0x1287   :  { %v703_v59 = vpop.permute.xlu1 %702 }
0x1288   :  { %v705_v60 = vadd.f32 %v703_v59, %v695_v58 }
0x128a   :  { %3139 = vtanh.f32 %v705_v60  ;;  %v772_v18 = vrot.slane %v705_v60, 7 }
0x1294   :  { %v3140_v61 = vpop.eup %3139 }
0x1295   :  { %708 = vrot.lane.b32.xlu0 %v3140_v61, %s3340_s0 }
0x1307   :  { %v709_v62 = vpop.permute.xlu0 %708 }
0x1308   :  { %v711_v63 = vmul.f32 %v3138_v54, %v709_v62 }
0x130a   :  { %v712_v0 = vpack.c.bf16 %v711_v63, %v711_v63 }
0x130c   :  { %v714_v2 = vrot.slane %v712_v0, 3 }
0x130e   :  { %715 = vrot.lane.b32.xlu1 %v714_v2, %s3341_s3 }
0x1380   :  { %v716_v3 = vpop.permute.xlu1 %715 }
0x1381   :  { %2924 = vmatmul.mubr.msk.bf16.vlgmr.msra.gmra.mrb[8].mxu0 %vm161_vm2, %v716_v3 }
0x1382   :  { %2934 = vmatpush3.bf16.msra.mxu0 %v3395_v6  ;;  %2935 = vmatprep.mubr.msk.bf16.mxu0 %vm3338_vm0, %v3337_v1 }
0x1383   :  { %2945 = vmatprep.subr.bf16.mxu0 %v3337_v1 }
0x1454   :  { %v754_v4 = vpop.f32.mrb[8].mxu0 }
0x1455   :  { %v761_v5 = vrot.slane %v754_v4, 1  ;;  %v2925_v7 = vpop.f32.mrb[9].mxu0 }
0x1456   :  { %v757_v8 = vpop.f32.mrb[10].mxu0 }
0x1457   :  { %v763_v9 = vadd.f32 %v761_v5, %v3431_v22  ;;  %v2926_v10 = vpop.f32.mrb[11].mxu0 }
0x1459   :  { %3141 = vtanh.f32 %v763_v9  ;;  %v2737_v12 = vmul.f32 -1.442695, %v763_v9 }
0x145b   :  { %3143 = vpow2.f32 %v2737_v12 }
0x1463   :  { %v3142_v11 = vpop.eup %3141 }
0x1464   :  { %776 = vrot.lane.b32.xlu0 %v3142_v11, %s3340_s0 }
0x1465   :  { %v3144_v13 = vpop.eup %3143 }
0x1466   :  { %v767_v14 = vadd.f32 1.0, %v3144_v13 }
0x1468   :  { %3145 = vrcp.f32 %v767_v14 }
0x1472   :  { %v3146_v15 = vpop.eup %3145 }
0x1473   :  { %v774_v19 = vmul.f32 %v3146_v15, %v772_v18 }
0x14d6   :  { %v777_v16 = vpop.permute.xlu0 %776 }
0x14d7   :  { %v779_v17 = vmul.f32 %v3146_v15, %v777_v16 }
0x14d9   :  { %781 = vrot.lane.b32.xlu1 %v779_v17, %s3341_s3 }
0x154b   :  { %v782_v21 = vpop.permute.xlu1 %781 }
0x154c   :  { %v784_v23 = vadd.f32 %v782_v21, %v774_v19 }
0x154e   :  { %3147 = vtanh.f32 %v784_v23  ;;  %v850_v44 = vrot.slane %v784_v23, 7 }
0x1558   :  { %v3148_v22 = vpop.eup %3147 }
0x1559   :  { %787 = vrot.lane.b32.xlu0 %v3148_v22, %s3340_s0 }
0x15cb   :  { %v788_v25 = vpop.permute.xlu0 %787 }
0x15cc   :  { %v790_v27 = vmul.f32 %v3146_v15, %v788_v25 }
0x15ce   :  { %v791_v28 = vpack.c.bf16 %v790_v27, %v790_v27 }
0x15d0   :  { %v793_v29 = vshrl.u32 %v791_v28, 16 }
0x15d2   :  { %v795_v30 = vrot.slane %v793_v29, 3 }
0x15d4   :  { %796 = vrot.lane.b32.xlu1 %v795_v30, %s3341_s3 }
0x1646   :  { %v797_v31 = vpop.permute.xlu1 %796 }
0x1647   :  { %2930 = vmatmul.mubr.msk.bf16.vlgmr.msra.gmra.mrb[24].mxu1 %vm161_vm2, %v797_v31 }
0x1648   :  { %2940 = vmatpush3.bf16.msra.mxu1 %v3395_v6  ;;  %2941 = vmatprep.mubr.msk.bf16.mxu1 %vm3338_vm0, %v3337_v1 }
0x1649   :  { %2951 = vmatprep.subr.bf16.mxu1 %v3337_v1 }
0x171a   :  { %v835_v32 = vpop.f32.mrb[24].mxu1 }
0x171b   :  { %v841_v33 = vadd.f32 %v835_v32, %v3435_v26  ;;  %v2931_v34 = vpop.f32.mrb[25].mxu1 }
0x171c   :  { %v838_v35 = vpop.f32.mrb[26].mxu1 }
0x171d   :  { %3149 = vtanh.f32 %v841_v33  ;;  %v2932_v36 = vpop.f32.mrb[27].mxu1  ;;  %v2739_v38 = vmul.f32 -1.442695, %v841_v33 }
0x171f   :  { %3151 = vpow2.f32 %v2739_v38 }
0x1727   :  { %v3150_v37 = vpop.eup %3149 }
0x1728   :  { %854 = vrot.lane.b32.xlu0 %v3150_v37, %s3340_s0 }
0x1729   :  { %v3152_v39 = vpop.eup %3151 }
0x172a   :  { %v845_v40 = vadd.f32 1.0, %v3152_v39 }
0x172c   :  { %3153 = vrcp.f32 %v845_v40 }
0x1736   :  { %v3154_v41 = vpop.eup %3153 }
0x1737   :  { %v852_v45 = vmul.f32 %v3154_v41, %v850_v44 }
0x179a   :  { %v855_v42 = vpop.permute.xlu0 %854 }
0x179b   :  { %v857_v43 = vmul.f32 %v3154_v41, %v855_v42 }
0x179d   :  { %859 = vrot.lane.b32.xlu1 %v857_v43, %s3341_s3 }
0x180f   :  { %v860_v46 = vpop.permute.xlu1 %859 }
0x1810   :  { %v862_v47 = vadd.f32 %v860_v46, %v852_v45 }
0x1812   :  { %3155 = vtanh.f32 %v862_v47  ;;  %v928_v3 = vrot.slane %v862_v47, 7 }
0x181c   :  { %v3156_v48 = vpop.eup %3155 }
0x181d   :  { %865 = vrot.lane.b32.xlu0 %v3156_v48, %s3340_s0 }
0x188f   :  { %v866_v49 = vpop.permute.xlu0 %865 }
0x1890   :  { %v868_v50 = vmul.f32 %v3154_v41, %v866_v49 }
0x1892   :  { %v869_v51 = vpack.c.bf16 %v868_v50, %v868_v50 }
0x1894   :  { %871 = vrot.lane.b32.xlu1 %v869_v51, %s3341_s3 }
0x1906   :  { %v872_v52 = vpop.permute.xlu1 %871 }
0x1907   :  { %2936 = vmatmul.mubr.msk.bf16.vlgmr.msra.gmra.mrb[12].mxu0 %vm161_vm2, %v872_v52 }
0x1908   :  { %2946 = vmatpush3.bf16.msra.mxu0 %v3395_v6  ;;  %2947 = vmatprep.mubr.msk.bf16.mxu0 %vm3338_vm0, %v3337_v1 }
0x1909   :  { %2957 = vmatprep.subr.bf16.mxu0 %v3337_v1 }
0x19da   :  { %v910_v53 = vpop.f32.mrb[12].mxu0 }
0x19db   :  { %v917_v54 = vrot.slane %v910_v53, 7  ;;  %v2937_v55 = vpop.f32.mrb[13].mxu0 }
0x19dc   :  { %v913_v56 = vpop.f32.mrb[14].mxu0 }
0x19dd   :  { %v919_v57 = vadd.f32 %v917_v54, %v3435_v26  ;;  %v2938_v58 = vpop.f32.mrb[15].mxu0 }
0x19df   :  { %3157 = vtanh.f32 %v919_v57  ;;  %v2741_v60 = vmul.f32 -1.442695, %v919_v57 }
0x19e1   :  { %3159 = vpow2.f32 %v2741_v60 }
0x19e9   :  { %v3158_v59 = vpop.eup %3157 }
0x19ea   :  { %932 = vrot.lane.b32.xlu0 %v3158_v59, %s3340_s0 }
0x19eb   :  { %v3160_v61 = vpop.eup %3159 }
0x19ec   :  { %v923_v62 = vadd.f32 1.0, %v3160_v61 }
0x19ee   :  { %3161 = vrcp.f32 %v923_v62 }
0x19f8   :  { %v3162_v63 = vpop.eup %3161 }
0x19f9   :  { %v930_v4 = vmul.f32 %v3162_v63, %v928_v3 }
0x1a5c   :  { %v933_v0 = vpop.permute.xlu0 %932 }
0x1a5d   :  { %v935_v2 = vmul.f32 %v3162_v63, %v933_v0 }
0x1a5f   :  { %937 = vrot.lane.b32.xlu1 %v935_v2, %s3341_s3 }
0x1ad1   :  { %v938_v5 = vpop.permute.xlu1 %937 }
0x1ad2   :  { %v940_v7 = vadd.f32 %v938_v5, %v930_v4 }
0x1ad4   :  { %3163 = vtanh.f32 %v940_v7  ;;  %v1008_v30 = vrot.slane %v940_v7, 7 }
0x1ade   :  { %v3164_v8 = vpop.eup %3163 }
0x1adf   :  { %943 = vrot.lane.b32.xlu0 %v3164_v8, %s3340_s0 }
0x1b51   :  { %v944_v9 = vpop.permute.xlu0 %943 }
0x1b52   :  { %v946_v10 = vmul.f32 %v3162_v63, %v944_v9 }
0x1b54   :  { %v947_v11 = vpack.c.bf16 %v946_v10, %v946_v10 }
0x1b56   :  { %v949_v12 = vshrl.u32 %v947_v11, 16 }
0x1b58   :  { %951 = vrot.lane.b32.xlu1 %v949_v12, %s3341_s3 }
0x1bca   :  { %v952_v13 = vpop.permute.xlu1 %951 }
0x1bcb   :  { %2942 = vmatmul.mubr.msk.bf16.vlgmr.msra.gmra.mrb[28].mxu1 %vm161_vm2, %v952_v13 }
0x1bcc   :  { %2952 = vmatpush3.bf16.msra.mxu1 %v3395_v6  ;;  %2953 = vmatprep.mubr.msk.bf16.mxu1 %vm3338_vm0, %v3337_v1 }
0x1bcd   :  { %2963 = vmatprep.subr.bf16.mxu1 %v3337_v1 }
0x1c9e   :  { %v990_v14 = vpop.f32.mrb[28].mxu1 }
0x1c9f   :  { %v997_v15 = vrot.slane %v990_v14, 6  ;;  %v2943_v16 = vpop.f32.mrb[29].mxu1 }
0x1ca0   :  { %v993_v17 = vpop.f32.mrb[30].mxu1 }
0x1ca1   :  { %v999_v18 = vadd.f32 %v997_v15, %v3435_v26  ;;  %v2944_v19 = vpop.f32.mrb[31].mxu1 }
0x1ca3   :  { %3165 = vtanh.f32 %v999_v18  ;;  %v2743_v23 = vmul.f32 -1.442695, %v999_v18 }
0x1ca5   :  { %3167 = vpow2.f32 %v2743_v23 }
0x1cad   :  { %v3166_v21 = vpop.eup %3165 }
0x1cae   :  { %1012 = vrot.lane.b32.xlu0 %v3166_v21, %s3340_s0 }
0x1caf   :  { %v3168_v22 = vpop.eup %3167 }
0x1cb0   :  { %v1003_v25 = vadd.f32 1.0, %v3168_v22 }
0x1cb2   :  { %3169 = vrcp.f32 %v1003_v25 }
0x1cbc   :  { %v3170_v27 = vpop.eup %3169 }
0x1cbd   :  { %v1010_v31 = vmul.f32 %v3170_v27, %v1008_v30 }
0x1d20   :  { %v1013_v28 = vpop.permute.xlu0 %1012 }
0x1d21   :  { %v1015_v29 = vmul.f32 %v3170_v27, %v1013_v28 }
0x1d23   :  { %1017 = vrot.lane.b32.xlu1 %v1015_v29, %s3341_s3 }
0x1d95   :  { %v1018_v32 = vpop.permute.xlu1 %1017 }
0x1d96   :  { %v1020_v33 = vadd.f32 %v1018_v32, %v1010_v31 }
0x1d98   :  { %3171 = vtanh.f32 %v1020_v33  ;;  %v1087_v53 = vrot.slane %v1020_v33, 7 }
0x1da2   :  { %v3172_v34 = vpop.eup %3171 }
0x1da3   :  { %1023 = vrot.lane.b32.xlu0 %v3172_v34, %s3340_s0 }
0x1e15   :  { %v1024_v35 = vpop.permute.xlu0 %1023 }
0x1e16   :  { %v1026_v36 = vmul.f32 %v3170_v27, %v1024_v35 }
0x1e18   :  { %v1027_v37 = vpack.c.bf16 %v1026_v36, %v1026_v36 }
0x1e1a   :  { %v1029_v38 = vrot.slane %v1027_v37, 1 }
0x1e1c   :  { %1030 = vrot.lane.b32.xlu1 %v1029_v38, %s3341_s3 }
0x1e8e   :  { %v1031_v39 = vpop.permute.xlu1 %1030 }
0x1e8f   :  { %2948 = vmatmul.mubr.msk.bf16.vlgmr.msra.gmra.mrb[16].mxu0 %vm161_vm2, %v1031_v39 }
0x1e90   :  { %2958 = vmatpush3.bf16.msra.mxu0 %v3395_v6  ;;  %2959 = vmatprep.mubr.msk.bf16.mxu0 %vm3338_vm0, %v3337_v1 }
0x1e91   :  { %2969 = vmatprep.subr.bf16.mxu0 %v3337_v1 }
0x1f62   :  { %v1069_v40 = vpop.f32.mrb[16].mxu0 }
0x1f63   :  { %v1076_v41 = vrot.slane %v1069_v40, 5  ;;  %v2949_v42 = vpop.f32.mrb[17].mxu0 }
0x1f64   :  { %v1072_v43 = vpop.f32.mrb[18].mxu0 }
0x1f65   :  { %v1078_v44 = vadd.f32 %v1076_v41, %v3435_v26  ;;  %v2950_v45 = vpop.f32.mrb[19].mxu0 }
0x1f67   :  { %3173 = vtanh.f32 %v1078_v44  ;;  %v2745_v47 = vmul.f32 -1.442695, %v1078_v44 }
0x1f69   :  { %3175 = vpow2.f32 %v2745_v47 }
0x1f71   :  { %v3174_v46 = vpop.eup %3173 }
0x1f72   :  { %1091 = vrot.lane.b32.xlu0 %v3174_v46, %s3340_s0 }
0x1f73   :  { %v3176_v48 = vpop.eup %3175 }
0x1f74   :  { %v1082_v49 = vadd.f32 1.0, %v3176_v48 }
0x1f76   :  { %3177 = vrcp.f32 %v1082_v49 }
0x1f80   :  { %v3178_v50 = vpop.eup %3177 }
0x1f81   :  { %v1089_v54 = vmul.f32 %v3178_v50, %v1087_v53 }
0x1fe4   :  { %v1092_v51 = vpop.permute.xlu0 %1091 }
0x1fe5   :  { %v1094_v52 = vmul.f32 %v3178_v50, %v1092_v51 }
0x1fe7   :  { %1096 = vrot.lane.b32.xlu1 %v1094_v52, %s3341_s3 }
0x2059   :  { %v1097_v55 = vpop.permute.xlu1 %1096 }
0x205a   :  { %v1099_v56 = vadd.f32 %v1097_v55, %v1089_v54 }
0x205c   :  { %3179 = vtanh.f32 %v1099_v56  ;;  %v1168_v15 = vrot.slane %v1099_v56, 7 }
0x2066   :  { %v3180_v57 = vpop.eup %3179 }
0x2067   :  { %1102 = vrot.lane.b32.xlu0 %v3180_v57, %s3340_s0 }
0x20d9   :  { %v1103_v58 = vpop.permute.xlu0 %1102 }
0x20da   :  { %v1105_v59 = vmul.f32 %v3178_v50, %v1103_v58 }
0x20dc   :  { %v1106_v60 = vpack.c.bf16 %v1105_v59, %v1105_v59 }
0x20de   :  { %v1108_v61 = vshrl.u32 %v1106_v60, 16 }
0x20e0   :  { %v1110_v62 = vrot.slane %v1108_v61, 1 }
0x20e2   :  { %1111 = vrot.lane.b32.xlu1 %v1110_v62, %s3341_s3 }
0x2154   :  { %v1112_v63 = vpop.permute.xlu1 %1111 }
0x2155   :  { %2954 = vmatmul.mubr.msk.bf16.vlgmr.msra.gmra.mrb[32].mxu1 %vm161_vm2, %v1112_v63 }
0x2156   :  { %2964 = vmatpush3.bf16.msra.mxu1 %v3395_v6  ;;  %2965 = vmatprep.mubr.msk.bf16.mxu1 %vm3338_vm0, %v3337_v1 }
0x2157   :  { %2975 = vmatprep.subr.bf16.mxu1 %v3337_v1 }
0x2228   :  { %v1150_v0 = vpop.f32.mrb[32].mxu1 }
0x2229   :  { %v1157_v2 = vrot.slane %v1150_v0, 4  ;;  %v2955_v3 = vpop.f32.mrb[33].mxu1 }
0x222a   :  { %v1153_v4 = vpop.f32.mrb[34].mxu1 }
0x222b   :  { %v1159_v5 = vadd.f32 %v1157_v2, %v3435_v26  ;;  %v2956_v7 = vpop.f32.mrb[35].mxu1 }
0x222d   :  { %3181 = vtanh.f32 %v1159_v5  ;;  %v2747_v9 = vmul.f32 -1.442695, %v1159_v5 }
0x222f   :  { %3183 = vpow2.f32 %v2747_v9 }
0x2237   :  { %v3182_v8 = vpop.eup %3181 }
0x2238   :  { %1172 = vrot.lane.b32.xlu0 %v3182_v8, %s3340_s0 }
0x2239   :  { %v3184_v10 = vpop.eup %3183 }
0x223a   :  { %v1163_v11 = vadd.f32 1.0, %v3184_v10 }
0x223c   :  { %3185 = vrcp.f32 %v1163_v11 }
0x2246   :  { %v3186_v12 = vpop.eup %3185 }
0x2247   :  { %v1170_v16 = vmul.f32 %v3186_v12, %v1168_v15 }
0x22aa   :  { %v1173_v13 = vpop.permute.xlu0 %1172 }
0x22ab   :  { %v1175_v14 = vmul.f32 %v3186_v12, %v1173_v13 }
0x22ad   :  { %1177 = vrot.lane.b32.xlu1 %v1175_v14, %s3341_s3 }
0x231f   :  { %v1178_v17 = vpop.permute.xlu1 %1177 }
0x2320   :  { %v1180_v18 = vadd.f32 %v1178_v17, %v1170_v16 }
0x2322   :  { %3187 = vtanh.f32 %v1180_v18  ;;  %v1247_v41 = vrot.slane %v1180_v18, 7 }
0x232c   :  { %v3188_v19 = vpop.eup %3187 }
0x232d   :  { %1183 = vrot.lane.b32.xlu0 %v3188_v19, %s3340_s0 }
0x239f   :  { %v1184_v21 = vpop.permute.xlu0 %1183 }
0x23a0   :  { %v1186_v23 = vmul.f32 %v3186_v12, %v1184_v21 }
0x23a2   :  { %v1187_v22 = vpack.c.bf16 %v1186_v23, %v1186_v23 }
0x23a4   :  { %v1189_v25 = vrot.slane %v1187_v22, 2 }
0x23a6   :  { %1190 = vrot.lane.b32.xlu1 %v1189_v25, %s3341_s3 }
0x2418   :  { %v1191_v27 = vpop.permute.xlu1 %1190 }
0x2419   :  { %2960 = vmatmul.mubr.msk.bf16.vlgmr.msra.gmra.mrb[20].mxu0 %vm161_vm2, %v1191_v27 }
0x241a   :  { %2970 = vmatpush3.bf16.msra.mxu0 %v3395_v6  ;;  %2971 = vmatprep.mubr.msk.bf16.mxu0 %vm3338_vm0, %v3337_v1 }
0x241b   :  { %2981 = vmatprep.subr.bf16.mxu0 %v3337_v1 }
0x24ec   :  { %v1229_v28 = vpop.f32.mrb[20].mxu0 }
0x24ed   :  { %v1236_v29 = vrot.slane %v1229_v28, 3  ;;  %v2961_v30 = vpop.f32.mrb[21].mxu0 }
0x24ee   :  { %v1232_v31 = vpop.f32.mrb[22].mxu0 }
0x24ef   :  { %v1238_v32 = vadd.f32 %v1236_v29, %v3435_v26  ;;  %v2962_v33 = vpop.f32.mrb[23].mxu0 }
0x24f1   :  { %3189 = vtanh.f32 %v1238_v32  ;;  %v2749_v35 = vmul.f32 -1.442695, %v1238_v32 }
0x24f3   :  { %3191 = vpow2.f32 %v2749_v35 }
0x24fb   :  { %v3190_v34 = vpop.eup %3189 }
0x24fc   :  { %1251 = vrot.lane.b32.xlu0 %v3190_v34, %s3340_s0 }
0x24fd   :  { %v3192_v36 = vpop.eup %3191 }
0x24fe   :  { %v1242_v37 = vadd.f32 1.0, %v3192_v36 }
0x2500   :  { %3193 = vrcp.f32 %v1242_v37 }
0x250a   :  { %v3194_v38 = vpop.eup %3193 }
0x250b   :  { %v1249_v42 = vmul.f32 %v3194_v38, %v1247_v41 }
0x256e   :  { %v1252_v39 = vpop.permute.xlu0 %1251 }
0x256f   :  { %v1254_v40 = vmul.f32 %v3194_v38, %v1252_v39 }
0x2571   :  { %1256 = vrot.lane.b32.xlu1 %v1254_v40, %s3341_s3 }
0x25e3   :  { %v1257_v43 = vpop.permute.xlu1 %1256 }
0x25e4   :  { %v1259_v44 = vadd.f32 %v1257_v43, %v1249_v42 }
0x25e6   :  { %3195 = vtanh.f32 %v1259_v44  ;;  %v1328_v2 = vrot.slane %v1259_v44, 7 }
0x25f0   :  { %v3196_v45 = vpop.eup %3195 }
0x25f1   :  { %1262 = vrot.lane.b32.xlu0 %v3196_v45, %s3340_s0 }
0x2663   :  { %v1263_v46 = vpop.permute.xlu0 %1262 }
0x2664   :  { %v1265_v47 = vmul.f32 %v3194_v38, %v1263_v46 }
0x2666   :  { %v1266_v48 = vpack.c.bf16 %v1265_v47, %v1265_v47 }
0x2668   :  { %v1268_v49 = vshrl.u32 %v1266_v48, 16 }
0x266a   :  { %v1270_v50 = vrot.slane %v1268_v49, 2 }
0x266c   :  { %1271 = vrot.lane.b32.xlu1 %v1270_v50, %s3341_s3 }
0x26de   :  { %v1272_v51 = vpop.permute.xlu1 %1271 }
0x26df   :  { %2966 = vmatmul.mubr.msk.bf16.vlgmr.msra.gmra.mrb[36].mxu1 %vm161_vm2, %v1272_v51 }
0x26e0   :  { %2976 = vmatpush3.bf16.msra.mxu1 %v3395_v6  ;;  %2977 = vmatprep.mubr.msk.bf16.mxu1 %vm3338_vm0, %v3337_v1 }
0x26e1   :  { %2987 = vmatprep.subr.bf16.mxu1 %v3337_v1 }
0x27b2   :  { %v1310_v52 = vpop.f32.mrb[36].mxu1 }
0x27b3   :  { %v1317_v53 = vrot.slane %v1310_v52, 2  ;;  %v2967_v54 = vpop.f32.mrb[37].mxu1 }
0x27b4   :  { %v1313_v55 = vpop.f32.mrb[38].mxu1 }
0x27b5   :  { %v1319_v56 = vadd.f32 %v1317_v53, %v3435_v26  ;;  %v2968_v57 = vpop.f32.mrb[39].mxu1 }
0x27b7   :  { %3197 = vtanh.f32 %v1319_v56  ;;  %v2751_v59 = vmul.f32 -1.442695, %v1319_v56 }
0x27b9   :  { %3199 = vpow2.f32 %v2751_v59 }
0x27c1   :  { %v3198_v58 = vpop.eup %3197 }
0x27c2   :  { %1332 = vrot.lane.b32.xlu0 %v3198_v58, %s3340_s0 }
0x27c3   :  { %v3200_v60 = vpop.eup %3199 }
0x27c4   :  { %v1323_v61 = vadd.f32 1.0, %v3200_v60 }
0x27c6   :  { %3201 = vrcp.f32 %v1323_v61 }
0x27d0   :  { %v3202_v62 = vpop.eup %3201 }
0x27d1   :  { %v1330_v3 = vmul.f32 %v3202_v62, %v1328_v2 }
0x2834   :  { %v1333_v63 = vpop.permute.xlu0 %1332 }
0x2835   :  { %v1335_v0 = vmul.f32 %v3202_v62, %v1333_v63 }
0x2837   :  { %1337 = vrot.lane.b32.xlu1 %v1335_v0, %s3341_s3 }
0x28a9   :  { %v1338_v4 = vpop.permute.xlu1 %1337 }
0x28aa   :  { %v1340_v5 = vadd.f32 %v1338_v4, %v1330_v3 }
0x28ac   :  { %3203 = vtanh.f32 %v1340_v5  ;;  %v1407_v29 = vrot.slane %v1340_v5, 7 }
0x28b6   :  { %v3204_v7 = vpop.eup %3203 }
0x28b7   :  { %1343 = vrot.lane.b32.xlu0 %v3204_v7, %s3340_s0 }
0x2929   :  { %v1344_v8 = vpop.permute.xlu0 %1343 }
0x292a   :  { %v1346_v9 = vmul.f32 %v3202_v62, %v1344_v8 }
0x292c   :  { %v1347_v10 = vpack.c.bf16 %v1346_v9, %v1346_v9 }
0x292e   :  { %v1349_v11 = vrot.slane %v1347_v10, 3 }
0x2930   :  { %1350 = vrot.lane.b32.xlu1 %v1349_v11, %s3341_s3 }
0x29a2   :  { %v1351_v12 = vpop.permute.xlu1 %1350 }
0x29a3   :  { %2972 = vmatmul.mubr.msk.bf16.vlgmr.msra.gmra.mrb[24].mxu0 %vm161_vm2, %v1351_v12 }
0x29a4   :  { %2982 = vmatpush3.bf16.msra.mxu0 %v3395_v6  ;;  %2983 = vmatprep.mubr.msk.bf16.mxu0 %vm3338_vm0, %v3337_v1 }
0x29a5   :  { %2993 = vmatprep.subr.bf16.mxu0 %v3337_v1 }
0x2a76   :  { %v1389_v13 = vpop.f32.mrb[24].mxu0 }
0x2a77   :  { %v1396_v14 = vrot.slane %v1389_v13, 1  ;;  %v2973_v15 = vpop.f32.mrb[25].mxu0 }
0x2a78   :  { %v1392_v16 = vpop.f32.mrb[26].mxu0 }
0x2a79   :  { %v1398_v17 = vadd.f32 %v1396_v14, %v3435_v26  ;;  %v2974_v18 = vpop.f32.mrb[27].mxu0 }
0x2a7b   :  { %3205 = vtanh.f32 %v1398_v17  ;;  %v2753_v21 = vmul.f32 -1.442695, %v1398_v17 }
0x2a7d   :  { %3207 = vpow2.f32 %v2753_v21 }
0x2a85   :  { %v3206_v19 = vpop.eup %3205 }
0x2a86   :  { %1411 = vrot.lane.b32.xlu0 %v3206_v19, %s3340_s0 }
0x2a87   :  { %v3208_v23 = vpop.eup %3207 }
0x2a88   :  { %v1402_v22 = vadd.f32 1.0, %v3208_v23 }
0x2a8a   :  { %3209 = vrcp.f32 %v1402_v22 }
0x2a94   :  { %v3210_v25 = vpop.eup %3209 }
0x2a95   :  { %v1409_v30 = vmul.f32 %v3210_v25, %v1407_v29 }
0x2af8   :  { %v1412_v27 = vpop.permute.xlu0 %1411 }
0x2af9   :  { %v1414_v28 = vmul.f32 %v3210_v25, %v1412_v27 }
0x2afb   :  { %1416 = vrot.lane.b32.xlu1 %v1414_v28, %s3341_s3 }
0x2b6d   :  { %v1417_v31 = vpop.permute.xlu1 %1416 }
0x2b6e   :  { %v1419_v32 = vadd.f32 %v1417_v31, %v1409_v30 }
0x2b70   :  { %3211 = vtanh.f32 %v1419_v32  ;;  %v1485_v51 = vrot.slane %v1419_v32, 7 }
0x2b7a   :  { %v3212_v26 = vpop.eup %3211 }
0x2b7b   :  { %1422 = vrot.lane.b32.xlu0 %v3212_v26, %s3340_s0 }
0x2bed   :  { %v1423_v33 = vpop.permute.xlu0 %1422 }
0x2bee   :  { %v1425_v34 = vmul.f32 %v3210_v25, %v1423_v33 }
0x2bf0   :  { %v1426_v35 = vpack.c.bf16 %v1425_v34, %v1425_v34 }
0x2bf2   :  { %v1428_v36 = vshrl.u32 %v1426_v35, 16 }
0x2bf4   :  { %v1430_v37 = vrot.slane %v1428_v36, 3 }
0x2bf6   :  { %1431 = vrot.lane.b32.xlu1 %v1430_v37, %s3341_s3 }
0x2c68   :  { %v1432_v38 = vpop.permute.xlu1 %1431 }
0x2c69   :  { %2978 = vmatmul.mubr.msk.bf16.vlgmr.msra.gmra.mrb[40].mxu1 %vm161_vm2, %v1432_v38 }
0x2c6a   :  { %2988 = vmatpush3.bf16.msra.mxu1 %v3395_v6  ;;  %2989 = vmatprep.mubr.msk.bf16.mxu1 %vm3338_vm0, %v3337_v1 }
0x2c6b   :  { %2999 = vmatprep.subr.bf16.mxu1 %v3337_v1 }
0x2d3c   :  { %v1470_v39 = vpop.f32.mrb[40].mxu1 }
0x2d3d   :  { %v1476_v40 = vadd.f32 %v1470_v39, %v3429_v20  ;;  %v2979_v41 = vpop.f32.mrb[41].mxu1 }
0x2d3e   :  { %v1473_v42 = vpop.f32.mrb[42].mxu1 }
0x2d3f   :  { %3213 = vtanh.f32 %v1476_v40  ;;  %v2980_v43 = vpop.f32.mrb[43].mxu1  ;;  %v2755_v45 = vmul.f32 -1.442695, %v1476_v40 }
0x2d41   :  { %3215 = vpow2.f32 %v2755_v45 }
0x2d49   :  { %v3214_v44 = vpop.eup %3213 }
0x2d4a   :  { %1489 = vrot.lane.b32.xlu0 %v3214_v44, %s3340_s0 }
0x2d4b   :  { %v3216_v46 = vpop.eup %3215 }
0x2d4c   :  { %v1480_v47 = vadd.f32 1.0, %v3216_v46 }
0x2d4e   :  { %3217 = vrcp.f32 %v1480_v47 }
0x2d58   :  { %v3218_v48 = vpop.eup %3217 }
0x2d59   :  { %v1487_v52 = vmul.f32 %v3218_v48, %v1485_v51 }
0x2dbc   :  { %v1490_v49 = vpop.permute.xlu0 %1489 }
0x2dbd   :  { %v1492_v50 = vmul.f32 %v3218_v48, %v1490_v49 }
0x2dbf   :  { %1494 = vrot.lane.b32.xlu1 %v1492_v50, %s3341_s3 }
0x2e31   :  { %v1495_v53 = vpop.permute.xlu1 %1494 }
0x2e32   :  { %v1497_v54 = vadd.f32 %v1495_v53, %v1487_v52 }
0x2e34   :  { %3219 = vtanh.f32 %v1497_v54  ;;  %v1563_v11 = vrot.slane %v1497_v54, 7 }
0x2e3e   :  { %v3220_v55 = vpop.eup %3219 }
0x2e3f   :  { %1500 = vrot.lane.b32.xlu0 %v3220_v55, %s3340_s0 }
0x2eb1   :  { %v1501_v56 = vpop.permute.xlu0 %1500 }
0x2eb2   :  { %v1503_v57 = vmul.f32 %v3218_v48, %v1501_v56 }
0x2eb4   :  { %v1504_v58 = vpack.c.bf16 %v1503_v57, %v1503_v57 }
0x2eb6   :  { %1506 = vrot.lane.b32.xlu1 %v1504_v58, %s3341_s3 }
0x2f28   :  { %v1507_v59 = vpop.permute.xlu1 %1506 }
0x2f29   :  { %2984 = vmatmul.mubr.msk.bf16.vlgmr.msra.gmra.mrb[28].mxu0 %vm161_vm2, %v1507_v59 }
0x2f2a   :  { %2994 = vmatpush3.bf16.msra.mxu0 %v3395_v6  ;;  %2995 = vmatprep.mubr.msk.bf16.mxu0 %vm3338_vm0, %v3337_v1 }
0x2f2b   :  { %3005 = vmatprep.subr.bf16.mxu0 %v3337_v1 }
0x2ffc   :  { %v1545_v60 = vpop.f32.mrb[28].mxu0 }
0x2ffd   :  { %v1552_v61 = vrot.slane %v1545_v60, 7  ;;  %v2985_v62 = vpop.f32.mrb[29].mxu0 }
0x2ffe   :  { %v1548_v63 = vpop.f32.mrb[30].mxu0 }
0x2fff   :  { %v1554_v0 = vadd.f32 %v1552_v61, %v3429_v20  ;;  %v2986_v2 = vpop.f32.mrb[31].mxu0 }
0x3001   :  { %3221 = vtanh.f32 %v1554_v0  ;;  %v2757_v4 = vmul.f32 -1.442695, %v1554_v0 }
0x3003   :  { %3223 = vpow2.f32 %v2757_v4 }
0x300b   :  { %v3222_v3 = vpop.eup %3221 }
0x300c   :  { %1567 = vrot.lane.b32.xlu0 %v3222_v3, %s3340_s0 }
0x300d   :  { %v3224_v5 = vpop.eup %3223 }
0x300e   :  { %v1558_v7 = vadd.f32 1.0, %v3224_v5 }
0x3010   :  { %3225 = vrcp.f32 %v1558_v7 }
0x301a   :  { %v3226_v8 = vpop.eup %3225 }
0x301b   :  { %v1565_v12 = vmul.f32 %v3226_v8, %v1563_v11 }
0x307e   :  { %v1568_v9 = vpop.permute.xlu0 %1567 }
0x307f   :  { %v1570_v10 = vmul.f32 %v3226_v8, %v1568_v9 }
0x3081   :  { %1572 = vrot.lane.b32.xlu1 %v1570_v10, %s3341_s3 }
0x30f3   :  { %v1573_v13 = vpop.permute.xlu1 %1572 }
0x30f4   :  { %v1575_v14 = vadd.f32 %v1573_v13, %v1565_v12 }
0x30f6   :  { %3227 = vtanh.f32 %v1575_v14  ;;  %v1643_v36 = vrot.slane %v1575_v14, 7 }
0x3100   :  { %v3228_v15 = vpop.eup %3227 }
0x3101   :  { %1578 = vrot.lane.b32.xlu0 %v3228_v15, %s3340_s0 }
0x3173   :  { %v1579_v16 = vpop.permute.xlu0 %1578 }
0x3174   :  { %v1581_v17 = vmul.f32 %v3226_v8, %v1579_v16 }
0x3176   :  { %v1582_v18 = vpack.c.bf16 %v1581_v17, %v1581_v17 }
0x3178   :  { %v1584_v19 = vshrl.u32 %v1582_v18, 16 }
0x317a   :  { %1586 = vrot.lane.b32.xlu1 %v1584_v19, %s3341_s3 }
0x31ec   :  { %v1587_v21 = vpop.permute.xlu1 %1586 }
0x31ed   :  { %2990 = vmatmul.mubr.msk.bf16.vlgmr.msra.gmra.mrb[44].mxu1 %vm161_vm2, %v1587_v21 }
0x31ee   :  { %3000 = vmatpush3.bf16.msra.mxu1 %v3395_v6  ;;  %3001 = vmatprep.mubr.msk.bf16.mxu1 %vm3338_vm0, %v3337_v1 }
0x31ef   :  { %3011 = vmatprep.subr.bf16.mxu1 %v3337_v1 }
0x32c0   :  { %v1625_v23 = vpop.f32.mrb[44].mxu1 }
0x32c1   :  { %v1632_v22 = vrot.slane %v1625_v23, 6  ;;  %v2991_v25 = vpop.f32.mrb[45].mxu1 }
0x32c2   :  { %v1628_v27 = vpop.f32.mrb[46].mxu1 }
0x32c3   :  { %v1634_v28 = vadd.f32 %v1632_v22, %v3429_v20  ;;  %v2992_v29 = vpop.f32.mrb[47].mxu1 }
0x32c5   :  { %3229 = vtanh.f32 %v1634_v28  ;;  %v2759_v31 = vmul.f32 -1.442695, %v1634_v28 }
0x32c7   :  { %3231 = vpow2.f32 %v2759_v31 }
0x32cf   :  { %v3230_v30 = vpop.eup %3229 }
0x32d0   :  { %1647 = vrot.lane.b32.xlu0 %v3230_v30, %s3340_s0 }
0x32d1   :  { %v3232_v32 = vpop.eup %3231 }
0x32d2   :  { %v1638_v26 = vadd.f32 1.0, %v3232_v32 }
0x32d4   :  { %3233 = vrcp.f32 %v1638_v26 }
0x32de   :  { %v3234_v33 = vpop.eup %3233 }
0x32df   :  { %v1645_v37 = vmul.f32 %v3234_v33, %v1643_v36 }
0x3342   :  { %v1648_v34 = vpop.permute.xlu0 %1647 }
0x3343   :  { %v1650_v35 = vmul.f32 %v3234_v33, %v1648_v34 }
0x3345   :  { %1652 = vrot.lane.b32.xlu1 %v1650_v35, %s3341_s3 }
0x33b7   :  { %v1653_v38 = vpop.permute.xlu1 %1652 }
0x33b8   :  { %v1655_v39 = vadd.f32 %v1653_v38, %v1645_v37 }
0x33ba   :  { %3235 = vtanh.f32 %v1655_v39  ;;  %v1722_v59 = vrot.slane %v1655_v39, 7 }
0x33c4   :  { %v3236_v40 = vpop.eup %3235 }
0x33c5   :  { %1658 = vrot.lane.b32.xlu0 %v3236_v40, %s3340_s0 }
0x3437   :  { %v1659_v41 = vpop.permute.xlu0 %1658 }
0x3438   :  { %v1661_v42 = vmul.f32 %v3234_v33, %v1659_v41 }
0x343a   :  { %v1662_v43 = vpack.c.bf16 %v1661_v42, %v1661_v42 }
0x343c   :  { %v1664_v44 = vrot.slane %v1662_v43, 1 }
0x343e   :  { %1665 = vrot.lane.b32.xlu1 %v1664_v44, %s3341_s3 }
0x34b0   :  { %v1666_v45 = vpop.permute.xlu1 %1665 }
0x34b1   :  { %2996 = vmatmul.mubr.msk.bf16.vlgmr.msra.gmra.mrb[32].mxu0 %vm161_vm2, %v1666_v45 }
0x34b2   :  { %3006 = vmatpush3.bf16.msra.mxu0 %v3395_v6  ;;  %3007 = vmatprep.mubr.msk.bf16.mxu0 %vm3338_vm0, %v3337_v1 }
0x34b3   :  { %3017 = vmatprep.subr.bf16.mxu0 %v3337_v1 }
0x3584   :  { %v1704_v46 = vpop.f32.mrb[32].mxu0 }
0x3585   :  { %v1711_v47 = vrot.slane %v1704_v46, 5  ;;  %v2997_v48 = vpop.f32.mrb[33].mxu0 }
0x3586   :  { %v1707_v49 = vpop.f32.mrb[34].mxu0 }
0x3587   :  { %v1713_v50 = vadd.f32 %v1711_v47, %v3429_v20  ;;  %v2998_v51 = vpop.f32.mrb[35].mxu0 }
0x3589   :  { %3237 = vtanh.f32 %v1713_v50  ;;  %v2761_v53 = vmul.f32 -1.442695, %v1713_v50 }
0x358b   :  { %3239 = vpow2.f32 %v2761_v53 }
0x3593   :  { %v3238_v52 = vpop.eup %3237 }
0x3594   :  { %1726 = vrot.lane.b32.xlu0 %v3238_v52, %s3340_s0 }
0x3595   :  { %v3240_v54 = vpop.eup %3239 }
0x3596   :  { %v1717_v55 = vadd.f32 1.0, %v3240_v54 }
0x3598   :  { %3241 = vrcp.f32 %v1717_v55 }
0x35a2   :  { %v3242_v56 = vpop.eup %3241 }
0x35a3   :  { %v1724_v60 = vmul.f32 %v3242_v56, %v1722_v59 }
0x3606   :  { %v1727_v57 = vpop.permute.xlu0 %1726 }
0x3607   :  { %v1729_v58 = vmul.f32 %v3242_v56, %v1727_v57 }
0x3609   :  { %1731 = vrot.lane.b32.xlu1 %v1729_v58, %s3341_s3 }
0x367b   :  { %v1732_v61 = vpop.permute.xlu1 %1731 }
0x367c   :  { %v1734_v62 = vadd.f32 %v1732_v61, %v1724_v60 }
0x367e   :  { %3243 = vtanh.f32 %v1734_v62  ;;  %v1803_v23 = vrot.slane %v1734_v62, 7 }
0x3688   :  { %v3244_v63 = vpop.eup %3243 }
0x3689   :  { %1737 = vrot.lane.b32.xlu0 %v3244_v63, %s3340_s0 }
0x36fb   :  { %v1738_v0 = vpop.permute.xlu0 %1737 }
0x36fc   :  { %v1740_v2 = vmul.f32 %v3242_v56, %v1738_v0 }
0x36fe   :  { %v1741_v3 = vpack.c.bf16 %v1740_v2, %v1740_v2 }
0x3700   :  { %v1743_v4 = vshrl.u32 %v1741_v3, 16 }
0x3702   :  { %v1745_v5 = vrot.slane %v1743_v4, 1 }
0x3704   :  { %1746 = vrot.lane.b32.xlu1 %v1745_v5, %s3341_s3 }
0x3776   :  { %v1747_v7 = vpop.permute.xlu1 %1746 }
0x3777   :  { %3002 = vmatmul.mubr.msk.bf16.vlgmr.msra.gmra.mrb[48].mxu1 %vm161_vm2, %v1747_v7 }
0x3778   :  { %3012 = vmatpush3.bf16.msra.mxu1 %v3395_v6  ;;  %3013 = vmatprep.mubr.msk.bf16.mxu1 %vm3338_vm0, %v3337_v1 }
0x3779   :  { %3023 = vmatprep.subr.bf16.mxu1 %v3337_v1 }
0x384a   :  { %v1785_v8 = vpop.f32.mrb[48].mxu1 }
0x384b   :  { %v1792_v9 = vrot.slane %v1785_v8, 4  ;;  %v3003_v10 = vpop.f32.mrb[49].mxu1 }
0x384c   :  { %v1788_v11 = vpop.f32.mrb[50].mxu1 }
0x384d   :  { %v1794_v12 = vadd.f32 %v1792_v9, %v3429_v20  ;;  %v3004_v13 = vpop.f32.mrb[51].mxu1 }
0x384f   :  { %3245 = vtanh.f32 %v1794_v12  ;;  %v2763_v15 = vmul.f32 -1.442695, %v1794_v12 }
0x3851   :  { %3247 = vpow2.f32 %v2763_v15 }
0x3859   :  { %v3246_v14 = vpop.eup %3245 }
0x385a   :  { %1807 = vrot.lane.b32.xlu0 %v3246_v14, %s3340_s0 }
0x385b   :  { %v3248_v16 = vpop.eup %3247 }
0x385c   :  { %v1798_v17 = vadd.f32 1.0, %v3248_v16 }
0x385e   :  { %3249 = vrcp.f32 %v1798_v17 }
0x3868   :  { %v3250_v18 = vpop.eup %3249 }
0x3869   :  { %v1805_v22 = vmul.f32 %v3250_v18, %v1803_v23 }
0x38cc   :  { %v1808_v19 = vpop.permute.xlu0 %1807 }
0x38cd   :  { %v1810_v21 = vmul.f32 %v3250_v18, %v1808_v19 }
0x38cf   :  { %1812 = vrot.lane.b32.xlu1 %v1810_v21, %s3341_s3 }
0x3941   :  { %v1813_v25 = vpop.permute.xlu1 %1812 }
0x3942   :  { %v1815_v27 = vadd.f32 %v1813_v25, %v1805_v22 }
0x3944   :  { %3251 = vtanh.f32 %v1815_v27  ;;  %v1882_v46 = vrot.slane %v1815_v27, 7 }
0x394e   :  { %v3252_v28 = vpop.eup %3251 }
0x394f   :  { %1818 = vrot.lane.b32.xlu0 %v3252_v28, %s3340_s0 }
0x39c1   :  { %v1819_v29 = vpop.permute.xlu0 %1818 }
0x39c2   :  { %v1821_v30 = vmul.f32 %v3250_v18, %v1819_v29 }
0x39c4   :  { %v1822_v31 = vpack.c.bf16 %v1821_v30, %v1821_v30 }
0x39c6   :  { %v1824_v32 = vrot.slane %v1822_v31, 2 }
0x39c8   :  { %1825 = vrot.lane.b32.xlu1 %v1824_v32, %s3341_s3 }
0x3a3a   :  { %v1826_v26 = vpop.permute.xlu1 %1825 }
0x3a3b   :  { %3008 = vmatmul.mubr.msk.bf16.vlgmr.msra.gmra.mrb[36].mxu0 %vm161_vm2, %v1826_v26 }
0x3a3c   :  { %3018 = vmatpush3.bf16.msra.mxu0 %v3395_v6  ;;  %3019 = vmatprep.mubr.msk.bf16.mxu0 %vm3338_vm0, %v3337_v1 }
0x3a3d   :  { %3029 = vmatprep.subr.bf16.mxu0 %v3337_v1 }
0x3b0e   :  { %v1864_v33 = vpop.f32.mrb[36].mxu0 }
0x3b0f   :  { %v1871_v34 = vrot.slane %v1864_v33, 3  ;;  %v3009_v35 = vpop.f32.mrb[37].mxu0 }
0x3b10   :  { %v1867_v36 = vpop.f32.mrb[38].mxu0 }
0x3b11   :  { %v1873_v37 = vadd.f32 %v1871_v34, %v3429_v20  ;;  %v3010_v38 = vpop.f32.mrb[39].mxu0 }
0x3b13   :  { %3253 = vtanh.f32 %v1873_v37  ;;  %v2765_v40 = vmul.f32 -1.442695, %v1873_v37 }
0x3b15   :  { %3255 = vpow2.f32 %v2765_v40 }
0x3b1d   :  { %v3254_v39 = vpop.eup %3253 }
0x3b1e   :  { %1886 = vrot.lane.b32.xlu0 %v3254_v39, %s3340_s0 }
0x3b1f   :  { %v3256_v41 = vpop.eup %3255 }
0x3b20   :  { %v1877_v42 = vadd.f32 1.0, %v3256_v41 }
0x3b22   :  { %3257 = vrcp.f32 %v1877_v42 }
0x3b2c   :  { %v3258_v43 = vpop.eup %3257 }
0x3b2d   :  { %v1884_v47 = vmul.f32 %v3258_v43, %v1882_v46 }
0x3b90   :  { %v1887_v44 = vpop.permute.xlu0 %1886 }
0x3b91   :  { %v1889_v45 = vmul.f32 %v3258_v43, %v1887_v44 }
0x3b93   :  { %1891 = vrot.lane.b32.xlu1 %v1889_v45, %s3341_s3 }
0x3c05   :  { %v1892_v48 = vpop.permute.xlu1 %1891 }
0x3c06   :  { %v1894_v49 = vadd.f32 %v1892_v48, %v1884_v47 }
0x3c08   :  { %3259 = vtanh.f32 %v1894_v49  ;;  %v1963_v8 = vrot.slane %v1894_v49, 7 }
0x3c12   :  { %v3260_v50 = vpop.eup %3259 }
0x3c13   :  { %1897 = vrot.lane.b32.xlu0 %v3260_v50, %s3340_s0 }
0x3c85   :  { %v1898_v51 = vpop.permute.xlu0 %1897 }
0x3c86   :  { %v1900_v52 = vmul.f32 %v3258_v43, %v1898_v51 }
0x3c88   :  { %v1901_v53 = vpack.c.bf16 %v1900_v52, %v1900_v52 }
0x3c8a   :  { %v1903_v54 = vshrl.u32 %v1901_v53, 16 }
0x3c8c   :  { %v1905_v55 = vrot.slane %v1903_v54, 2 }
0x3c8e   :  { %1906 = vrot.lane.b32.xlu1 %v1905_v55, %s3341_s3 }
0x3d00   :  { %v1907_v56 = vpop.permute.xlu1 %1906 }
0x3d01   :  { %3014 = vmatmul.mubr.msk.bf16.vlgmr.msra.gmra.mrb[52].mxu1 %vm161_vm2, %v1907_v56 }
0x3d02   :  { %3024 = vmatpush3.bf16.msra.mxu1 %v3395_v6  ;;  %3025 = vmatprep.mubr.msk.bf16.mxu1 %vm3338_vm0, %v3337_v1 }
0x3d03   :  { %3035 = vmatprep.subr.bf16.mxu1 %v3337_v1 }
0x3dd4   :  { %v1945_v57 = vpop.f32.mrb[52].mxu1 }
0x3dd5   :  { %v1952_v58 = vrot.slane %v1945_v57, 2  ;;  %v3015_v59 = vpop.f32.mrb[53].mxu1 }
0x3dd6   :  { %v1948_v60 = vpop.f32.mrb[54].mxu1 }
0x3dd7   :  { %v1954_v61 = vadd.f32 %v1952_v58, %v3429_v20  ;;  %v3016_v62 = vpop.f32.mrb[55].mxu1 }
0x3dd9   :  { %3261 = vtanh.f32 %v1954_v61  ;;  %v2767_v0 = vmul.f32 -1.442695, %v1954_v61 }
0x3ddb   :  { %3263 = vpow2.f32 %v2767_v0 }
0x3de3   :  { %v3262_v63 = vpop.eup %3261 }
0x3de4   :  { %1967 = vrot.lane.b32.xlu0 %v3262_v63, %s3340_s0 }
0x3de5   :  { %v3264_v2 = vpop.eup %3263 }
0x3de6   :  { %v1958_v3 = vadd.f32 1.0, %v3264_v2 }
0x3de8   :  { %3265 = vrcp.f32 %v1958_v3 }
0x3df2   :  { %v3266_v4 = vpop.eup %3265 }
0x3df3   :  { %v1965_v9 = vmul.f32 %v3266_v4, %v1963_v8 }
0x3e56   :  { %v1968_v5 = vpop.permute.xlu0 %1967 }
0x3e57   :  { %v1970_v7 = vmul.f32 %v3266_v4, %v1968_v5 }
0x3e59   :  { %1972 = vrot.lane.b32.xlu1 %v1970_v7, %s3341_s3 }
0x3ecb   :  { %v1973_v10 = vpop.permute.xlu1 %1972 }
0x3ecc   :  { %v1975_v11 = vadd.f32 %v1973_v10, %v1965_v9 }
0x3ece   :  { %3267 = vtanh.f32 %v1975_v11  ;;  %v2042_v33 = vrot.slane %v1975_v11, 7 }
0x3ed8   :  { %v3268_v12 = vpop.eup %3267 }
0x3ed9   :  { %1978 = vrot.lane.b32.xlu0 %v3268_v12, %s3340_s0 }
0x3f4b   :  { %v1979_v13 = vpop.permute.xlu0 %1978 }
0x3f4c   :  { %v1981_v14 = vmul.f32 %v3266_v4, %v1979_v13 }
0x3f4e   :  { %v1982_v15 = vpack.c.bf16 %v1981_v14, %v1981_v14 }
0x3f50   :  { %v1984_v16 = vrot.slane %v1982_v15, 3 }
0x3f52   :  { %1985 = vrot.lane.b32.xlu1 %v1984_v16, %s3341_s3 }
0x3fc4   :  { %v1986_v17 = vpop.permute.xlu1 %1985 }
0x3fc5   :  { %3020 = vmatmul.mubr.msk.bf16.vlgmr.msra.gmra.mrb[40].mxu0 %vm161_vm2, %v1986_v17 }
0x3fc6   :  { %3030 = vmatpush3.bf16.msra.mxu0 %v3395_v6  ;;  %3031 = vmatprep.mubr.msk.bf16.mxu0 %vm3338_vm0, %v3337_v1 }
0x3fc7   :  { %3041 = vmatprep.subr.bf16.mxu0 %v3337_v1 }
0x4098   :  { %v2024_v18 = vpop.f32.mrb[40].mxu0 }
0x4099   :  { %v2031_v19 = vrot.slane %v2024_v18, 1  ;;  %v3021_v21 = vpop.f32.mrb[41].mxu0 }
0x409a   :  { %v2027_v23 = vpop.f32.mrb[42].mxu0 }
0x409b   :  { %v2033_v22 = vadd.f32 %v2031_v19, %v3429_v20  ;;  %v3022_v25 = vpop.f32.mrb[43].mxu0 }
0x409d   :  { %3269 = vtanh.f32 %v2033_v22  ;;  %v2769_v28 = vmul.f32 -1.442695, %v2033_v22 }
0x409f   :  { %3271 = vpow2.f32 %v2769_v28 }
0x40a7   :  { %v3270_v27 = vpop.eup %3269 }
0x40a8   :  { %2046 = vrot.lane.b32.xlu0 %v3270_v27, %s3340_s0 }
0x40a9   :  { %v3272_v29 = vpop.eup %3271 }
0x40aa   :  { %v2037_v30 = vadd.f32 1.0, %v3272_v29 }
0x40ac   :  { %3273 = vrcp.f32 %v2037_v30 }
0x40b6   :  { %v3274_v31 = vpop.eup %3273 }
0x40b7   :  { %v2044_v34 = vmul.f32 %v3274_v31, %v2042_v33 }
0x411a   :  { %v2047_v32 = vpop.permute.xlu0 %2046 }
0x411b   :  { %v2049_v26 = vmul.f32 %v3274_v31, %v2047_v32 }
0x411d   :  { %2051 = vrot.lane.b32.xlu1 %v2049_v26, %s3341_s3 }
0x418f   :  { %v2052_v35 = vpop.permute.xlu1 %2051 }
0x4190   :  { %v2054_v36 = vadd.f32 %v2052_v35, %v2044_v34 }
0x4192   :  { %3275 = vtanh.f32 %v2054_v36  ;;  %v2120_v55 = vrot.slane %v2054_v36, 7 }
0x419c   :  { %v3276_v20 = vpop.eup %3275 }
0x419d   :  { %2057 = vrot.lane.b32.xlu0 %v3276_v20, %s3340_s0 }
0x420f   :  { %v2058_v37 = vpop.permute.xlu0 %2057 }
0x4210   :  { %v2060_v38 = vmul.f32 %v3274_v31, %v2058_v37 }
0x4212   :  { %v2061_v39 = vpack.c.bf16 %v2060_v38, %v2060_v38 }
0x4214   :  { %v2063_v40 = vshrl.u32 %v2061_v39, 16 }
0x4216   :  { %v2065_v41 = vrot.slane %v2063_v40, 3 }
0x4218   :  { %2066 = vrot.lane.b32.xlu1 %v2065_v41, %s3341_s3 }
0x428a   :  { %v2067_v42 = vpop.permute.xlu1 %2066 }
0x428b   :  { %3026 = vmatmul.mubr.msk.bf16.vlgmr.msra.gmra.mrb[56].mxu1 %vm161_vm2, %v2067_v42 }
0x428c   :  { %3036 = vmatpush3.bf16.msra.mxu1 %v3395_v6  ;;  %3037 = vmatprep.mubr.msk.bf16.mxu1 %vm3338_vm0, %v3337_v1 }
0x428d   :  { %3047 = vmatprep.subr.bf16.mxu1 %v3337_v1 }
0x435e   :  { %v2105_v43 = vpop.f32.mrb[56].mxu1 }
0x435f   :  { %v2111_v44 = vadd.f32 %v2105_v43, %v3433_v24  ;;  %v3027_v45 = vpop.f32.mrb[57].mxu1 }
0x4360   :  { %v2108_v46 = vpop.f32.mrb[58].mxu1 }
0x4361   :  { %3277 = vtanh.f32 %v2111_v44  ;;  %v3028_v47 = vpop.f32.mrb[59].mxu1  ;;  %v2771_v49 = vmul.f32 -1.442695, %v2111_v44 }
0x4363   :  { %3279 = vpow2.f32 %v2771_v49 }
0x436b   :  { %v3278_v48 = vpop.eup %3277 }
0x436c   :  { %2124 = vrot.lane.b32.xlu0 %v3278_v48, %s3340_s0 }
0x436d   :  { %v3280_v50 = vpop.eup %3279 }
0x436e   :  { %v2115_v51 = vadd.f32 1.0, %v3280_v50 }
0x4370   :  { %3281 = vrcp.f32 %v2115_v51 }
0x437a   :  { %v3282_v52 = vpop.eup %3281 }
0x437b   :  { %v2122_v56 = vmul.f32 %v3282_v52, %v2120_v55 }
0x43de   :  { %v2125_v53 = vpop.permute.xlu0 %2124 }
0x43df   :  { %v2127_v54 = vmul.f32 %v3282_v52, %v2125_v53 }
0x43e1   :  { %2129 = vrot.lane.b32.xlu1 %v2127_v54, %s3341_s3 }
0x4453   :  { %v2130_v57 = vpop.permute.xlu1 %2129 }
0x4454   :  { %v2132_v58 = vadd.f32 %v2130_v57, %v2122_v56 }
0x4456   :  { %3283 = vtanh.f32 %v2132_v58  ;;  %v2198_v15 = vrot.slane %v2132_v58, 7 }
0x4460   :  { %v3284_v59 = vpop.eup %3283 }
0x4461   :  { %2135 = vrot.lane.b32.xlu0 %v3284_v59, %s3340_s0 }
0x44d3   :  { %v2136_v60 = vpop.permute.xlu0 %2135 }
0x44d4   :  { %v2138_v61 = vmul.f32 %v3282_v52, %v2136_v60 }
0x44d6   :  { %v2139_v62 = vpack.c.bf16 %v2138_v61, %v2138_v61 }
0x44d8   :  { %2141 = vrot.lane.b32.xlu1 %v2139_v62, %s3341_s3 }
0x454a   :  { %v2142_v63 = vpop.permute.xlu1 %2141 }
0x454b   :  { %3032 = vmatmul.mubr.msk.bf16.vlgmr.msra.gmra.mrb[44].mxu0 %vm161_vm2, %v2142_v63 }
0x454c   :  { %3042 = vmatpush3.bf16.msra.mxu0 %v3395_v6  ;;  %3043 = vmatprep.mubr.msk.bf16.mxu0 %vm3338_vm0, %v3337_v1 }
0x454d   :  { %3053 = vmatprep.subr.bf16.mxu0 %v3337_v1 }
0x461e   :  { %v2180_v0 = vpop.f32.mrb[44].mxu0 }
0x461f   :  { %v2187_v2 = vrot.slane %v2180_v0, 7  ;;  %v3033_v3 = vpop.f32.mrb[45].mxu0 }
0x4620   :  { %v2183_v4 = vpop.f32.mrb[46].mxu0 }
0x4621   :  { %v2189_v5 = vadd.f32 %v2187_v2, %v3433_v24  ;;  %v3034_v7 = vpop.f32.mrb[47].mxu0 }
0x4623   :  { %3285 = vtanh.f32 %v2189_v5  ;;  %v2773_v9 = vmul.f32 -1.442695, %v2189_v5 }
0x4625   :  { %3287 = vpow2.f32 %v2773_v9 }
0x462d   :  { %v3286_v8 = vpop.eup %3285 }
0x462e   :  { %2202 = vrot.lane.b32.xlu0 %v3286_v8, %s3340_s0 }
0x462f   :  { %v3288_v10 = vpop.eup %3287 }
0x4630   :  { %v2193_v11 = vadd.f32 1.0, %v3288_v10 }
0x4632   :  { %3289 = vrcp.f32 %v2193_v11 }
0x463c   :  { %v3290_v12 = vpop.eup %3289 }
0x463d   :  { %v2200_v16 = vmul.f32 %v3290_v12, %v2198_v15 }
0x46a0   :  { %v2203_v13 = vpop.permute.xlu0 %2202 }
0x46a1   :  { %v2205_v14 = vmul.f32 %v3290_v12, %v2203_v13 }
0x46a3   :  { %2207 = vrot.lane.b32.xlu1 %v2205_v14, %s3341_s3 }
0x4715   :  { %v2208_v17 = vpop.permute.xlu1 %2207 }
0x4716   :  { %v2210_v18 = vadd.f32 %v2208_v17, %v2200_v16 }
0x4718   :  { %3291 = vtanh.f32 %v2210_v18  ;;  %v2278_v39 = vrot.slane %v2210_v18, 7 }
0x4722   :  { %v3292_v19 = vpop.eup %3291 }
0x4723   :  { %2213 = vrot.lane.b32.xlu0 %v3292_v19, %s3340_s0 }
0x4795   :  { %v2214_v21 = vpop.permute.xlu0 %2213 }
0x4796   :  { %v2216_v23 = vmul.f32 %v3290_v12, %v2214_v21 }
0x4798   :  { %v2217_v22 = vpack.c.bf16 %v2216_v23, %v2216_v23 }
0x479a   :  { %v2219_v25 = vshrl.u32 %v2217_v22, 16 }
0x479c   :  { %2221 = vrot.lane.b32.xlu1 %v2219_v25, %s3341_s3 }
0x480e   :  { %v2222_v27 = vpop.permute.xlu1 %2221 }
0x480f   :  { %3038 = vmatmul.mubr.msk.bf16.vlgmr.msra.gmra.mrb[60].mxu1 %vm161_vm2, %v2222_v27 }
0x4810   :  { %3048 = vmatpush3.bf16.msra.mxu1 %v3395_v6  ;;  %3049 = vmatprep.mubr.msk.bf16.mxu1 %vm3338_vm0, %v3337_v1 }
0x4811   :  { %3059 = vmatprep.subr.bf16.mxu1 %v3337_v1 }
0x48e2   :  { %v2260_v28 = vpop.f32.mrb[60].mxu1 }
0x48e3   :  { %v2267_v29 = vrot.slane %v2260_v28, 6  ;;  %v3039_v30 = vpop.f32.mrb[61].mxu1 }
0x48e4   :  { %v2263_v31 = vpop.f32.mrb[62].mxu1 }
0x48e5   :  { %v2269_v32 = vadd.f32 %v2267_v29, %v3433_v24  ;;  %v3040_v26 = vpop.f32.mrb[63].mxu1 }
0x48e7   :  { %3293 = vtanh.f32 %v2269_v32  ;;  %v2775_v34 = vmul.f32 -1.442695, %v2269_v32 }
0x48e9   :  { %3295 = vpow2.f32 %v2775_v34 }
0x48f1   :  { %v3294_v33 = vpop.eup %3293 }
0x48f2   :  { %2282 = vrot.lane.b32.xlu0 %v3294_v33, %s3340_s0 }
0x48f3   :  { %v3296_v35 = vpop.eup %3295 }
0x48f4   :  { %v2273_v36 = vadd.f32 1.0, %v3296_v35 }
0x48f6   :  { %3297 = vrcp.f32 %v2273_v36 }
0x4900   :  { %v3298_v20 = vpop.eup %3297 }
0x4901   :  { %v2280_v40 = vmul.f32 %v3298_v20, %v2278_v39 }
0x4964   :  { %v2283_v37 = vpop.permute.xlu0 %2282 }
0x4965   :  { %v2285_v38 = vmul.f32 %v3298_v20, %v2283_v37 }
0x4967   :  { %2287 = vrot.lane.b32.xlu1 %v2285_v38, %s3341_s3 }
0x49d9   :  { %v2288_v41 = vpop.permute.xlu1 %2287 }
0x49da   :  { %v2290_v42 = vadd.f32 %v2288_v41, %v2280_v40 }
0x49dc   :  { %3299 = vtanh.f32 %v2290_v42  ;;  %v2357_v62 = vrot.slane %v2290_v42, 7 }
0x49e6   :  { %v3300_v43 = vpop.eup %3299 }
0x49e7   :  { %2293 = vrot.lane.b32.xlu0 %v3300_v43, %s3340_s0 }
0x4a59   :  { %v2294_v44 = vpop.permute.xlu0 %2293 }
0x4a5a   :  { %v2296_v45 = vmul.f32 %v3298_v20, %v2294_v44 }
0x4a5c   :  { %v2297_v46 = vpack.c.bf16 %v2296_v45, %v2296_v45 }
0x4a5e   :  { %v2299_v47 = vrot.slane %v2297_v46, 1 }
0x4a60   :  { %2300 = vrot.lane.b32.xlu1 %v2299_v47, %s3341_s3 }
0x4ad2   :  { %v2301_v48 = vpop.permute.xlu1 %2300 }
0x4ad3   :  { %3044 = vmatmul.mubr.msk.bf16.vlgmr.msra.gmra.mrb[48].mxu0 %vm161_vm2, %v2301_v48 }
0x4ad4   :  { %3054 = vmatpush3.bf16.msra.mxu0 %v3395_v6  ;;  %3055 = vmatprep.mubr.msk.bf16.mxu0 %vm3338_vm0, %v3337_v1 }
0x4ad5   :  { %3065 = vmatprep.subr.mxu0 %v3337_v1 }
0x4ba6   :  { %v2339_v49 = vpop.f32.mrb[48].mxu0 }
0x4ba7   :  { %v2346_v50 = vrot.slane %v2339_v49, 5  ;;  %v3045_v51 = vpop.f32.mrb[49].mxu0 }
0x4ba8   :  { %v2342_v52 = vpop.f32.mrb[50].mxu0 }
0x4ba9   :  { %v2348_v53 = vadd.f32 %v2346_v50, %v3433_v24  ;;  %v3046_v54 = vpop.f32.mrb[51].mxu0 }
0x4bab   :  { %3301 = vtanh.f32 %v2348_v53  ;;  %v2777_v56 = vmul.f32 -1.442695, %v2348_v53 }
0x4bad   :  { %3303 = vpow2.f32 %v2777_v56 }
0x4bb5   :  { %v3302_v55 = vpop.eup %3301 }
0x4bb6   :  { %2361 = vrot.lane.b32.xlu0 %v3302_v55, %s3340_s0 }
0x4bb7   :  { %v3304_v57 = vpop.eup %3303 }
0x4bb8   :  { %v2352_v58 = vadd.f32 1.0, %v3304_v57 }
0x4bba   :  { %3305 = vrcp.f32 %v2352_v58 }
0x4bc4   :  { %v3306_v59 = vpop.eup %3305 }
0x4bc5   :  { %v2359_v63 = vmul.f32 %v3306_v59, %v2357_v62 }
0x4c28   :  { %v2362_v60 = vpop.permute.xlu0 %2361 }
0x4c29   :  { %v2364_v61 = vmul.f32 %v3306_v59, %v2362_v60 }
0x4c2b   :  { %2366 = vrot.lane.b32.xlu1 %v2364_v61, %s3341_s3 }
0x4c9d   :  { %v2367_v0 = vpop.permute.xlu1 %2366 }
0x4c9e   :  { %v2369_v2 = vadd.f32 %v2367_v0, %v2359_v63 }
0x4ca0   :  { %3307 = vtanh.f32 %v2369_v2  ;;  %v2438_v25 = vrot.slane %v2369_v2, 7 }
0x4caa   :  { %v3308_v3 = vpop.eup %3307 }
0x4cab   :  { %2372 = vrot.lane.b32.xlu0 %v3308_v3, %s3340_s0 }
0x4d1d   :  { %v2373_v4 = vpop.permute.xlu0 %2372 }
0x4d1e   :  { %v2375_v5 = vmul.f32 %v3306_v59, %v2373_v4 }
0x4d20   :  { %v2376_v7 = vpack.c.bf16 %v2375_v5, %v2375_v5 }
0x4d22   :  { %v2378_v8 = vshrl.u32 %v2376_v7, 16 }
0x4d24   :  { %v2380_v9 = vrot.slane %v2378_v8, 1 }
0x4d26   :  { %2381 = vrot.lane.b32.xlu1 %v2380_v9, %s3341_s3 }
0x4d98   :  { %v2382_v10 = vpop.permute.xlu1 %2381 }
0x4d99   :  { %3050 = vmatmul.mubr.msk.bf16.vlgmr.msra.gmra.mrb[64].mxu1 %vm161_vm2, %v2382_v10 }
0x4d9a   :  { %3060 = vmatpush3.bf16.msra.mxu1 %v3395_v6  ;;  %3061 = vmatprep.mubr.msk.bf16.mxu1 %vm3338_vm0, %v3337_v1 }
0x4e6c   :  { %v2420_v11 = vpop.f32.mrb[64].mxu1 }
0x4e6d   :  { %v2427_v12 = vrot.slane %v2420_v11, 4  ;;  %v3051_v13 = vpop.f32.mrb[65].mxu1 }
0x4e6e   :  { %v2423_v14 = vpop.f32.mrb[66].mxu1 }
0x4e6f   :  { %v2429_v15 = vadd.f32 %v2427_v12, %v3433_v24  ;;  %v3052_v16 = vpop.f32.mrb[67].mxu1 }
0x4e71   :  { %3309 = vtanh.f32 %v2429_v15  ;;  %v2779_v18 = vmul.f32 -1.442695, %v2429_v15 }
0x4e73   :  { %3311 = vpow2.f32 %v2779_v18 }
0x4e7b   :  { %v3310_v17 = vpop.eup %3309 }
0x4e7c   :  { %2442 = vrot.lane.b32.xlu0 %v3310_v17, %s3340_s0  ;;  %v2618_v17 = vld [vmem:[%s3750_s5] sm:$0x1] }
0x4e7d   :  { %v3312_v19 = vpop.eup %3311 }
0x4e7e   :  { %v2433_v21 = vadd.f32 1.0, %v3312_v19 }
0x4e80   :  { %3313 = vrcp.f32 %v2433_v21 }
0x4e8a   :  { %v3314_v6 = vpop.eup %3313 }
0x4e8b   :  { %v2440_v27 = vmul.f32 %v3314_v6, %v2438_v25 }
0x4eee   :  { %v2443_v23 = vpop.permute.xlu0 %2442 }
0x4eef   :  { %v2445_v22 = vmul.f32 %v3314_v6, %v2443_v23 }
0x4ef1   :  { %2447 = vrot.lane.b32.xlu1 %v2445_v22, %s3341_s3 }
0x4f63   :  { %v2448_v28 = vpop.permute.xlu1 %2447 }
0x4f64   :  { %v2450_v29 = vadd.f32 %v2448_v28, %v2440_v27 }
0x4f66   :  { %3315 = vtanh.f32 %v2450_v29 }
0x4f70   :  { %v3316_v30 = vpop.eup %3315 }
0x4f71   :  { %2453 = vrot.lane.b32.xlu0 %v3316_v30, %s3340_s0 }
0x4fe3   :  { %v2454_v31 = vpop.permute.xlu0 %2453 }
0x4fe4   :  { %v2456_v32 = vmul.f32 %v3314_v6, %v2454_v31 }
0x4fe6   :  { %v2457_v26 = vpack.c.bf16 %v2456_v32, %v2456_v32 }
0x4fe8   :  { %v2459_v33 = vrot.slane %v2457_v26, 2 }
0x4fea   :  { %2460 = vrot.lane.b32.xlu1 %v2459_v33, %s3341_s3 }
0x505c   :  { %v2461_v34 = vpop.permute.xlu1 %2460 }
0x505d   :  { %3056 = vmatmul.mubr.msk.bf16.vlgmr.msra.gmra.mrb[52].mxu0 %vm161_vm2, %v2461_v34 }
0x505e   :  { %3067 = vmatprep.mubr.msk.f32.mxu0 %vm3338_vm0, %v3337_v1  ;;  %v2517_v1 = vrot.slane %v2450_v29, 7 }
0x5130   :  { %v2499_v35 = vpop.f32.mrb[52].mxu0 }
0x5131   :  { %v2506_v36 = vrot.slane %v2499_v35, 3  ;;  %v3057_v20 = vpop.f32.mrb[53].mxu0 }
0x5132   :  { %v2502_v37 = vpop.f32.mrb[54].mxu0 }
0x5133   :  { %v2508_v38 = vadd.f32 %v2506_v36, %v3433_v24  ;;  %v3058_v39 = vpop.f32.mrb[55].mxu0 }
0x5135   :  { %3317 = vtanh.f32 %v2508_v38  ;;  %v2781_v41 = vmul.f32 -1.442695, %v2508_v38 }
0x5137   :  { %3319 = vpow2.f32 %v2781_v41 }
0x513f   :  { %v3318_v40 = vpop.eup %3317 }
0x5140   :  { %2521 = vrot.lane.b32.xlu0 %v3318_v40, %s3340_s0 }
0x5141   :  { %v3320_v42 = vpop.eup %3319 }
0x5142   :  { %v2512_v43 = vadd.f32 1.0, %v3320_v42 }
0x5144   :  { %3321 = vrcp.f32 %v2512_v43 }
0x514e   :  { %v3322_v44 = vpop.eup %3321 }
0x514f   :  { %v2519_v47 = vmul.f32 %v3322_v44, %v2517_v1 }
0x51b2   :  { %v2522_v45 = vpop.permute.xlu0 %2521 }
0x51b3   :  { %v2524_v46 = vmul.f32 %v3322_v44, %v2522_v45 }
0x51b5   :  { %2526 = vrot.lane.b32.xlu1 %v2524_v46, %s3341_s3 }
0x5227   :  { %v2527_v48 = vpop.permute.xlu1 %2526 }
0x5228   :  { %v2529_v49 = vadd.f32 %v2527_v48, %v2519_v47 }
0x522a   :  { %3323 = vtanh.f32 %v2529_v49  ;;  %v2598_v8 = vrot.slane %v2529_v49, 7 }
0x5234   :  { %v3324_v50 = vpop.eup %3323 }
0x5235   :  { %2532 = vrot.lane.b32.xlu0 %v3324_v50, %s3340_s0 }
0x52a7   :  { %v2533_v51 = vpop.permute.xlu0 %2532 }
0x52a8   :  { %v2535_v52 = vmul.f32 %v3322_v44, %v2533_v51 }
0x52aa   :  { %v2536_v53 = vpack.c.bf16 %v2535_v52, %v2535_v52 }
0x52ac   :  { %v2538_v54 = vshrl.u32 %v2536_v53, 16 }
0x52ae   :  { %v2540_v55 = vrot.slane %v2538_v54, 2 }
0x52b0   :  { %2541 = vrot.lane.b32.xlu1 %v2540_v55, %s3341_s3 }
0x5322   :  { %v2542_v56 = vpop.permute.xlu1 %2541 }
0x5323   :  { %3062 = vmatmul.mubr.msk.bf16.vlgmr.msra.gmra.mrb[68].mxu1 %vm161_vm2, %v2542_v56 }
0x53f6   :  { %v2580_v57 = vpop.f32.mrb[68].mxu1 }
0x53f7   :  { %v2587_v58 = vrot.slane %v2580_v57, 2  ;;  %v3063_v59 = vpop.f32.mrb[69].mxu1 }
0x53f8   :  { %v2583_v60 = vpop.f32.mrb[70].mxu1 }
0x53f9   :  { %v2589_v61 = vadd.f32 %v2587_v58, %v3433_v24  ;;  %v3064_v62 = vpop.f32.mrb[71].mxu1  ;;  %v2617_v24 = vld [vmem:[%s3749_s4] sm:$0xff] }
0x53fa   :  { %3066 = vmatpush3.msra.mxu0 %v2617_v24 }
0x53fb   :  { %3325 = vtanh.f32 %v2589_v61  ;;  %v2783_v0 = vmul.f32 -1.442695, %v2589_v61 }
0x53fd   :  { %3327 = vpow2.f32 %v2783_v0 }
0x5405   :  { %v3326_v63 = vpop.eup %3325 }
0x5406   :  { %2602 = vrot.lane.b32.xlu0 %v3326_v63, %s3340_s0 }
0x5407   :  { %v3328_v2 = vpop.eup %3327 }
0x5408   :  { %v2593_v3 = vadd.f32 1.0, %v3328_v2 }
0x540a   :  { %3329 = vrcp.f32 %v2593_v3 }
0x5414   :  { %v3330_v4 = vpop.eup %3329 }
0x5415   :  { %v2600_v9 = vmul.f32 %v3330_v4, %v2598_v8 }
0x5478   :  { %v2603_v5 = vpop.permute.xlu0 %2602 }
0x5479   :  { %v2605_v7 = vmul.f32 %v3330_v4, %v2603_v5 }
0x547b   :  { %2607 = vrot.lane.b32.xlu1 %v2605_v7, %s3341_s3 }
0x54ed   :  { %v2608_v10 = vpop.permute.xlu1 %2607 }
0x54ee   :  { %v2610_v11 = vadd.f32 %v2608_v10, %v2600_v9 }
0x54f0   :  { %3331 = vtanh.f32 %v2610_v11 }
0x54fa   :  { %v3332_v12 = vpop.eup %3331 }
0x54fb   :  { %2613 = vrot.lane.b32.xlu0 %v3332_v12, %s3340_s0 }
0x556d   :  { %v2614_v13 = vpop.permute.xlu0 %2613 }
0x556e   :  { %v2616_v14 = vmul.f32 %v3330_v4, %v2614_v13 }
0x5570   :  { %v2620_v15 = vrot.slane %v2616_v14, 6 }
0x5572   :  { %2621 = vrot.lane.b32.xlu1 %v2620_v15, %s3341_s3 }
0x55e4   :  { %v2622_v16 = vpop.permute.xlu1 %2621 }
0x55e5   :  { %3068 = vmatmul.mubr.msk.f32.vlgmr.msra.gmra.mrb[56].mxu0 %vm161_vm2, %v2622_v16 }
0x56b8   :  { %v2691_v18 = vpop.f32.mrb[56].mxu0 }
0x56b9   :  { %v2692_v19 = vadd.f32 %v2691_v18, %v2618_v17  ;;  %v3069_v21 = vpop.f32.mrb[57].mxu0 }
0x56bb   :  { %v2696_v6 = vsel %vm2695_vm3, %v2692_v19, -inf }
0x56bc   :  { %2697 = vmax.xlane.f32.xlu0 %v2696_v6 }
0x5749   :  { %v2698_v23 = vpop.xlane.xlu0 %2697 }
0x574a   :  { %v2699_v22 = vsub.f32 %v2692_v19, %v2698_v23 }
0x574c   :  { %v2700_v25 = vmul.f32 1.442695, %v2699_v22 }
0x574e   :  { %3333 = vpow2.f32 %v2700_v25 }
0x5758   :  { %v3334_v27 = vpop.eup %3333 }
0x5759   :  { %v2702_v28 = vsel %vm2695_vm3, %v3334_v27, 0.0 }
0x575a   :  { %2703 = vadd.xlane.f32.xlu1 %v2702_v28 }
0x57e7   :  { %v2704_v29 = vpop.xlane.xlu1 %2703 }
0x57e8   :  { %3335 = vrcp.f32 %v2704_v29 }
0x57f2   :  { %v3336_v30 = vpop.eup %3335 }
0x57f3   :  { %v2706_v31 = vmul.f32 %v3336_v30, %v3334_v27 }
0x57f5   :  { %2707 = vst [vmem:[%s3751_s6] sm:$0x1] %v2706_v31 }

</bundles_post_ra>
